<compile_context>
chip_gen: v7x
topology: tpu7x:2x2x1
jax: 0.10.0
libtpu: 0.0.40
codegen_flags: <defaults>
</compile_context>

<pallas_src>
import jax
import jax.numpy as jnp
from jax.experimental import pallas as pl
from jax.experimental.pallas import tpu as pltpu

# ---- small, DISTANA-consistent configuration -------------------------------
B = 8            # batch_size  (folded into lanes: B*L = 128 lanes)
L = 16           # field_size
N = B * L        # lane extent of every activation tile
T = 8            # number of fused forward() calls (timesteps)
DYN_IN = 4       # pk_dyn_in_size
DYN_OUT = 4      # pk_dyn_out_size
LAT = 4          # pk_lat_size
PRE = 8          # pk_pre_layer_size
CELLS = 16       # pk_num_lstm_cells
LAT_P = 8        # lat channels padded to one f32 sublane tile
DIN_P = 8        # dyn-in channels padded to one f32 sublane tile
OUT_CH = DYN_OUT + LAT
# pk_conv_ksize=3, pk_conv_stride=1, pk_conv_padding=1 (length preserving)


# ---- Pallas kernel ----------------------------------------------------------
def _distana_kernel(dyn_ref, lat0_ref, h0_ref, c0_ref, mask_ref,
                    w_lat_ref, b_lat_ref,
                    w_pre_dyn_ref, w_pre_lat_ref, b_pre_ref,
                    w_g_ref, b_g_ref,
                    w_post_ref, b_post_ref,
                    out_ref, state_ref):
    n = lat0_ref.shape[-1]          # N = 128 (one vreg of lanes)
    t_steps = out_ref.shape[0]

    # precomputed batch/field-boundary masks (wrapper input, no in-loop iota)
    mask_m1_big = mask_ref[0:1, :]      # (1, T*N): zero where lane % L == 0
    mask_p1_big = mask_ref[1:2, :]      # (1, T*N): zero where lane % L == L-1
    mask_m1 = mask_m1_big[:, :n]        # per-step (1, N) views (aligned slice)
    mask_p1 = mask_p1_big[:, :n]

    def conv3(x, w, mm1, mp1, b=None):
        """Conv1d(k=3, s=1, p=1) over the field axis, batch folded into lanes.

        x: (C_in, lanes); w: (C_out, 3*C_in) = [tap0 | tap1 | tap2].
        Shifts are XLU rolls, zeroed at field boundaries by the lane masks.
        (v5e note: if the concat shows up as vst pressure, replace with three
         accumulating dots w0@x_m1 + w1@x + w2@x_p1.)
        """
        nn = x.shape[-1]
        x_m1 = mm1 * pltpu.roll(x, 1, 1)        # x[l-1]  (tap 0 partner)
        x_p1 = mp1 * pltpu.roll(x, nn - 1, 1)   # x[l+1]  (tap 2 partner)
        stacked = jnp.concatenate([x_m1, x, x_p1], axis=0)   # (3*C_in, lanes)
        out = jnp.dot(w, stacked, preferred_element_type=jnp.float32)
        return out if b is None else out + b

    # --- prologue: recurrence-independent dyn path of pre_layer for all T ----
    # one (PRE, 3*DIN_P) x (3*DIN_P, T*N) matmul; bias folded into the loop add
    pre_dyn_all = conv3(dyn_ref[...], w_pre_dyn_ref[...],
                        mask_m1_big, mask_p1_big)             # (PRE, T*N)

    # hoisted row-select mask: tanh only the lat rows of the post-layer output
    row = jax.lax.broadcasted_iota(jnp.int32, (OUT_CH, n), 0)
    lat_row_sel = row >= DYN_OUT

    # --- fully unrolled recurrence (carried state lives in vregs: ~5 vregs) --
    lat_slab = lat0_ref[...]     # (8, N): rows 0:4 dyn slot, rows 4:8 lat_out
    h = h0_ref[...]              # (CELLS, N)
    c = c0_ref[...]              # (CELLS, N)

    for t in range(t_steps):
        # pk_lat_in = lat_in_conv_layer(pk_lat_out)
        # (weight columns for the dyn rows of lat_slab are zero; output rows
        #  4:8 of the padded lat_in are zero by construction)
        lat_in = conv3(lat_slab, w_lat_ref[...], mask_m1, mask_p1,
                       b_lat_ref[...])                          # (8, N)

        # pre_act = tanh(pre_layer(cat(dyn_in, lat_in)))
        pre_dyn_t = pre_dyn_all[:, t * n:(t + 1) * n]           # static vreg slice
        pre_act = jnp.tanh(pre_dyn_t
                           + conv3(lat_in, w_pre_lat_ref[...], mask_m1, mask_p1)
                           + b_pre_ref[...])                    # (PRE, N)

        # ConvLSTM cell: gates = Conv1d(cat(pre_act, h)); i,f,o sigmoid, g tanh
        gates = conv3(jnp.concatenate([pre_act, h], axis=0),
                      w_g_ref[...], mask_m1, mask_p1, b_g_ref[...])  # (64, N)
        ifo = 0.5 * (jnp.tanh(0.5 * gates[:3 * CELLS]) + 1.0)   # one EUP block
        i_g = ifo[0 * CELLS:1 * CELLS]
        f_g = ifo[1 * CELLS:2 * CELLS]
        o_g = ifo[2 * CELLS:3 * CELLS]
        g_g = jnp.tanh(gates[3 * CELLS:])
        c = f_g * c + i_g * g_g
        h = o_g * jnp.tanh(c)

        # post_layer; dyn_out = post[:DYN_OUT], lat_out = tanh(post[DYN_OUT:])
        post = conv3(h, w_post_ref[...], mask_m1, mask_p1, b_post_ref[...])
        out_slab = jnp.where(lat_row_sel, jnp.tanh(post), post)  # (8, N)

        out_ref[t] = out_slab      # lane-dense, unmasked (8,128) store
        lat_slab = out_slab        # carried lat state (dyn rows masked by W)

    # final recurrent state, written once
    state_ref[...] = jnp.concatenate([h, c], axis=0)


# ---- layout helpers (plain JAX glue: fold/unfold batch into lanes) ----------
def _fold_state(x):          # (B, C, L) -> (C, B*L)
    return jnp.transpose(x, (1, 0, 2)).reshape(x.shape[1], -1)


def _fold_seq(x):            # (T, B, C, L) -> (T, C, B*L)
    return jnp.transpose(x, (0, 2, 1, 3)).reshape(x.shape[0], x.shape[2], -1)


def _unfold_state(x, b):     # (C, B*L) -> (B, C, L)
    c, n = x.shape
    return jnp.transpose(x.reshape(c, b, n // b), (1, 0, 2))


def _unfold_seq(x, b):       # (T, C, B*L) -> (T, B, C, L)
    t, c, n = x.shape
    return jnp.transpose(x.reshape(t, c, b, n // b), (0, 2, 1, 3))


# ---- wrapper ----------------------------------------------------------------
def distana_forward_seq(dyn_seq, lat0, h0, c0, params):
    """Runs T fused DISTANA forward() steps in one (grid-less) pallas_call.

    dyn_seq: (T, B, DYN_IN, L); lat0: (B, LAT, L); h0, c0: (B, CELLS, L).
    Returns (dyn_out_seq, lat_out_seq, h_final, c_final) in torch NCL layout.
    """
    (w_lat, b_lat, w_pre, b_pre, w_g, b_g, w_post, b_post) = params
    t_steps, bb, _, ll = dyn_seq.shape
    n = bb * ll
    tn = t_steps * n

    def fuse_taps(w3):       # (C_out, C_in, 3) -> (C_out, 3*C_in), tap-major
        return jnp.concatenate([w3[:, :, 0], w3[:, :, 1], w3[:, :, 2]], axis=1)

    def bcast_bias(b_vec, rows):   # (C,) -> (rows, N), zero-padded rows
        b_pad = jnp.pad(b_vec, (0, rows - b_vec.shape[0]))
        return jnp.broadcast_to(b_pad[:, None], (rows, n)).astype(jnp.float32)

    # --- activations: fold batch into lanes, pad channels to sublane tiles ---
    dyn_f = _fold_seq(dyn_seq)                                   # (T, 4, N)
    dyn_all = jnp.transpose(dyn_f, (1, 0, 2)).reshape(DYN_IN, tn)
    dyn_all = jnp.pad(dyn_all, ((0, DIN_P - DYN_IN), (0, 0)))    # (8, T*N)

    lat_f = _fold_state(lat0)                                    # (4, N)
    lat_slab0 = jnp.zeros((OUT_CH, n), jnp.float32).at[DYN_OUT:, :].set(lat_f)
    h_f = _fold_state(h0)                                        # (16, N)
    c_f = _fold_state(c0)                                        # (16, N)

    # field-boundary masks for the lane-folded shifts (whole T*N slab)
    lane = jnp.arange(tn, dtype=jnp.int32)
    mask_big = jnp.stack([(lane % ll != 0), (lane % ll != ll - 1)],
                         axis=0).astype(jnp.float32)             # (2, T*N)

    # --- fused / padded weights ----------------------------------------------
    # lat_in_conv: input = carried slab [dyn_out(0:4) | lat_out(4:8)];
    # columns for the dyn rows are zero, output rows 4:8 stay zero.
    w_lat_p = (jnp.zeros((LAT_P, LAT_P, 3), jnp.float32)
               .at[:LAT, DYN_OUT:DYN_OUT + LAT, :].set(w_lat))
    # pre_layer split into dyn path (hoisted prologue) and lat path (in-loop)
    w_pre_dyn_p = (jnp.zeros((PRE, DIN_P, 3), jnp.float32)
                   .at[:, :DYN_IN, :].set(w_pre[:, :DYN_IN, :]))
    w_pre_lat_p = (jnp.zeros((PRE, LAT_P, 3), jnp.float32)
                   .at[:, :LAT, :].set(w_pre[:, DYN_IN:, :]))

    w_lat_f = fuse_taps(w_lat_p)          # (8, 24)
    w_pre_dyn_f = fuse_taps(w_pre_dyn_p)  # (8, 24)
    w_pre_lat_f = fuse_taps(w_pre_lat_p)  # (8, 24)
    w_g_f = fuse_taps(w_g)                # (64, 72)
    w_post_f = fuse_taps(w_post)          # (8, 48)

    b_lat_b = bcast_bias(b_lat, LAT_P)    # (8, N), rows 4:8 zero
    b_pre_b = bcast_bias(b_pre, PRE)      # (8, N)
    b_g_b = bcast_bias(b_g, 4 * CELLS)    # (64, N)
    b_post_b = bcast_bias(b_post, OUT_CH)  # (8, N)

    # --- single grid-less pallas_call: everything resident in VMEM -----------
    out_seq, state = pl.pallas_call(
        _distana_kernel,
        out_shape=(jax.ShapeDtypeStruct((t_steps, OUT_CH, n), jnp.float32),
                   jax.ShapeDtypeStruct((2 * CELLS, n), jnp.float32)),
    )(dyn_all, lat_slab0, h_f, c_f, mask_big,
      w_lat_f, b_lat_b, w_pre_dyn_f, w_pre_lat_f, b_pre_b,
      w_g_f, b_g_b, w_post_f, b_post_b)

    dyn_out_seq = _unfold_seq(out_seq[:, :DYN_OUT], bb)
    lat_out_seq = _unfold_seq(out_seq[:, DYN_OUT:], bb)
    h_final = _unfold_state(state[:CELLS], bb)
    c_final = _unfold_state(state[CELLS:], bb)
    return dyn_out_seq, lat_out_seq, h_final, c_final


# ---- deterministic parameter init (PyTorch Conv1d-style uniform) -------------
def init_params(key):
    def conv_init(k, c_out, c_in, ksize=3):
        k1, k2 = jax.random.split(k)
        bound = 1.0 / float(jnp.sqrt(jnp.float32(c_in * ksize)))
        w = jax.random.uniform(k1, (c_out, c_in, ksize), jnp.float32, -bound, bound)
        b = jax.random.uniform(k2, (c_out,), jnp.float32, -bound, bound)
        return w, b

    keys = jax.random.split(key, 4)
    w_lat, b_lat = conv_init(keys[0], LAT, LAT)                 # lat_in_conv_layer
    w_pre, b_pre = conv_init(keys[1], PRE, DYN_IN + LAT)        # pre_layer
    w_g, b_g = conv_init(keys[2], 4 * CELLS, PRE + CELLS)       # clstm gates
    w_post, b_post = conv_init(keys[3], DYN_OUT + LAT, CELLS)   # post_layer
    return (w_lat, b_lat, w_pre, b_pre, w_g, b_g, w_post, b_post)


# ---- plain-JAX reference (mirrors the PyTorch module, one forward per step) --
def _conv1d_ref(x, w, b):
    xp = jnp.pad(x, ((0, 0), (0, 0), (1, 1)))
    out = b[None, :, None]
    for k in range(3):
        out = out + jnp.einsum('oi,bil->bol', w[:, :, k],
                               xp[:, :, k:k + x.shape[-1]],
                               precision=jax.lax.Precision.HIGHEST)
    return out


def distana_step_ref(dyn_in, lat_prev, h_prev, c_prev, params):
    (w_lat, b_lat, w_pre, b_pre, w_g, b_g, w_post, b_post) = params
    lat_in = _conv1d_ref(lat_prev, w_lat, b_lat)
    pre = jnp.tanh(_conv1d_ref(jnp.concatenate([dyn_in, lat_in], axis=1),
                               w_pre, b_pre))
    gates = _conv1d_ref(jnp.concatenate([pre, h_prev], axis=1), w_g, b_g)
    i_g = jax.nn.sigmoid(gates[:, 0 * CELLS:1 * CELLS])
    f_g = jax.nn.sigmoid(gates[:, 1 * CELLS:2 * CELLS])
    o_g = jax.nn.sigmoid(gates[:, 2 * CELLS:3 * CELLS])
    g_g = jnp.tanh(gates[:, 3 * CELLS:4 * CELLS])
    c_new = f_g * c_prev + i_g * g_g
    h_new = o_g * jnp.tanh(c_new)
    post = _conv1d_ref(h_new, w_post, b_post)
    return post[:, :DYN_OUT], jnp.tanh(post[:, -LAT:]), h_new, c_new


def distana_seq_ref(dyn_seq, lat0, h0, c0, params):
    lat, h, c = lat0, h0, c0
    dyn_outs, lat_outs = [], []
    for t in range(dyn_seq.shape[0]):
        dyn_out, lat, h, c = distana_step_ref(dyn_seq[t], lat, h, c, params)
        dyn_outs.append(dyn_out)
        lat_outs.append(lat)
    return jnp.stack(dyn_outs), jnp.stack(lat_outs), h, c


if __name__ == "__main__":
    key = jax.random.PRNGKey(0)
    kp, k1, k2, k3, k4 = jax.random.split(key, 5)
    params = init_params(kp)

    # dyn_in sequence and the module's recurrent tensors
    # (pk_lat_out, pk_lstm_h, pk_lstm_c) in torch NCL layout.
    dyn_seq = jax.random.normal(k1, (T, B, DYN_IN, L), jnp.float32)
    lat0 = jax.random.normal(k2, (B, LAT, L), jnp.float32) * 0.1
    h0 = jax.random.normal(k3, (B, CELLS, L), jnp.float32) * 0.1
    c0 = jax.random.normal(k4, (B, CELLS, L), jnp.float32) * 0.1

    run = jax.jit(distana_forward_seq)
    outs = run(dyn_seq, lat0, h0, c0, params)
    outs = jax.block_until_ready(outs)

    ref = distana_seq_ref(dyn_seq, lat0, h0, c0, params)
    for got, want in zip(outs, ref):
        assert got.shape == want.shape and got.dtype == want.dtype
        assert jnp.allclose(got, want, atol=1e-3, rtol=1e-3), \
            float(jnp.max(jnp.abs(got - want)))

    print("KERNEL_OK")
</pallas_src>

<mosaic_0001>
module attributes {stable_mosaic.version = 11 : i64} {
  func.func @_distana_kernel(%arg0: memref<8x1024xf32, #tpu.memory_space<vmem>>, %arg1: memref<8x128xf32, #tpu.memory_space<vmem>>, %arg2: memref<16x128xf32, #tpu.memory_space<vmem>>, %arg3: memref<16x128xf32, #tpu.memory_space<vmem>>, %arg4: memref<2x1024xf32, #tpu.memory_space<vmem>>, %arg5: memref<8x24xf32, #tpu.memory_space<vmem>>, %arg6: memref<8x128xf32, #tpu.memory_space<vmem>>, %arg7: memref<8x24xf32, #tpu.memory_space<vmem>>, %arg8: memref<8x24xf32, #tpu.memory_space<vmem>>, %arg9: memref<8x128xf32, #tpu.memory_space<vmem>>, %arg10: memref<64x72xf32, #tpu.memory_space<vmem>>, %arg11: memref<64x128xf32, #tpu.memory_space<vmem>>, %arg12: memref<8x48xf32, #tpu.memory_space<vmem>>, %arg13: memref<8x128xf32, #tpu.memory_space<vmem>>, %arg14: memref<8x8x128xf32, #tpu.memory_space<vmem>>, %arg15: memref<32x128xf32, #tpu.memory_space<vmem>>) attributes {dimension_semantics = [], scalar_prefetch = 0 : i64, scratch_operands = 0 : i64, tpu.core_type = #tpu.core_type<tc>} {
    %c0 = arith.constant 0 : index
    %c0_0 = arith.constant 0 : index
    %0 = vector.load %arg4[%c0, %c0_0] : memref<2x1024xf32, #tpu.memory_space<vmem>>, vector<1x1024xf32>
    %c1 = arith.constant 1 : index
    %c0_1 = arith.constant 0 : index
    %1 = vector.load %arg4[%c1, %c0_1] : memref<2x1024xf32, #tpu.memory_space<vmem>>, vector<1x1024xf32>
    %2 = vector.extract_strided_slice %0 {offsets = [0, 0], sizes = [1, 128], strides = [1, 1]} : vector<1x1024xf32> to vector<1x128xf32>
    %3 = vector.extract_strided_slice %1 {offsets = [0, 0], sizes = [1, 128], strides = [1, 1]} : vector<1x1024xf32> to vector<1x128xf32>
    %c0_2 = arith.constant 0 : index
    %c0_3 = arith.constant 0 : index
    %4 = vector.load %arg0[%c0_2, %c0_3] : memref<8x1024xf32, #tpu.memory_space<vmem>>, vector<8x1024xf32>
    %c0_4 = arith.constant 0 : index
    %c0_5 = arith.constant 0 : index
    %5 = vector.load %arg7[%c0_4, %c0_5] : memref<8x24xf32, #tpu.memory_space<vmem>>, vector<8x24xf32>
    %c1_i32 = arith.constant 1 : i32
    %6 = tpu.dynamic_rotate %4 by %c1_i32 dim 1 : vector<8x1024xf32>, i32 -> vector<8x1024xf32>
    %7 = vector.broadcast %0 : vector<1x1024xf32> to vector<8x1024xf32>
    %8 = arith.mulf %7, %6 : vector<8x1024xf32>
    %c1023_i32 = arith.constant 1023 : i32
    %9 = tpu.dynamic_rotate %4 by %c1023_i32 dim 1 : vector<8x1024xf32>, i32 -> vector<8x1024xf32>
    %10 = vector.broadcast %1 : vector<1x1024xf32> to vector<8x1024xf32>
    %11 = arith.mulf %10, %9 : vector<8x1024xf32>
    %12 = tpu.concatenate %8, %4, %11 in 0 : vector<8x1024xf32>, vector<8x1024xf32>, vector<8x1024xf32> -> vector<24x1024xf32>
    %cst = arith.constant dense<0.000000e+00> : vector<8x1024xf32>
    %13 = tpu.matmul %5, %12, %cst {dimension_numbers = #tpu.dot_dimension_numbers<[1], [0], [0], [1], [0, 0, 1, 1], [], []>} : vector<8x24xf32>, vector<24x1024xf32>, vector<8x1024xf32> -> vector<8x1024xf32>
    %14 = tpu.iota {dimensions = array<i32: 0>} : vector<8x128xi32>
    %c4_i32 = arith.constant 4 : i32
    %15 = vector.broadcast %c4_i32 : i32 to vector<8x128xi32>
    %16 = arith.cmpi sge, %14, %15 : vector<8x128xi32>
    %c0_6 = arith.constant 0 : index
    %c0_7 = arith.constant 0 : index
    %17 = vector.load %arg1[%c0_6, %c0_7] : memref<8x128xf32, #tpu.memory_space<vmem>>, vector<8x128xf32>
    %c0_8 = arith.constant 0 : index
    %c0_9 = arith.constant 0 : index
    %18 = vector.load %arg2[%c0_8, %c0_9] : memref<16x128xf32, #tpu.memory_space<vmem>>, vector<16x128xf32>
    %c0_10 = arith.constant 0 : index
    %c0_11 = arith.constant 0 : index
    %19 = vector.load %arg3[%c0_10, %c0_11] : memref<16x128xf32, #tpu.memory_space<vmem>>, vector<16x128xf32>
    %c0_12 = arith.constant 0 : index
    %c0_13 = arith.constant 0 : index
    %20 = vector.load %arg5[%c0_12, %c0_13] : memref<8x24xf32, #tpu.memory_space<vmem>>, vector<8x24xf32>
    %c0_14 = arith.constant 0 : index
    %c0_15 = arith.constant 0 : index
    %21 = vector.load %arg6[%c0_14, %c0_15] : memref<8x128xf32, #tpu.memory_space<vmem>>, vector<8x128xf32>
    %c1_i32_16 = arith.constant 1 : i32
    %22 = tpu.dynamic_rotate %17 by %c1_i32_16 dim 1 : vector<8x128xf32>, i32 -> vector<8x128xf32>
    %23 = vector.broadcast %2 : vector<1x128xf32> to vector<8x128xf32>
    %24 = arith.mulf %23, %22 : vector<8x128xf32>
    %c127_i32 = arith.constant 127 : i32
    %25 = tpu.dynamic_rotate %17 by %c127_i32 dim 1 : vector<8x128xf32>, i32 -> vector<8x128xf32>
    %26 = vector.broadcast %3 : vector<1x128xf32> to vector<8x128xf32>
    %27 = arith.mulf %26, %25 : vector<8x128xf32>
    %28 = tpu.concatenate %24, %17, %27 in 0 : vector<8x128xf32>, vector<8x128xf32>, vector<8x128xf32> -> vector<24x128xf32>
    %cst_17 = arith.constant dense<0.000000e+00> : vector<8x128xf32>
    %29 = tpu.matmul %20, %28, %cst_17 {dimension_numbers = #tpu.dot_dimension_numbers<[1], [0], [0], [1], [0, 0, 1, 1], [], []>} : vector<8x24xf32>, vector<24x128xf32>, vector<8x128xf32> -> vector<8x128xf32>
    %30 = arith.addf %29, %21 : vector<8x128xf32>
    %31 = vector.extract_strided_slice %13 {offsets = [0, 0], sizes = [8, 128], strides = [1, 1]} : vector<8x1024xf32> to vector<8x128xf32>
    %c0_18 = arith.constant 0 : index
    %c0_19 = arith.constant 0 : index
    %32 = vector.load %arg8[%c0_18, %c0_19] : memref<8x24xf32, #tpu.memory_space<vmem>>, vector<8x24xf32>
    %c1_i32_20 = arith.constant 1 : i32
    %33 = tpu.dynamic_rotate %30 by %c1_i32_20 dim 1 : vector<8x128xf32>, i32 -> vector<8x128xf32>
    %34 = vector.broadcast %2 : vector<1x128xf32> to vector<8x128xf32>
    %35 = arith.mulf %34, %33 : vector<8x128xf32>
    %c127_i32_21 = arith.constant 127 : i32
    %36 = tpu.dynamic_rotate %30 by %c127_i32_21 dim 1 : vector<8x128xf32>, i32 -> vector<8x128xf32>
    %37 = vector.broadcast %3 : vector<1x128xf32> to vector<8x128xf32>
    %38 = arith.mulf %37, %36 : vector<8x128xf32>
    %39 = tpu.concatenate %35, %30, %38 in 0 : vector<8x128xf32>, vector<8x128xf32>, vector<8x128xf32> -> vector<24x128xf32>
    %cst_22 = arith.constant dense<0.000000e+00> : vector<8x128xf32>
    %40 = tpu.matmul %32, %39, %cst_22 {dimension_numbers = #tpu.dot_dimension_numbers<[1], [0], [0], [1], [0, 0, 1, 1], [], []>} : vector<8x24xf32>, vector<24x128xf32>, vector<8x128xf32> -> vector<8x128xf32>
    %41 = arith.addf %31, %40 : vector<8x128xf32>
    %c0_23 = arith.constant 0 : index
    %c0_24 = arith.constant 0 : index
    %42 = vector.load %arg9[%c0_23, %c0_24] : memref<8x128xf32, #tpu.memory_space<vmem>>, vector<8x128xf32>
    %43 = arith.addf %41, %42 : vector<8x128xf32>
    %44 = math.tanh %43 : vector<8x128xf32>
    %45 = tpu.concatenate %44, %18 in 0 : vector<8x128xf32>, vector<16x128xf32> -> vector<24x128xf32>
    %c0_25 = arith.constant 0 : index
    %c0_26 = arith.constant 0 : index
    %46 = vector.load %arg10[%c0_25, %c0_26] : memref<64x72xf32, #tpu.memory_space<vmem>>, vector<64x72xf32>
    %c0_27 = arith.constant 0 : index
    %c0_28 = arith.constant 0 : index
    %47 = vector.load %arg11[%c0_27, %c0_28] : memref<64x128xf32, #tpu.memory_space<vmem>>, vector<64x128xf32>
    %c1_i32_29 = arith.constant 1 : i32
    %48 = tpu.dynamic_rotate %45 by %c1_i32_29 dim 1 : vector<24x128xf32>, i32 -> vector<24x128xf32>
    %49 = vector.broadcast %2 : vector<1x128xf32> to vector<24x128xf32>
    %50 = arith.mulf %49, %48 : vector<24x128xf32>
    %c127_i32_30 = arith.constant 127 : i32
    %51 = tpu.dynamic_rotate %45 by %c127_i32_30 dim 1 : vector<24x128xf32>, i32 -> vector<24x128xf32>
    %52 = vector.broadcast %3 : vector<1x128xf32> to vector<24x128xf32>
    %53 = arith.mulf %52, %51 : vector<24x128xf32>
    %54 = tpu.concatenate %50, %45, %53 in 0 : vector<24x128xf32>, vector<24x128xf32>, vector<24x128xf32> -> vector<72x128xf32>
    %cst_31 = arith.constant dense<0.000000e+00> : vector<64x128xf32>
    %55 = tpu.matmul %46, %54, %cst_31 {dimension_numbers = #tpu.dot_dimension_numbers<[1], [0], [0], [1], [0, 0, 1, 1], [], []>} : vector<64x72xf32>, vector<72x128xf32>, vector<64x128xf32> -> vector<64x128xf32>
    %56 = arith.addf %55, %47 : vector<64x128xf32>
    %57 = vector.extract_strided_slice %56 {offsets = [0, 0], sizes = [48, 128], strides = [1, 1]} : vector<64x128xf32> to vector<48x128xf32>
    %cst_32 = arith.constant 5.000000e-01 : f32
    %58 = vector.broadcast %cst_32 : f32 to vector<48x128xf32>
    %59 = arith.mulf %58, %57 : vector<48x128xf32>
    %60 = math.tanh %59 : vector<48x128xf32>
    %cst_33 = arith.constant 1.000000e+00 : f32
    %61 = vector.broadcast %cst_33 : f32 to vector<48x128xf32>
    %62 = arith.addf %60, %61 : vector<48x128xf32>
    %cst_34 = arith.constant 5.000000e-01 : f32
    %63 = vector.broadcast %cst_34 : f32 to vector<48x128xf32>
    %64 = arith.mulf %63, %62 : vector<48x128xf32>
    %65 = vector.extract_strided_slice %64 {offsets = [0, 0], sizes = [16, 128], strides = [1, 1]} : vector<48x128xf32> to vector<16x128xf32>
    %66 = vector.extract_strided_slice %64 {offsets = [16, 0], sizes = [16, 128], strides = [1, 1]} : vector<48x128xf32> to vector<16x128xf32>
    %67 = vector.extract_strided_slice %64 {offsets = [32, 0], sizes = [16, 128], strides = [1, 1]} : vector<48x128xf32> to vector<16x128xf32>
    %68 = vector.extract_strided_slice %56 {offsets = [48, 0], sizes = [16, 128], strides = [1, 1]} : vector<64x128xf32> to vector<16x128xf32>
    %69 = math.tanh %68 : vector<16x128xf32>
    %70 = arith.mulf %66, %19 : vector<16x128xf32>
    %71 = arith.mulf %65, %69 : vector<16x128xf32>
    %72 = arith.addf %70, %71 : vector<16x128xf32>
    %73 = math.tanh %72 : vector<16x128xf32>
    %74 = arith.mulf %67, %73 : vector<16x128xf32>
    %c0_35 = arith.constant 0 : index
    %c0_36 = arith.constant 0 : index
    %75 = vector.load %arg12[%c0_35, %c0_36] : memref<8x48xf32, #tpu.memory_space<vmem>>, vector<8x48xf32>
    %c0_37 = arith.constant 0 : index
    %c0_38 = arith.constant 0 : index
    %76 = vector.load %arg13[%c0_37, %c0_38] : memref<8x128xf32, #tpu.memory_space<vmem>>, vector<8x128xf32>
    %c1_i32_39 = arith.constant 1 : i32
    %77 = tpu.dynamic_rotate %74 by %c1_i32_39 dim 1 : vector<16x128xf32>, i32 -> vector<16x128xf32>
    %78 = vector.broadcast %2 : vector<1x128xf32> to vector<16x128xf32>
    %79 = arith.mulf %78, %77 : vector<16x128xf32>
    %c127_i32_40 = arith.constant 127 : i32
    %80 = tpu.dynamic_rotate %74 by %c127_i32_40 dim 1 : vector<16x128xf32>, i32 -> vector<16x128xf32>
    %81 = vector.broadcast %3 : vector<1x128xf32> to vector<16x128xf32>
    %82 = arith.mulf %81, %80 : vector<16x128xf32>
    %83 = tpu.concatenate %79, %74, %82 in 0 : vector<16x128xf32>, vector<16x128xf32>, vector<16x128xf32> -> vector<48x128xf32>
    %cst_41 = arith.constant dense<0.000000e+00> : vector<8x128xf32>
    %84 = tpu.matmul %75, %83, %cst_41 {dimension_numbers = #tpu.dot_dimension_numbers<[1], [0], [0], [1], [0, 0, 1, 1], [], []>} : vector<8x48xf32>, vector<48x128xf32>, vector<8x128xf32> -> vector<8x128xf32>
    %85 = arith.addf %84, %76 : vector<8x128xf32>
    %86 = math.tanh %85 : vector<8x128xf32>
    %87 = arith.select %16, %86, %85 : vector<8x128xi1>, vector<8x128xf32>
    %c0_42 = arith.constant 0 : index
    %c0_43 = arith.constant 0 : index
    %c0_44 = arith.constant 0 : index
    %88 = vector.load %arg14[%c0_42, %c0_43, %c0_44] : memref<8x8x128xf32, #tpu.memory_space<vmem>>, vector<1x8x128xf32>
    %89 = vector.shape_cast %88 : vector<1x8x128xf32> to vector<8x128xf32>
    %90 = vector.shape_cast %87 : vector<8x128xf32> to vector<1x8x128xf32>
    tpu.vector_store %arg14[%c0_42, %c0_43, %c0_44], %90 {strides = array<i32>} : memref<8x8x128xf32, #tpu.memory_space<vmem>>, vector<1x8x128xf32>,
    %c0_45 = arith.constant 0 : index
    %c0_46 = arith.constant 0 : index
    %91 = vector.load %arg5[%c0_45, %c0_46] : memref<8x24xf32, #tpu.memory_space<vmem>>, vector<8x24xf32>
    %c0_47 = arith.constant 0 : index
    %c0_48 = arith.constant 0 : index
    %92 = vector.load %arg6[%c0_47, %c0_48] : memref<8x128xf32, #tpu.memory_space<vmem>>, vector<8x128xf32>
    %c1_i32_49 = arith.constant 1 : i32
    %93 = tpu.dynamic_rotate %87 by %c1_i32_49 dim 1 : vector<8x128xf32>, i32 -> vector<8x128xf32>
    %94 = vector.broadcast %2 : vector<1x128xf32> to vector<8x128xf32>
    %95 = arith.mulf %94, %93 : vector<8x128xf32>
    %c127_i32_50 = arith.constant 127 : i32
    %96 = tpu.dynamic_rotate %87 by %c127_i32_50 dim 1 : vector<8x128xf32>, i32 -> vector<8x128xf32>
    %97 = vector.broadcast %3 : vector<1x128xf32> to vector<8x128xf32>
    %98 = arith.mulf %97, %96 : vector<8x128xf32>
    %99 = tpu.concatenate %95, %87, %98 in 0 : vector<8x128xf32>, vector<8x128xf32>, vector<8x128xf32> -> vector<24x128xf32>
    %cst_51 = arith.constant dense<0.000000e+00> : vector<8x128xf32>
    %100 = tpu.matmul %91, %99, %cst_51 {dimension_numbers = #tpu.dot_dimension_numbers<[1], [0], [0], [1], [0, 0, 1, 1], [], []>} : vector<8x24xf32>, vector<24x128xf32>, vector<8x128xf32> -> vector<8x128xf32>
    %101 = arith.addf %100, %92 : vector<8x128xf32>
    %102 = vector.extract_strided_slice %13 {offsets = [0, 128], sizes = [8, 128], strides = [1, 1]} : vector<8x1024xf32> to vector<8x128xf32>
    %c0_52 = arith.constant 0 : index
    %c0_53 = arith.constant 0 : index
    %103 = vector.load %arg8[%c0_52, %c0_53] : memref<8x24xf32, #tpu.memory_space<vmem>>, vector<8x24xf32>
    %c1_i32_54 = arith.constant 1 : i32
    %104 = tpu.dynamic_rotate %101 by %c1_i32_54 dim 1 : vector<8x128xf32>, i32 -> vector<8x128xf32>
    %105 = vector.broadcast %2 : vector<1x128xf32> to vector<8x128xf32>
    %106 = arith.mulf %105, %104 : vector<8x128xf32>
    %c127_i32_55 = arith.constant 127 : i32
    %107 = tpu.dynamic_rotate %101 by %c127_i32_55 dim 1 : vector<8x128xf32>, i32 -> vector<8x128xf32>
    %108 = vector.broadcast %3 : vector<1x128xf32> to vector<8x128xf32>
    %109 = arith.mulf %108, %107 : vector<8x128xf32>
    %110 = tpu.concatenate %106, %101, %109 in 0 : vector<8x128xf32>, vector<8x128xf32>, vector<8x128xf32> -> vector<24x128xf32>
    %cst_56 = arith.constant dense<0.000000e+00> : vector<8x128xf32>
    %111 = tpu.matmul %103, %110, %cst_56 {dimension_numbers = #tpu.dot_dimension_numbers<[1], [0], [0], [1], [0, 0, 1, 1], [], []>} : vector<8x24xf32>, vector<24x128xf32>, vector<8x128xf32> -> vector<8x128xf32>
    %112 = arith.addf %102, %111 : vector<8x128xf32>
    %c0_57 = arith.constant 0 : index
    %c0_58 = arith.constant 0 : index
    %113 = vector.load %arg9[%c0_57, %c0_58] : memref<8x128xf32, #tpu.memory_space<vmem>>, vector<8x128xf32>
    %114 = arith.addf %112, %113 : vector<8x128xf32>
    %115 = math.tanh %114 : vector<8x128xf32>
    %116 = tpu.concatenate %115, %74 in 0 : vector<8x128xf32>, vector<16x128xf32> -> vector<24x128xf32>
    %c0_59 = arith.constant 0 : index
    %c0_60 = arith.constant 0 : index
    %117 = vector.load %arg10[%c0_59, %c0_60] : memref<64x72xf32, #tpu.memory_space<vmem>>, vector<64x72xf32>
    %c0_61 = arith.constant 0 : index
    %c0_62 = arith.constant 0 : index
    %118 = vector.load %arg11[%c0_61, %c0_62] : memref<64x128xf32, #tpu.memory_space<vmem>>, vector<64x128xf32>
    %c1_i32_63 = arith.constant 1 : i32
    %119 = tpu.dynamic_rotate %116 by %c1_i32_63 dim 1 : vector<24x128xf32>, i32 -> vector<24x128xf32>
    %120 = vector.broadcast %2 : vector<1x128xf32> to vector<24x128xf32>
    %121 = arith.mulf %120, %119 : vector<24x128xf32>
    %c127_i32_64 = arith.constant 127 : i32
    %122 = tpu.dynamic_rotate %116 by %c127_i32_64 dim 1 : vector<24x128xf32>, i32 -> vector<24x128xf32>
    %123 = vector.broadcast %3 : vector<1x128xf32> to vector<24x128xf32>
    %124 = arith.mulf %123, %122 : vector<24x128xf32>
    %125 = tpu.concatenate %121, %116, %124 in 0 : vector<24x128xf32>, vector<24x128xf32>, vector<24x128xf32> -> vector<72x128xf32>
    %cst_65 = arith.constant dense<0.000000e+00> : vector<64x128xf32>
    %126 = tpu.matmul %117, %125, %cst_65 {dimension_numbers = #tpu.dot_dimension_numbers<[1], [0], [0], [1], [0, 0, 1, 1], [], []>} : vector<64x72xf32>, vector<72x128xf32>, vector<64x128xf32> -> vector<64x128xf32>
    %127 = arith.addf %126, %118 : vector<64x128xf32>
    %128 = vector.extract_strided_slice %127 {offsets = [0, 0], sizes = [48, 128], strides = [1, 1]} : vector<64x128xf32> to vector<48x128xf32>
    %cst_66 = arith.constant 5.000000e-01 : f32
    %129 = vector.broadcast %cst_66 : f32 to vector<48x128xf32>
    %130 = arith.mulf %129, %128 : vector<48x128xf32>
    %131 = math.tanh %130 : vector<48x128xf32>
    %cst_67 = arith.constant 1.000000e+00 : f32
    %132 = vector.broadcast %cst_67 : f32 to vector<48x128xf32>
    %133 = arith.addf %131, %132 : vector<48x128xf32>
    %cst_68 = arith.constant 5.000000e-01 : f32
    %134 = vector.broadcast %cst_68 : f32 to vector<48x128xf32>
    %135 = arith.mulf %134, %133 : vector<48x128xf32>
    %136 = vector.extract_strided_slice %135 {offsets = [0, 0], sizes = [16, 128], strides = [1, 1]} : vector<48x128xf32> to vector<16x128xf32>
    %137 = vector.extract_strided_slice %135 {offsets = [16, 0], sizes = [16, 128], strides = [1, 1]} : vector<48x128xf32> to vector<16x128xf32>
    %138 = vector.extract_strided_slice %135 {offsets = [32, 0], sizes = [16, 128], strides = [1, 1]} : vector<48x128xf32> to vector<16x128xf32>
    %139 = vector.extract_strided_slice %127 {offsets = [48, 0], sizes = [16, 128], strides = [1, 1]} : vector<64x128xf32> to vector<16x128xf32>
    %140 = math.tanh %139 : vector<16x128xf32>
    %141 = arith.mulf %137, %72 : vector<16x128xf32>
    %142 = arith.mulf %136, %140 : vector<16x128xf32>
    %143 = arith.addf %141, %142 : vector<16x128xf32>
    %144 = math.tanh %143 : vector<16x128xf32>
    %145 = arith.mulf %138, %144 : vector<16x128xf32>
    %c0_69 = arith.constant 0 : index
    %c0_70 = arith.constant 0 : index
    %146 = vector.load %arg12[%c0_69, %c0_70] : memref<8x48xf32, #tpu.memory_space<vmem>>, vector<8x48xf32>
    %c0_71 = arith.constant 0 : index
    %c0_72 = arith.constant 0 : index
    %147 = vector.load %arg13[%c0_71, %c0_72] : memref<8x128xf32, #tpu.memory_space<vmem>>, vector<8x128xf32>
    %c1_i32_73 = arith.constant 1 : i32
    %148 = tpu.dynamic_rotate %145 by %c1_i32_73 dim 1 : vector<16x128xf32>, i32 -> vector<16x128xf32>
    %149 = vector.broadcast %2 : vector<1x128xf32> to vector<16x128xf32>
    %150 = arith.mulf %149, %148 : vector<16x128xf32>
    %c127_i32_74 = arith.constant 127 : i32
    %151 = tpu.dynamic_rotate %145 by %c127_i32_74 dim 1 : vector<16x128xf32>, i32 -> vector<16x128xf32>
    %152 = vector.broadcast %3 : vector<1x128xf32> to vector<16x128xf32>
    %153 = arith.mulf %152, %151 : vector<16x128xf32>
    %154 = tpu.concatenate %150, %145, %153 in 0 : vector<16x128xf32>, vector<16x128xf32>, vector<16x128xf32> -> vector<48x128xf32>
    %cst_75 = arith.constant dense<0.000000e+00> : vector<8x128xf32>
    %155 = tpu.matmul %146, %154, %cst_75 {dimension_numbers = #tpu.dot_dimension_numbers<[1], [0], [0], [1], [0, 0, 1, 1], [], []>} : vector<8x48xf32>, vector<48x128xf32>, vector<8x128xf32> -> vector<8x128xf32>
    %156 = arith.addf %155, %147 : vector<8x128xf32>
    %157 = math.tanh %156 : vector<8x128xf32>
    %158 = arith.select %16, %157, %156 : vector<8x128xi1>, vector<8x128xf32>
    %c1_76 = arith.constant 1 : index
    %c0_77 = arith.constant 0 : index
    %c0_78 = arith.constant 0 : index
    %159 = vector.load %arg14[%c1_76, %c0_77, %c0_78] : memref<8x8x128xf32, #tpu.memory_space<vmem>>, vector<1x8x128xf32>
    %160 = vector.shape_cast %159 : vector<1x8x128xf32> to vector<8x128xf32>
    %161 = vector.shape_cast %158 : vector<8x128xf32> to vector<1x8x128xf32>
    tpu.vector_store %arg14[%c1_76, %c0_77, %c0_78], %161 {strides = array<i32>} : memref<8x8x128xf32, #tpu.memory_space<vmem>>, vector<1x8x128xf32>,
    %c0_79 = arith.constant 0 : index
    %c0_80 = arith.constant 0 : index
    %162 = vector.load %arg5[%c0_79, %c0_80] : memref<8x24xf32, #tpu.memory_space<vmem>>, vector<8x24xf32>
    %c0_81 = arith.constant 0 : index
    %c0_82 = arith.constant 0 : index
    %163 = vector.load %arg6[%c0_81, %c0_82] : memref<8x128xf32, #tpu.memory_space<vmem>>, vector<8x128xf32>
    %c1_i32_83 = arith.constant 1 : i32
    %164 = tpu.dynamic_rotate %158 by %c1_i32_83 dim 1 : vector<8x128xf32>, i32 -> vector<8x128xf32>
    %165 = vector.broadcast %2 : vector<1x128xf32> to vector<8x128xf32>
    %166 = arith.mulf %165, %164 : vector<8x128xf32>
    %c127_i32_84 = arith.constant 127 : i32
    %167 = tpu.dynamic_rotate %158 by %c127_i32_84 dim 1 : vector<8x128xf32>, i32 -> vector<8x128xf32>
    %168 = vector.broadcast %3 : vector<1x128xf32> to vector<8x128xf32>
    %169 = arith.mulf %168, %167 : vector<8x128xf32>
    %170 = tpu.concatenate %166, %158, %169 in 0 : vector<8x128xf32>, vector<8x128xf32>, vector<8x128xf32> -> vector<24x128xf32>
    %cst_85 = arith.constant dense<0.000000e+00> : vector<8x128xf32>
    %171 = tpu.matmul %162, %170, %cst_85 {dimension_numbers = #tpu.dot_dimension_numbers<[1], [0], [0], [1], [0, 0, 1, 1], [], []>} : vector<8x24xf32>, vector<24x128xf32>, vector<8x128xf32> -> vector<8x128xf32>
    %172 = arith.addf %171, %163 : vector<8x128xf32>
    %173 = vector.extract_strided_slice %13 {offsets = [0, 256], sizes = [8, 128], strides = [1, 1]} : vector<8x1024xf32> to vector<8x128xf32>
    %c0_86 = arith.constant 0 : index
    %c0_87 = arith.constant 0 : index
    %174 = vector.load %arg8[%c0_86, %c0_87] : memref<8x24xf32, #tpu.memory_space<vmem>>, vector<8x24xf32>
    %c1_i32_88 = arith.constant 1 : i32
    %175 = tpu.dynamic_rotate %172 by %c1_i32_88 dim 1 : vector<8x128xf32>, i32 -> vector<8x128xf32>
    %176 = vector.broadcast %2 : vector<1x128xf32> to vector<8x128xf32>
    %177 = arith.mulf %176, %175 : vector<8x128xf32>
    %c127_i32_89 = arith.constant 127 : i32
    %178 = tpu.dynamic_rotate %172 by %c127_i32_89 dim 1 : vector<8x128xf32>, i32 -> vector<8x128xf32>
    %179 = vector.broadcast %3 : vector<1x128xf32> to vector<8x128xf32>
    %180 = arith.mulf %179, %178 : vector<8x128xf32>
    %181 = tpu.concatenate %177, %172, %180 in 0 : vector<8x128xf32>, vector<8x128xf32>, vector<8x128xf32> -> vector<24x128xf32>
    %cst_90 = arith.constant dense<0.000000e+00> : vector<8x128xf32>
    %182 = tpu.matmul %174, %181, %cst_90 {dimension_numbers = #tpu.dot_dimension_numbers<[1], [0], [0], [1], [0, 0, 1, 1], [], []>} : vector<8x24xf32>, vector<24x128xf32>, vector<8x128xf32> -> vector<8x128xf32>
    %183 = arith.addf %173, %182 : vector<8x128xf32>
    %c0_91 = arith.constant 0 : index
    %c0_92 = arith.constant 0 : index
    %184 = vector.load %arg9[%c0_91, %c0_92] : memref<8x128xf32, #tpu.memory_space<vmem>>, vector<8x128xf32>
    %185 = arith.addf %183, %184 : vector<8x128xf32>
    %186 = math.tanh %185 : vector<8x128xf32>
    %187 = tpu.concatenate %186, %145 in 0 : vector<8x128xf32>, vector<16x128xf32> -> vector<24x128xf32>
    %c0_93 = arith.constant 0 : index
    %c0_94 = arith.constant 0 : index
    %188 = vector.load %arg10[%c0_93, %c0_94] : memref<64x72xf32, #tpu.memory_space<vmem>>, vector<64x72xf32>
    %c0_95 = arith.constant 0 : index
    %c0_96 = arith.constant 0 : index
    %189 = vector.load %arg11[%c0_95, %c0_96] : memref<64x128xf32, #tpu.memory_space<vmem>>, vector<64x128xf32>
    %c1_i32_97 = arith.constant 1 : i32
    %190 = tpu.dynamic_rotate %187 by %c1_i32_97 dim 1 : vector<24x128xf32>, i32 -> vector<24x128xf32>
    %191 = vector.broadcast %2 : vector<1x128xf32> to vector<24x128xf32>
    %192 = arith.mulf %191, %190 : vector<24x128xf32>
    %c127_i32_98 = arith.constant 127 : i32
    %193 = tpu.dynamic_rotate %187 by %c127_i32_98 dim 1 : vector<24x128xf32>, i32 -> vector<24x128xf32>
    %194 = vector.broadcast %3 : vector<1x128xf32> to vector<24x128xf32>
    %195 = arith.mulf %194, %193 : vector<24x128xf32>
    %196 = tpu.concatenate %192, %187, %195 in 0 : vector<24x128xf32>, vector<24x128xf32>, vector<24x128xf32> -> vector<72x128xf32>
    %cst_99 = arith.constant dense<0.000000e+00> : vector<64x128xf32>
    %197 = tpu.matmul %188, %196, %cst_99 {dimension_numbers = #tpu.dot_dimension_numbers<[1], [0], [0], [1], [0, 0, 1, 1], [], []>} : vector<64x72xf32>, vector<72x128xf32>, vector<64x128xf32> -> vector<64x128xf32>
    %198 = arith.addf %197, %189 : vector<64x128xf32>
    %199 = vector.extract_strided_slice %198 {offsets = [0, 0], sizes = [48, 128], strides = [1, 1]} : vector<64x128xf32> to vector<48x128xf32>
    %cst_100 = arith.constant 5.000000e-01 : f32
    %200 = vector.broadcast %cst_100 : f32 to vector<48x128xf32>
    %201 = arith.mulf %200, %199 : vector<48x128xf32>
    %202 = math.tanh %201 : vector<48x128xf32>
    %cst_101 = arith.constant 1.000000e+00 : f32
    %203 = vector.broadcast %cst_101 : f32 to vector<48x128xf32>
    %204 = arith.addf %202, %203 : vector<48x128xf32>
    %cst_102 = arith.constant 5.000000e-01 : f32
    %205 = vector.broadcast %cst_102 : f32 to vector<48x128xf32>
    %206 = arith.mulf %205, %204 : vector<48x128xf32>
    %207 = vector.extract_strided_slice %206 {offsets = [0, 0], sizes = [16, 128], strides = [1, 1]} : vector<48x128xf32> to vector<16x128xf32>
    %208 = vector.extract_strided_slice %206 {offsets = [16, 0], sizes = [16, 128], strides = [1, 1]} : vector<48x128xf32> to vector<16x128xf32>
    %209 = vector.extract_strided_slice %206 {offsets = [32, 0], sizes = [16, 128], strides = [1, 1]} : vector<48x128xf32> to vector<16x128xf32>
    %210 = vector.extract_strided_slice %198 {offsets = [48, 0], sizes = [16, 128], strides = [1, 1]} : vector<64x128xf32> to vector<16x128xf32>
    %211 = math.tanh %210 : vector<16x128xf32>
    %212 = arith.mulf %208, %143 : vector<16x128xf32>
    %213 = arith.mulf %207, %211 : vector<16x128xf32>
    %214 = arith.addf %212, %213 : vector<16x128xf32>
    %215 = math.tanh %214 : vector<16x128xf32>
    %216 = arith.mulf %209, %215 : vector<16x128xf32>
    %c0_103 = arith.constant 0 : index
    %c0_104 = arith.constant 0 : index
    %217 = vector.load %arg12[%c0_103, %c0_104] : memref<8x48xf32, #tpu.memory_space<vmem>>, vector<8x48xf32>
    %c0_105 = arith.constant 0 : index
    %c0_106 = arith.constant 0 : index
    %218 = vector.load %arg13[%c0_105, %c0_106] : memref<8x128xf32, #tpu.memory_space<vmem>>, vector<8x128xf32>
    %c1_i32_107 = arith.constant 1 : i32
    %219 = tpu.dynamic_rotate %216 by %c1_i32_107 dim 1 : vector<16x128xf32>, i32 -> vector<16x128xf32>
    %220 = vector.broadcast %2 : vector<1x128xf32> to vector<16x128xf32>
    %221 = arith.mulf %220, %219 : vector<16x128xf32>
    %c127_i32_108 = arith.constant 127 : i32
    %222 = tpu.dynamic_rotate %216 by %c127_i32_108 dim 1 : vector<16x128xf32>, i32 -> vector<16x128xf32>
    %223 = vector.broadcast %3 : vector<1x128xf32> to vector<16x128xf32>
    %224 = arith.mulf %223, %222 : vector<16x128xf32>
    %225 = tpu.concatenate %221, %216, %224 in 0 : vector<16x128xf32>, vector<16x128xf32>, vector<16x128xf32> -> vector<48x128xf32>
    %cst_109 = arith.constant dense<0.000000e+00> : vector<8x128xf32>
    %226 = tpu.matmul %217, %225, %cst_109 {dimension_numbers = #tpu.dot_dimension_numbers<[1], [0], [0], [1], [0, 0, 1, 1], [], []>} : vector<8x48xf32>, vector<48x128xf32>, vector<8x128xf32> -> vector<8x128xf32>
    %227 = arith.addf %226, %218 : vector<8x128xf32>
    %228 = math.tanh %227 : vector<8x128xf32>
    %229 = arith.select %16, %228, %227 : vector<8x128xi1>, vector<8x128xf32>
    %c2 = arith.constant 2 : index
    %c0_110 = arith.constant 0 : index
    %c0_111 = arith.constant 0 : index
    %230 = vector.load %arg14[%c2, %c0_110, %c0_111] : memref<8x8x128xf32, #tpu.memory_space<vmem>>, vector<1x8x128xf32>
    %231 = vector.shape_cast %230 : vector<1x8x128xf32> to vector<8x128xf32>
    %232 = vector.shape_cast %229 : vector<8x128xf32> to vector<1x8x128xf32>
    tpu.vector_store %arg14[%c2, %c0_110, %c0_111], %232 {strides = array<i32>} : memref<8x8x128xf32, #tpu.memory_space<vmem>>, vector<1x8x128xf32>,
    %c0_112 = arith.constant 0 : index
    %c0_113 = arith.constant 0 : index
    %233 = vector.load %arg5[%c0_112, %c0_113] : memref<8x24xf32, #tpu.memory_space<vmem>>, vector<8x24xf32>
    %c0_114 = arith.constant 0 : index
    %c0_115 = arith.constant 0 : index
    %234 = vector.load %arg6[%c0_114, %c0_115] : memref<8x128xf32, #tpu.memory_space<vmem>>, vector<8x128xf32>
    %c1_i32_116 = arith.constant 1 : i32
    %235 = tpu.dynamic_rotate %229 by %c1_i32_116 dim 1 : vector<8x128xf32>, i32 -> vector<8x128xf32>
    %236 = vector.broadcast %2 : vector<1x128xf32> to vector<8x128xf32>
    %237 = arith.mulf %236, %235 : vector<8x128xf32>
    %c127_i32_117 = arith.constant 127 : i32
    %238 = tpu.dynamic_rotate %229 by %c127_i32_117 dim 1 : vector<8x128xf32>, i32 -> vector<8x128xf32>
    %239 = vector.broadcast %3 : vector<1x128xf32> to vector<8x128xf32>
    %240 = arith.mulf %239, %238 : vector<8x128xf32>
    %241 = tpu.concatenate %237, %229, %240 in 0 : vector<8x128xf32>, vector<8x128xf32>, vector<8x128xf32> -> vector<24x128xf32>
    %cst_118 = arith.constant dense<0.000000e+00> : vector<8x128xf32>
    %242 = tpu.matmul %233, %241, %cst_118 {dimension_numbers = #tpu.dot_dimension_numbers<[1], [0], [0], [1], [0, 0, 1, 1], [], []>} : vector<8x24xf32>, vector<24x128xf32>, vector<8x128xf32> -> vector<8x128xf32>
    %243 = arith.addf %242, %234 : vector<8x128xf32>
    %244 = vector.extract_strided_slice %13 {offsets = [0, 384], sizes = [8, 128], strides = [1, 1]} : vector<8x1024xf32> to vector<8x128xf32>
    %c0_119 = arith.constant 0 : index
    %c0_120 = arith.constant 0 : index
    %245 = vector.load %arg8[%c0_119, %c0_120] : memref<8x24xf32, #tpu.memory_space<vmem>>, vector<8x24xf32>
    %c1_i32_121 = arith.constant 1 : i32
    %246 = tpu.dynamic_rotate %243 by %c1_i32_121 dim 1 : vector<8x128xf32>, i32 -> vector<8x128xf32>
    %247 = vector.broadcast %2 : vector<1x128xf32> to vector<8x128xf32>
    %248 = arith.mulf %247, %246 : vector<8x128xf32>
    %c127_i32_122 = arith.constant 127 : i32
    %249 = tpu.dynamic_rotate %243 by %c127_i32_122 dim 1 : vector<8x128xf32>, i32 -> vector<8x128xf32>
    %250 = vector.broadcast %3 : vector<1x128xf32> to vector<8x128xf32>
    %251 = arith.mulf %250, %249 : vector<8x128xf32>
    %252 = tpu.concatenate %248, %243, %251 in 0 : vector<8x128xf32>, vector<8x128xf32>, vector<8x128xf32> -> vector<24x128xf32>
    %cst_123 = arith.constant dense<0.000000e+00> : vector<8x128xf32>
    %253 = tpu.matmul %245, %252, %cst_123 {dimension_numbers = #tpu.dot_dimension_numbers<[1], [0], [0], [1], [0, 0, 1, 1], [], []>} : vector<8x24xf32>, vector<24x128xf32>, vector<8x128xf32> -> vector<8x128xf32>
    %254 = arith.addf %244, %253 : vector<8x128xf32>
    %c0_124 = arith.constant 0 : index
    %c0_125 = arith.constant 0 : index
    %255 = vector.load %arg9[%c0_124, %c0_125] : memref<8x128xf32, #tpu.memory_space<vmem>>, vector<8x128xf32>
    %256 = arith.addf %254, %255 : vector<8x128xf32>
    %257 = math.tanh %256 : vector<8x128xf32>
    %258 = tpu.concatenate %257, %216 in 0 : vector<8x128xf32>, vector<16x128xf32> -> vector<24x128xf32>
    %c0_126 = arith.constant 0 : index
    %c0_127 = arith.constant 0 : index
    %259 = vector.load %arg10[%c0_126, %c0_127] : memref<64x72xf32, #tpu.memory_space<vmem>>, vector<64x72xf32>
    %c0_128 = arith.constant 0 : index
    %c0_129 = arith.constant 0 : index
    %260 = vector.load %arg11[%c0_128, %c0_129] : memref<64x128xf32, #tpu.memory_space<vmem>>, vector<64x128xf32>
    %c1_i32_130 = arith.constant 1 : i32
    %261 = tpu.dynamic_rotate %258 by %c1_i32_130 dim 1 : vector<24x128xf32>, i32 -> vector<24x128xf32>
    %262 = vector.broadcast %2 : vector<1x128xf32> to vector<24x128xf32>
    %263 = arith.mulf %262, %261 : vector<24x128xf32>
    %c127_i32_131 = arith.constant 127 : i32
    %264 = tpu.dynamic_rotate %258 by %c127_i32_131 dim 1 : vector<24x128xf32>, i32 -> vector<24x128xf32>
    %265 = vector.broadcast %3 : vector<1x128xf32> to vector<24x128xf32>
    %266 = arith.mulf %265, %264 : vector<24x128xf32>
    %267 = tpu.concatenate %263, %258, %266 in 0 : vector<24x128xf32>, vector<24x128xf32>, vector<24x128xf32> -> vector<72x128xf32>
    %cst_132 = arith.constant dense<0.000000e+00> : vector<64x128xf32>
    %268 = tpu.matmul %259, %267, %cst_132 {dimension_numbers = #tpu.dot_dimension_numbers<[1], [0], [0], [1], [0, 0, 1, 1], [], []>} : vector<64x72xf32>, vector<72x128xf32>, vector<64x128xf32> -> vector<64x128xf32>
    %269 = arith.addf %268, %260 : vector<64x128xf32>
    %270 = vector.extract_strided_slice %269 {offsets = [0, 0], sizes = [48, 128], strides = [1, 1]} : vector<64x128xf32> to vector<48x128xf32>
    %cst_133 = arith.constant 5.000000e-01 : f32
    %271 = vector.broadcast %cst_133 : f32 to vector<48x128xf32>
    %272 = arith.mulf %271, %270 : vector<48x128xf32>
    %273 = math.tanh %272 : vector<48x128xf32>
    %cst_134 = arith.constant 1.000000e+00 : f32
    %274 = vector.broadcast %cst_134 : f32 to vector<48x128xf32>
    %275 = arith.addf %273, %274 : vector<48x128xf32>
    %cst_135 = arith.constant 5.000000e-01 : f32
    %276 = vector.broadcast %cst_135 : f32 to vector<48x128xf32>
    %277 = arith.mulf %276, %275 : vector<48x128xf32>
    %278 = vector.extract_strided_slice %277 {offsets = [0, 0], sizes = [16, 128], strides = [1, 1]} : vector<48x128xf32> to vector<16x128xf32>
    %279 = vector.extract_strided_slice %277 {offsets = [16, 0], sizes = [16, 128], strides = [1, 1]} : vector<48x128xf32> to vector<16x128xf32>
    %280 = vector.extract_strided_slice %277 {offsets = [32, 0], sizes = [16, 128], strides = [1, 1]} : vector<48x128xf32> to vector<16x128xf32>
    %281 = vector.extract_strided_slice %269 {offsets = [48, 0], sizes = [16, 128], strides = [1, 1]} : vector<64x128xf32> to vector<16x128xf32>
    %282 = math.tanh %281 : vector<16x128xf32>
    %283 = arith.mulf %279, %214 : vector<16x128xf32>
    %284 = arith.mulf %278, %282 : vector<16x128xf32>
    %285 = arith.addf %283, %284 : vector<16x128xf32>
    %286 = math.tanh %285 : vector<16x128xf32>
    %287 = arith.mulf %280, %286 : vector<16x128xf32>
    %c0_136 = arith.constant 0 : index
    %c0_137 = arith.constant 0 : index
    %288 = vector.load %arg12[%c0_136, %c0_137] : memref<8x48xf32, #tpu.memory_space<vmem>>, vector<8x48xf32>
    %c0_138 = arith.constant 0 : index
    %c0_139 = arith.constant 0 : index
    %289 = vector.load %arg13[%c0_138, %c0_139] : memref<8x128xf32, #tpu.memory_space<vmem>>, vector<8x128xf32>
    %c1_i32_140 = arith.constant 1 : i32
    %290 = tpu.dynamic_rotate %287 by %c1_i32_140 dim 1 : vector<16x128xf32>, i32 -> vector<16x128xf32>
    %291 = vector.broadcast %2 : vector<1x128xf32> to vector<16x128xf32>
    %292 = arith.mulf %291, %290 : vector<16x128xf32>
    %c127_i32_141 = arith.constant 127 : i32
    %293 = tpu.dynamic_rotate %287 by %c127_i32_141 dim 1 : vector<16x128xf32>, i32 -> vector<16x128xf32>
    %294 = vector.broadcast %3 : vector<1x128xf32> to vector<16x128xf32>
    %295 = arith.mulf %294, %293 : vector<16x128xf32>
    %296 = tpu.concatenate %292, %287, %295 in 0 : vector<16x128xf32>, vector<16x128xf32>, vector<16x128xf32> -> vector<48x128xf32>
    %cst_142 = arith.constant dense<0.000000e+00> : vector<8x128xf32>
    %297 = tpu.matmul %288, %296, %cst_142 {dimension_numbers = #tpu.dot_dimension_numbers<[1], [0], [0], [1], [0, 0, 1, 1], [], []>} : vector<8x48xf32>, vector<48x128xf32>, vector<8x128xf32> -> vector<8x128xf32>
    %298 = arith.addf %297, %289 : vector<8x128xf32>
    %299 = math.tanh %298 : vector<8x128xf32>
    %300 = arith.select %16, %299, %298 : vector<8x128xi1>, vector<8x128xf32>
    %c3 = arith.constant 3 : index
    %c0_143 = arith.constant 0 : index
    %c0_144 = arith.constant 0 : index
    %301 = vector.load %arg14[%c3, %c0_143, %c0_144] : memref<8x8x128xf32, #tpu.memory_space<vmem>>, vector<1x8x128xf32>
    %302 = vector.shape_cast %301 : vector<1x8x128xf32> to vector<8x128xf32>
    %303 = vector.shape_cast %300 : vector<8x128xf32> to vector<1x8x128xf32>
    tpu.vector_store %arg14[%c3, %c0_143, %c0_144], %303 {strides = array<i32>} : memref<8x8x128xf32, #tpu.memory_space<vmem>>, vector<1x8x128xf32>,
    %c0_145 = arith.constant 0 : index
    %c0_146 = arith.constant 0 : index
    %304 = vector.load %arg5[%c0_145, %c0_146] : memref<8x24xf32, #tpu.memory_space<vmem>>, vector<8x24xf32>
    %c0_147 = arith.constant 0 : index
    %c0_148 = arith.constant 0 : index
    %305 = vector.load %arg6[%c0_147, %c0_148] : memref<8x128xf32, #tpu.memory_space<vmem>>, vector<8x128xf32>
    %c1_i32_149 = arith.constant 1 : i32
    %306 = tpu.dynamic_rotate %300 by %c1_i32_149 dim 1 : vector<8x128xf32>, i32 -> vector<8x128xf32>
    %307 = vector.broadcast %2 : vector<1x128xf32> to vector<8x128xf32>
    %308 = arith.mulf %307, %306 : vector<8x128xf32>
    %c127_i32_150 = arith.constant 127 : i32
    %309 = tpu.dynamic_rotate %300 by %c127_i32_150 dim 1 : vector<8x128xf32>, i32 -> vector<8x128xf32>
    %310 = vector.broadcast %3 : vector<1x128xf32> to vector<8x128xf32>
    %311 = arith.mulf %310, %309 : vector<8x128xf32>
    %312 = tpu.concatenate %308, %300, %311 in 0 : vector<8x128xf32>, vector<8x128xf32>, vector<8x128xf32> -> vector<24x128xf32>
    %cst_151 = arith.constant dense<0.000000e+00> : vector<8x128xf32>
    %313 = tpu.matmul %304, %312, %cst_151 {dimension_numbers = #tpu.dot_dimension_numbers<[1], [0], [0], [1], [0, 0, 1, 1], [], []>} : vector<8x24xf32>, vector<24x128xf32>, vector<8x128xf32> -> vector<8x128xf32>
    %314 = arith.addf %313, %305 : vector<8x128xf32>
    %315 = vector.extract_strided_slice %13 {offsets = [0, 512], sizes = [8, 128], strides = [1, 1]} : vector<8x1024xf32> to vector<8x128xf32>
    %c0_152 = arith.constant 0 : index
    %c0_153 = arith.constant 0 : index
    %316 = vector.load %arg8[%c0_152, %c0_153] : memref<8x24xf32, #tpu.memory_space<vmem>>, vector<8x24xf32>
    %c1_i32_154 = arith.constant 1 : i32
    %317 = tpu.dynamic_rotate %314 by %c1_i32_154 dim 1 : vector<8x128xf32>, i32 -> vector<8x128xf32>
    %318 = vector.broadcast %2 : vector<1x128xf32> to vector<8x128xf32>
    %319 = arith.mulf %318, %317 : vector<8x128xf32>
    %c127_i32_155 = arith.constant 127 : i32
    %320 = tpu.dynamic_rotate %314 by %c127_i32_155 dim 1 : vector<8x128xf32>, i32 -> vector<8x128xf32>
    %321 = vector.broadcast %3 : vector<1x128xf32> to vector<8x128xf32>
    %322 = arith.mulf %321, %320 : vector<8x128xf32>
    %323 = tpu.concatenate %319, %314, %322 in 0 : vector<8x128xf32>, vector<8x128xf32>, vector<8x128xf32> -> vector<24x128xf32>
    %cst_156 = arith.constant dense<0.000000e+00> : vector<8x128xf32>
    %324 = tpu.matmul %316, %323, %cst_156 {dimension_numbers = #tpu.dot_dimension_numbers<[1], [0], [0], [1], [0, 0, 1, 1], [], []>} : vector<8x24xf32>, vector<24x128xf32>, vector<8x128xf32> -> vector<8x128xf32>
    %325 = arith.addf %315, %324 : vector<8x128xf32>
    %c0_157 = arith.constant 0 : index
    %c0_158 = arith.constant 0 : index
    %326 = vector.load %arg9[%c0_157, %c0_158] : memref<8x128xf32, #tpu.memory_space<vmem>>, vector<8x128xf32>
    %327 = arith.addf %325, %326 : vector<8x128xf32>
    %328 = math.tanh %327 : vector<8x128xf32>
    %329 = tpu.concatenate %328, %287 in 0 : vector<8x128xf32>, vector<16x128xf32> -> vector<24x128xf32>
    %c0_159 = arith.constant 0 : index
    %c0_160 = arith.constant 0 : index
    %330 = vector.load %arg10[%c0_159, %c0_160] : memref<64x72xf32, #tpu.memory_space<vmem>>, vector<64x72xf32>
    %c0_161 = arith.constant 0 : index
    %c0_162 = arith.constant 0 : index
    %331 = vector.load %arg11[%c0_161, %c0_162] : memref<64x128xf32, #tpu.memory_space<vmem>>, vector<64x128xf32>
    %c1_i32_163 = arith.constant 1 : i32
    %332 = tpu.dynamic_rotate %329 by %c1_i32_163 dim 1 : vector<24x128xf32>, i32 -> vector<24x128xf32>
    %333 = vector.broadcast %2 : vector<1x128xf32> to vector<24x128xf32>
    %334 = arith.mulf %333, %332 : vector<24x128xf32>
    %c127_i32_164 = arith.constant 127 : i32
    %335 = tpu.dynamic_rotate %329 by %c127_i32_164 dim 1 : vector<24x128xf32>, i32 -> vector<24x128xf32>
    %336 = vector.broadcast %3 : vector<1x128xf32> to vector<24x128xf32>
    %337 = arith.mulf %336, %335 : vector<24x128xf32>
    %338 = tpu.concatenate %334, %329, %337 in 0 : vector<24x128xf32>, vector<24x128xf32>, vector<24x128xf32> -> vector<72x128xf32>
    %cst_165 = arith.constant dense<0.000000e+00> : vector<64x128xf32>
    %339 = tpu.matmul %330, %338, %cst_165 {dimension_numbers = #tpu.dot_dimension_numbers<[1], [0], [0], [1], [0, 0, 1, 1], [], []>} : vector<64x72xf32>, vector<72x128xf32>, vector<64x128xf32> -> vector<64x128xf32>
    %340 = arith.addf %339, %331 : vector<64x128xf32>
    %341 = vector.extract_strided_slice %340 {offsets = [0, 0], sizes = [48, 128], strides = [1, 1]} : vector<64x128xf32> to vector<48x128xf32>
    %cst_166 = arith.constant 5.000000e-01 : f32
    %342 = vector.broadcast %cst_166 : f32 to vector<48x128xf32>
    %343 = arith.mulf %342, %341 : vector<48x128xf32>
    %344 = math.tanh %343 : vector<48x128xf32>
    %cst_167 = arith.constant 1.000000e+00 : f32
    %345 = vector.broadcast %cst_167 : f32 to vector<48x128xf32>
    %346 = arith.addf %344, %345 : vector<48x128xf32>
    %cst_168 = arith.constant 5.000000e-01 : f32
    %347 = vector.broadcast %cst_168 : f32 to vector<48x128xf32>
    %348 = arith.mulf %347, %346 : vector<48x128xf32>
    %349 = vector.extract_strided_slice %348 {offsets = [0, 0], sizes = [16, 128], strides = [1, 1]} : vector<48x128xf32> to vector<16x128xf32>
    %350 = vector.extract_strided_slice %348 {offsets = [16, 0], sizes = [16, 128], strides = [1, 1]} : vector<48x128xf32> to vector<16x128xf32>
    %351 = vector.extract_strided_slice %348 {offsets = [32, 0], sizes = [16, 128], strides = [1, 1]} : vector<48x128xf32> to vector<16x128xf32>
    %352 = vector.extract_strided_slice %340 {offsets = [48, 0], sizes = [16, 128], strides = [1, 1]} : vector<64x128xf32> to vector<16x128xf32>
    %353 = math.tanh %352 : vector<16x128xf32>
    %354 = arith.mulf %350, %285 : vector<16x128xf32>
    %355 = arith.mulf %349, %353 : vector<16x128xf32>
    %356 = arith.addf %354, %355 : vector<16x128xf32>
    %357 = math.tanh %356 : vector<16x128xf32>
    %358 = arith.mulf %351, %357 : vector<16x128xf32>
    %c0_169 = arith.constant 0 : index
    %c0_170 = arith.constant 0 : index
    %359 = vector.load %arg12[%c0_169, %c0_170] : memref<8x48xf32, #tpu.memory_space<vmem>>, vector<8x48xf32>
    %c0_171 = arith.constant 0 : index
    %c0_172 = arith.constant 0 : index
    %360 = vector.load %arg13[%c0_171, %c0_172] : memref<8x128xf32, #tpu.memory_space<vmem>>, vector<8x128xf32>
    %c1_i32_173 = arith.constant 1 : i32
    %361 = tpu.dynamic_rotate %358 by %c1_i32_173 dim 1 : vector<16x128xf32>, i32 -> vector<16x128xf32>
    %362 = vector.broadcast %2 : vector<1x128xf32> to vector<16x128xf32>
    %363 = arith.mulf %362, %361 : vector<16x128xf32>
    %c127_i32_174 = arith.constant 127 : i32
    %364 = tpu.dynamic_rotate %358 by %c127_i32_174 dim 1 : vector<16x128xf32>, i32 -> vector<16x128xf32>
    %365 = vector.broadcast %3 : vector<1x128xf32> to vector<16x128xf32>
    %366 = arith.mulf %365, %364 : vector<16x128xf32>
    %367 = tpu.concatenate %363, %358, %366 in 0 : vector<16x128xf32>, vector<16x128xf32>, vector<16x128xf32> -> vector<48x128xf32>
    %cst_175 = arith.constant dense<0.000000e+00> : vector<8x128xf32>
    %368 = tpu.matmul %359, %367, %cst_175 {dimension_numbers = #tpu.dot_dimension_numbers<[1], [0], [0], [1], [0, 0, 1, 1], [], []>} : vector<8x48xf32>, vector<48x128xf32>, vector<8x128xf32> -> vector<8x128xf32>
    %369 = arith.addf %368, %360 : vector<8x128xf32>
    %370 = math.tanh %369 : vector<8x128xf32>
    %371 = arith.select %16, %370, %369 : vector<8x128xi1>, vector<8x128xf32>
    %c4 = arith.constant 4 : index
    %c0_176 = arith.constant 0 : index
    %c0_177 = arith.constant 0 : index
    %372 = vector.load %arg14[%c4, %c0_176, %c0_177] : memref<8x8x128xf32, #tpu.memory_space<vmem>>, vector<1x8x128xf32>
    %373 = vector.shape_cast %372 : vector<1x8x128xf32> to vector<8x128xf32>
    %374 = vector.shape_cast %371 : vector<8x128xf32> to vector<1x8x128xf32>
    tpu.vector_store %arg14[%c4, %c0_176, %c0_177], %374 {strides = array<i32>} : memref<8x8x128xf32, #tpu.memory_space<vmem>>, vector<1x8x128xf32>,
    %c0_178 = arith.constant 0 : index
    %c0_179 = arith.constant 0 : index
    %375 = vector.load %arg5[%c0_178, %c0_179] : memref<8x24xf32, #tpu.memory_space<vmem>>, vector<8x24xf32>
    %c0_180 = arith.constant 0 : index
    %c0_181 = arith.constant 0 : index
    %376 = vector.load %arg6[%c0_180, %c0_181] : memref<8x128xf32, #tpu.memory_space<vmem>>, vector<8x128xf32>
    %c1_i32_182 = arith.constant 1 : i32
    %377 = tpu.dynamic_rotate %371 by %c1_i32_182 dim 1 : vector<8x128xf32>, i32 -> vector<8x128xf32>
    %378 = vector.broadcast %2 : vector<1x128xf32> to vector<8x128xf32>
    %379 = arith.mulf %378, %377 : vector<8x128xf32>
    %c127_i32_183 = arith.constant 127 : i32
    %380 = tpu.dynamic_rotate %371 by %c127_i32_183 dim 1 : vector<8x128xf32>, i32 -> vector<8x128xf32>
    %381 = vector.broadcast %3 : vector<1x128xf32> to vector<8x128xf32>
    %382 = arith.mulf %381, %380 : vector<8x128xf32>
    %383 = tpu.concatenate %379, %371, %382 in 0 : vector<8x128xf32>, vector<8x128xf32>, vector<8x128xf32> -> vector<24x128xf32>
    %cst_184 = arith.constant dense<0.000000e+00> : vector<8x128xf32>
    %384 = tpu.matmul %375, %383, %cst_184 {dimension_numbers = #tpu.dot_dimension_numbers<[1], [0], [0], [1], [0, 0, 1, 1], [], []>} : vector<8x24xf32>, vector<24x128xf32>, vector<8x128xf32> -> vector<8x128xf32>
    %385 = arith.addf %384, %376 : vector<8x128xf32>
    %386 = vector.extract_strided_slice %13 {offsets = [0, 640], sizes = [8, 128], strides = [1, 1]} : vector<8x1024xf32> to vector<8x128xf32>
    %c0_185 = arith.constant 0 : index
    %c0_186 = arith.constant 0 : index
    %387 = vector.load %arg8[%c0_185, %c0_186] : memref<8x24xf32, #tpu.memory_space<vmem>>, vector<8x24xf32>
    %c1_i32_187 = arith.constant 1 : i32
    %388 = tpu.dynamic_rotate %385 by %c1_i32_187 dim 1 : vector<8x128xf32>, i32 -> vector<8x128xf32>
    %389 = vector.broadcast %2 : vector<1x128xf32> to vector<8x128xf32>
    %390 = arith.mulf %389, %388 : vector<8x128xf32>
    %c127_i32_188 = arith.constant 127 : i32
    %391 = tpu.dynamic_rotate %385 by %c127_i32_188 dim 1 : vector<8x128xf32>, i32 -> vector<8x128xf32>
    %392 = vector.broadcast %3 : vector<1x128xf32> to vector<8x128xf32>
    %393 = arith.mulf %392, %391 : vector<8x128xf32>
    %394 = tpu.concatenate %390, %385, %393 in 0 : vector<8x128xf32>, vector<8x128xf32>, vector<8x128xf32> -> vector<24x128xf32>
    %cst_189 = arith.constant dense<0.000000e+00> : vector<8x128xf32>
    %395 = tpu.matmul %387, %394, %cst_189 {dimension_numbers = #tpu.dot_dimension_numbers<[1], [0], [0], [1], [0, 0, 1, 1], [], []>} : vector<8x24xf32>, vector<24x128xf32>, vector<8x128xf32> -> vector<8x128xf32>
    %396 = arith.addf %386, %395 : vector<8x128xf32>
    %c0_190 = arith.constant 0 : index
    %c0_191 = arith.constant 0 : index
    %397 = vector.load %arg9[%c0_190, %c0_191] : memref<8x128xf32, #tpu.memory_space<vmem>>, vector<8x128xf32>
    %398 = arith.addf %396, %397 : vector<8x128xf32>
    %399 = math.tanh %398 : vector<8x128xf32>
    %400 = tpu.concatenate %399, %358 in 0 : vector<8x128xf32>, vector<16x128xf32> -> vector<24x128xf32>
    %c0_192 = arith.constant 0 : index
    %c0_193 = arith.constant 0 : index
    %401 = vector.load %arg10[%c0_192, %c0_193] : memref<64x72xf32, #tpu.memory_space<vmem>>, vector<64x72xf32>
    %c0_194 = arith.constant 0 : index
    %c0_195 = arith.constant 0 : index
    %402 = vector.load %arg11[%c0_194, %c0_195] : memref<64x128xf32, #tpu.memory_space<vmem>>, vector<64x128xf32>
    %c1_i32_196 = arith.constant 1 : i32
    %403 = tpu.dynamic_rotate %400 by %c1_i32_196 dim 1 : vector<24x128xf32>, i32 -> vector<24x128xf32>
    %404 = vector.broadcast %2 : vector<1x128xf32> to vector<24x128xf32>
    %405 = arith.mulf %404, %403 : vector<24x128xf32>
    %c127_i32_197 = arith.constant 127 : i32
    %406 = tpu.dynamic_rotate %400 by %c127_i32_197 dim 1 : vector<24x128xf32>, i32 -> vector<24x128xf32>
    %407 = vector.broadcast %3 : vector<1x128xf32> to vector<24x128xf32>
    %408 = arith.mulf %407, %406 : vector<24x128xf32>
    %409 = tpu.concatenate %405, %400, %408 in 0 : vector<24x128xf32>, vector<24x128xf32>, vector<24x128xf32> -> vector<72x128xf32>
    %cst_198 = arith.constant dense<0.000000e+00> : vector<64x128xf32>
    %410 = tpu.matmul %401, %409, %cst_198 {dimension_numbers = #tpu.dot_dimension_numbers<[1], [0], [0], [1], [0, 0, 1, 1], [], []>} : vector<64x72xf32>, vector<72x128xf32>, vector<64x128xf32> -> vector<64x128xf32>
    %411 = arith.addf %410, %402 : vector<64x128xf32>
    %412 = vector.extract_strided_slice %411 {offsets = [0, 0], sizes = [48, 128], strides = [1, 1]} : vector<64x128xf32> to vector<48x128xf32>
    %cst_199 = arith.constant 5.000000e-01 : f32
    %413 = vector.broadcast %cst_199 : f32 to vector<48x128xf32>
    %414 = arith.mulf %413, %412 : vector<48x128xf32>
    %415 = math.tanh %414 : vector<48x128xf32>
    %cst_200 = arith.constant 1.000000e+00 : f32
    %416 = vector.broadcast %cst_200 : f32 to vector<48x128xf32>
    %417 = arith.addf %415, %416 : vector<48x128xf32>
    %cst_201 = arith.constant 5.000000e-01 : f32
    %418 = vector.broadcast %cst_201 : f32 to vector<48x128xf32>
    %419 = arith.mulf %418, %417 : vector<48x128xf32>
    %420 = vector.extract_strided_slice %419 {offsets = [0, 0], sizes = [16, 128], strides = [1, 1]} : vector<48x128xf32> to vector<16x128xf32>
    %421 = vector.extract_strided_slice %419 {offsets = [16, 0], sizes = [16, 128], strides = [1, 1]} : vector<48x128xf32> to vector<16x128xf32>
    %422 = vector.extract_strided_slice %419 {offsets = [32, 0], sizes = [16, 128], strides = [1, 1]} : vector<48x128xf32> to vector<16x128xf32>
    %423 = vector.extract_strided_slice %411 {offsets = [48, 0], sizes = [16, 128], strides = [1, 1]} : vector<64x128xf32> to vector<16x128xf32>
    %424 = math.tanh %423 : vector<16x128xf32>
    %425 = arith.mulf %421, %356 : vector<16x128xf32>
    %426 = arith.mulf %420, %424 : vector<16x128xf32>
    %427 = arith.addf %425, %426 : vector<16x128xf32>
    %428 = math.tanh %427 : vector<16x128xf32>
    %429 = arith.mulf %422, %428 : vector<16x128xf32>
    %c0_202 = arith.constant 0 : index
    %c0_203 = arith.constant 0 : index
    %430 = vector.load %arg12[%c0_202, %c0_203] : memref<8x48xf32, #tpu.memory_space<vmem>>, vector<8x48xf32>
    %c0_204 = arith.constant 0 : index
    %c0_205 = arith.constant 0 : index
    %431 = vector.load %arg13[%c0_204, %c0_205] : memref<8x128xf32, #tpu.memory_space<vmem>>, vector<8x128xf32>
    %c1_i32_206 = arith.constant 1 : i32
    %432 = tpu.dynamic_rotate %429 by %c1_i32_206 dim 1 : vector<16x128xf32>, i32 -> vector<16x128xf32>
    %433 = vector.broadcast %2 : vector<1x128xf32> to vector<16x128xf32>
    %434 = arith.mulf %433, %432 : vector<16x128xf32>
    %c127_i32_207 = arith.constant 127 : i32
    %435 = tpu.dynamic_rotate %429 by %c127_i32_207 dim 1 : vector<16x128xf32>, i32 -> vector<16x128xf32>
    %436 = vector.broadcast %3 : vector<1x128xf32> to vector<16x128xf32>
    %437 = arith.mulf %436, %435 : vector<16x128xf32>
    %438 = tpu.concatenate %434, %429, %437 in 0 : vector<16x128xf32>, vector<16x128xf32>, vector<16x128xf32> -> vector<48x128xf32>
    %cst_208 = arith.constant dense<0.000000e+00> : vector<8x128xf32>
    %439 = tpu.matmul %430, %438, %cst_208 {dimension_numbers = #tpu.dot_dimension_numbers<[1], [0], [0], [1], [0, 0, 1, 1], [], []>} : vector<8x48xf32>, vector<48x128xf32>, vector<8x128xf32> -> vector<8x128xf32>
    %440 = arith.addf %439, %431 : vector<8x128xf32>
    %441 = math.tanh %440 : vector<8x128xf32>
    %442 = arith.select %16, %441, %440 : vector<8x128xi1>, vector<8x128xf32>
    %c5 = arith.constant 5 : index
    %c0_209 = arith.constant 0 : index
    %c0_210 = arith.constant 0 : index
    %443 = vector.load %arg14[%c5, %c0_209, %c0_210] : memref<8x8x128xf32, #tpu.memory_space<vmem>>, vector<1x8x128xf32>
    %444 = vector.shape_cast %443 : vector<1x8x128xf32> to vector<8x128xf32>
    %445 = vector.shape_cast %442 : vector<8x128xf32> to vector<1x8x128xf32>
    tpu.vector_store %arg14[%c5, %c0_209, %c0_210], %445 {strides = array<i32>} : memref<8x8x128xf32, #tpu.memory_space<vmem>>, vector<1x8x128xf32>,
    %c0_211 = arith.constant 0 : index
    %c0_212 = arith.constant 0 : index
    %446 = vector.load %arg5[%c0_211, %c0_212] : memref<8x24xf32, #tpu.memory_space<vmem>>, vector<8x24xf32>
    %c0_213 = arith.constant 0 : index
    %c0_214 = arith.constant 0 : index
    %447 = vector.load %arg6[%c0_213, %c0_214] : memref<8x128xf32, #tpu.memory_space<vmem>>, vector<8x128xf32>
    %c1_i32_215 = arith.constant 1 : i32
    %448 = tpu.dynamic_rotate %442 by %c1_i32_215 dim 1 : vector<8x128xf32>, i32 -> vector<8x128xf32>
    %449 = vector.broadcast %2 : vector<1x128xf32> to vector<8x128xf32>
    %450 = arith.mulf %449, %448 : vector<8x128xf32>
    %c127_i32_216 = arith.constant 127 : i32
    %451 = tpu.dynamic_rotate %442 by %c127_i32_216 dim 1 : vector<8x128xf32>, i32 -> vector<8x128xf32>
    %452 = vector.broadcast %3 : vector<1x128xf32> to vector<8x128xf32>
    %453 = arith.mulf %452, %451 : vector<8x128xf32>
    %454 = tpu.concatenate %450, %442, %453 in 0 : vector<8x128xf32>, vector<8x128xf32>, vector<8x128xf32> -> vector<24x128xf32>
    %cst_217 = arith.constant dense<0.000000e+00> : vector<8x128xf32>
    %455 = tpu.matmul %446, %454, %cst_217 {dimension_numbers = #tpu.dot_dimension_numbers<[1], [0], [0], [1], [0, 0, 1, 1], [], []>} : vector<8x24xf32>, vector<24x128xf32>, vector<8x128xf32> -> vector<8x128xf32>
    %456 = arith.addf %455, %447 : vector<8x128xf32>
    %457 = vector.extract_strided_slice %13 {offsets = [0, 768], sizes = [8, 128], strides = [1, 1]} : vector<8x1024xf32> to vector<8x128xf32>
    %c0_218 = arith.constant 0 : index
    %c0_219 = arith.constant 0 : index
    %458 = vector.load %arg8[%c0_218, %c0_219] : memref<8x24xf32, #tpu.memory_space<vmem>>, vector<8x24xf32>
    %c1_i32_220 = arith.constant 1 : i32
    %459 = tpu.dynamic_rotate %456 by %c1_i32_220 dim 1 : vector<8x128xf32>, i32 -> vector<8x128xf32>
    %460 = vector.broadcast %2 : vector<1x128xf32> to vector<8x128xf32>
    %461 = arith.mulf %460, %459 : vector<8x128xf32>
    %c127_i32_221 = arith.constant 127 : i32
    %462 = tpu.dynamic_rotate %456 by %c127_i32_221 dim 1 : vector<8x128xf32>, i32 -> vector<8x128xf32>
    %463 = vector.broadcast %3 : vector<1x128xf32> to vector<8x128xf32>
    %464 = arith.mulf %463, %462 : vector<8x128xf32>
    %465 = tpu.concatenate %461, %456, %464 in 0 : vector<8x128xf32>, vector<8x128xf32>, vector<8x128xf32> -> vector<24x128xf32>
    %cst_222 = arith.constant dense<0.000000e+00> : vector<8x128xf32>
    %466 = tpu.matmul %458, %465, %cst_222 {dimension_numbers = #tpu.dot_dimension_numbers<[1], [0], [0], [1], [0, 0, 1, 1], [], []>} : vector<8x24xf32>, vector<24x128xf32>, vector<8x128xf32> -> vector<8x128xf32>
    %467 = arith.addf %457, %466 : vector<8x128xf32>
    %c0_223 = arith.constant 0 : index
    %c0_224 = arith.constant 0 : index
    %468 = vector.load %arg9[%c0_223, %c0_224] : memref<8x128xf32, #tpu.memory_space<vmem>>, vector<8x128xf32>
    %469 = arith.addf %467, %468 : vector<8x128xf32>
    %470 = math.tanh %469 : vector<8x128xf32>
    %471 = tpu.concatenate %470, %429 in 0 : vector<8x128xf32>, vector<16x128xf32> -> vector<24x128xf32>
    %c0_225 = arith.constant 0 : index
    %c0_226 = arith.constant 0 : index
    %472 = vector.load %arg10[%c0_225, %c0_226] : memref<64x72xf32, #tpu.memory_space<vmem>>, vector<64x72xf32>
    %c0_227 = arith.constant 0 : index
    %c0_228 = arith.constant 0 : index
    %473 = vector.load %arg11[%c0_227, %c0_228] : memref<64x128xf32, #tpu.memory_space<vmem>>, vector<64x128xf32>
    %c1_i32_229 = arith.constant 1 : i32
    %474 = tpu.dynamic_rotate %471 by %c1_i32_229 dim 1 : vector<24x128xf32>, i32 -> vector<24x128xf32>
    %475 = vector.broadcast %2 : vector<1x128xf32> to vector<24x128xf32>
    %476 = arith.mulf %475, %474 : vector<24x128xf32>
    %c127_i32_230 = arith.constant 127 : i32
    %477 = tpu.dynamic_rotate %471 by %c127_i32_230 dim 1 : vector<24x128xf32>, i32 -> vector<24x128xf32>
    %478 = vector.broadcast %3 : vector<1x128xf32> to vector<24x128xf32>
    %479 = arith.mulf %478, %477 : vector<24x128xf32>
    %480 = tpu.concatenate %476, %471, %479 in 0 : vector<24x128xf32>, vector<24x128xf32>, vector<24x128xf32> -> vector<72x128xf32>
    %cst_231 = arith.constant dense<0.000000e+00> : vector<64x128xf32>
    %481 = tpu.matmul %472, %480, %cst_231 {dimension_numbers = #tpu.dot_dimension_numbers<[1], [0], [0], [1], [0, 0, 1, 1], [], []>} : vector<64x72xf32>, vector<72x128xf32>, vector<64x128xf32> -> vector<64x128xf32>
    %482 = arith.addf %481, %473 : vector<64x128xf32>
    %483 = vector.extract_strided_slice %482 {offsets = [0, 0], sizes = [48, 128], strides = [1, 1]} : vector<64x128xf32> to vector<48x128xf32>
    %cst_232 = arith.constant 5.000000e-01 : f32
    %484 = vector.broadcast %cst_232 : f32 to vector<48x128xf32>
    %485 = arith.mulf %484, %483 : vector<48x128xf32>
    %486 = math.tanh %485 : vector<48x128xf32>
    %cst_233 = arith.constant 1.000000e+00 : f32
    %487 = vector.broadcast %cst_233 : f32 to vector<48x128xf32>
    %488 = arith.addf %486, %487 : vector<48x128xf32>
    %cst_234 = arith.constant 5.000000e-01 : f32
    %489 = vector.broadcast %cst_234 : f32 to vector<48x128xf32>
    %490 = arith.mulf %489, %488 : vector<48x128xf32>
    %491 = vector.extract_strided_slice %490 {offsets = [0, 0], sizes = [16, 128], strides = [1, 1]} : vector<48x128xf32> to vector<16x128xf32>
    %492 = vector.extract_strided_slice %490 {offsets = [16, 0], sizes = [16, 128], strides = [1, 1]} : vector<48x128xf32> to vector<16x128xf32>
    %493 = vector.extract_strided_slice %490 {offsets = [32, 0], sizes = [16, 128], strides = [1, 1]} : vector<48x128xf32> to vector<16x128xf32>
    %494 = vector.extract_strided_slice %482 {offsets = [48, 0], sizes = [16, 128], strides = [1, 1]} : vector<64x128xf32> to vector<16x128xf32>
    %495 = math.tanh %494 : vector<16x128xf32>
    %496 = arith.mulf %492, %427 : vector<16x128xf32>
    %497 = arith.mulf %491, %495 : vector<16x128xf32>
    %498 = arith.addf %496, %497 : vector<16x128xf32>
    %499 = math.tanh %498 : vector<16x128xf32>
    %500 = arith.mulf %493, %499 : vector<16x128xf32>
    %c0_235 = arith.constant 0 : index
    %c0_236 = arith.constant 0 : index
    %501 = vector.load %arg12[%c0_235, %c0_236] : memref<8x48xf32, #tpu.memory_space<vmem>>, vector<8x48xf32>
    %c0_237 = arith.constant 0 : index
    %c0_238 = arith.constant 0 : index
    %502 = vector.load %arg13[%c0_237, %c0_238] : memref<8x128xf32, #tpu.memory_space<vmem>>, vector<8x128xf32>
    %c1_i32_239 = arith.constant 1 : i32
    %503 = tpu.dynamic_rotate %500 by %c1_i32_239 dim 1 : vector<16x128xf32>, i32 -> vector<16x128xf32>
    %504 = vector.broadcast %2 : vector<1x128xf32> to vector<16x128xf32>
    %505 = arith.mulf %504, %503 : vector<16x128xf32>
    %c127_i32_240 = arith.constant 127 : i32
    %506 = tpu.dynamic_rotate %500 by %c127_i32_240 dim 1 : vector<16x128xf32>, i32 -> vector<16x128xf32>
    %507 = vector.broadcast %3 : vector<1x128xf32> to vector<16x128xf32>
    %508 = arith.mulf %507, %506 : vector<16x128xf32>
    %509 = tpu.concatenate %505, %500, %508 in 0 : vector<16x128xf32>, vector<16x128xf32>, vector<16x128xf32> -> vector<48x128xf32>
    %cst_241 = arith.constant dense<0.000000e+00> : vector<8x128xf32>
    %510 = tpu.matmul %501, %509, %cst_241 {dimension_numbers = #tpu.dot_dimension_numbers<[1], [0], [0], [1], [0, 0, 1, 1], [], []>} : vector<8x48xf32>, vector<48x128xf32>, vector<8x128xf32> -> vector<8x128xf32>
    %511 = arith.addf %510, %502 : vector<8x128xf32>
    %512 = math.tanh %511 : vector<8x128xf32>
    %513 = arith.select %16, %512, %511 : vector<8x128xi1>, vector<8x128xf32>
    %c6 = arith.constant 6 : index
    %c0_242 = arith.constant 0 : index
    %c0_243 = arith.constant 0 : index
    %514 = vector.load %arg14[%c6, %c0_242, %c0_243] : memref<8x8x128xf32, #tpu.memory_space<vmem>>, vector<1x8x128xf32>
    %515 = vector.shape_cast %514 : vector<1x8x128xf32> to vector<8x128xf32>
    %516 = vector.shape_cast %513 : vector<8x128xf32> to vector<1x8x128xf32>
    tpu.vector_store %arg14[%c6, %c0_242, %c0_243], %516 {strides = array<i32>} : memref<8x8x128xf32, #tpu.memory_space<vmem>>, vector<1x8x128xf32>,
    %c0_244 = arith.constant 0 : index
    %c0_245 = arith.constant 0 : index
    %517 = vector.load %arg5[%c0_244, %c0_245] : memref<8x24xf32, #tpu.memory_space<vmem>>, vector<8x24xf32>
    %c0_246 = arith.constant 0 : index
    %c0_247 = arith.constant 0 : index
    %518 = vector.load %arg6[%c0_246, %c0_247] : memref<8x128xf32, #tpu.memory_space<vmem>>, vector<8x128xf32>
    %c1_i32_248 = arith.constant 1 : i32
    %519 = tpu.dynamic_rotate %513 by %c1_i32_248 dim 1 : vector<8x128xf32>, i32 -> vector<8x128xf32>
    %520 = vector.broadcast %2 : vector<1x128xf32> to vector<8x128xf32>
    %521 = arith.mulf %520, %519 : vector<8x128xf32>
    %c127_i32_249 = arith.constant 127 : i32
    %522 = tpu.dynamic_rotate %513 by %c127_i32_249 dim 1 : vector<8x128xf32>, i32 -> vector<8x128xf32>
    %523 = vector.broadcast %3 : vector<1x128xf32> to vector<8x128xf32>
    %524 = arith.mulf %523, %522 : vector<8x128xf32>
    %525 = tpu.concatenate %521, %513, %524 in 0 : vector<8x128xf32>, vector<8x128xf32>, vector<8x128xf32> -> vector<24x128xf32>
    %cst_250 = arith.constant dense<0.000000e+00> : vector<8x128xf32>
    %526 = tpu.matmul %517, %525, %cst_250 {dimension_numbers = #tpu.dot_dimension_numbers<[1], [0], [0], [1], [0, 0, 1, 1], [], []>} : vector<8x24xf32>, vector<24x128xf32>, vector<8x128xf32> -> vector<8x128xf32>
    %527 = arith.addf %526, %518 : vector<8x128xf32>
    %528 = vector.extract_strided_slice %13 {offsets = [0, 896], sizes = [8, 128], strides = [1, 1]} : vector<8x1024xf32> to vector<8x128xf32>
    %c0_251 = arith.constant 0 : index
    %c0_252 = arith.constant 0 : index
    %529 = vector.load %arg8[%c0_251, %c0_252] : memref<8x24xf32, #tpu.memory_space<vmem>>, vector<8x24xf32>
    %c1_i32_253 = arith.constant 1 : i32
    %530 = tpu.dynamic_rotate %527 by %c1_i32_253 dim 1 : vector<8x128xf32>, i32 -> vector<8x128xf32>
    %531 = vector.broadcast %2 : vector<1x128xf32> to vector<8x128xf32>
    %532 = arith.mulf %531, %530 : vector<8x128xf32>
    %c127_i32_254 = arith.constant 127 : i32
    %533 = tpu.dynamic_rotate %527 by %c127_i32_254 dim 1 : vector<8x128xf32>, i32 -> vector<8x128xf32>
    %534 = vector.broadcast %3 : vector<1x128xf32> to vector<8x128xf32>
    %535 = arith.mulf %534, %533 : vector<8x128xf32>
    %536 = tpu.concatenate %532, %527, %535 in 0 : vector<8x128xf32>, vector<8x128xf32>, vector<8x128xf32> -> vector<24x128xf32>
    %cst_255 = arith.constant dense<0.000000e+00> : vector<8x128xf32>
    %537 = tpu.matmul %529, %536, %cst_255 {dimension_numbers = #tpu.dot_dimension_numbers<[1], [0], [0], [1], [0, 0, 1, 1], [], []>} : vector<8x24xf32>, vector<24x128xf32>, vector<8x128xf32> -> vector<8x128xf32>
    %538 = arith.addf %528, %537 : vector<8x128xf32>
    %c0_256 = arith.constant 0 : index
    %c0_257 = arith.constant 0 : index
    %539 = vector.load %arg9[%c0_256, %c0_257] : memref<8x128xf32, #tpu.memory_space<vmem>>, vector<8x128xf32>
    %540 = arith.addf %538, %539 : vector<8x128xf32>
    %541 = math.tanh %540 : vector<8x128xf32>
    %542 = tpu.concatenate %541, %500 in 0 : vector<8x128xf32>, vector<16x128xf32> -> vector<24x128xf32>
    %c0_258 = arith.constant 0 : index
    %c0_259 = arith.constant 0 : index
    %543 = vector.load %arg10[%c0_258, %c0_259] : memref<64x72xf32, #tpu.memory_space<vmem>>, vector<64x72xf32>
    %c0_260 = arith.constant 0 : index
    %c0_261 = arith.constant 0 : index
    %544 = vector.load %arg11[%c0_260, %c0_261] : memref<64x128xf32, #tpu.memory_space<vmem>>, vector<64x128xf32>
    %c1_i32_262 = arith.constant 1 : i32
    %545 = tpu.dynamic_rotate %542 by %c1_i32_262 dim 1 : vector<24x128xf32>, i32 -> vector<24x128xf32>
    %546 = vector.broadcast %2 : vector<1x128xf32> to vector<24x128xf32>
    %547 = arith.mulf %546, %545 : vector<24x128xf32>
    %c127_i32_263 = arith.constant 127 : i32
    %548 = tpu.dynamic_rotate %542 by %c127_i32_263 dim 1 : vector<24x128xf32>, i32 -> vector<24x128xf32>
    %549 = vector.broadcast %3 : vector<1x128xf32> to vector<24x128xf32>
    %550 = arith.mulf %549, %548 : vector<24x128xf32>
    %551 = tpu.concatenate %547, %542, %550 in 0 : vector<24x128xf32>, vector<24x128xf32>, vector<24x128xf32> -> vector<72x128xf32>
    %cst_264 = arith.constant dense<0.000000e+00> : vector<64x128xf32>
    %552 = tpu.matmul %543, %551, %cst_264 {dimension_numbers = #tpu.dot_dimension_numbers<[1], [0], [0], [1], [0, 0, 1, 1], [], []>} : vector<64x72xf32>, vector<72x128xf32>, vector<64x128xf32> -> vector<64x128xf32>
    %553 = arith.addf %552, %544 : vector<64x128xf32>
    %554 = vector.extract_strided_slice %553 {offsets = [0, 0], sizes = [48, 128], strides = [1, 1]} : vector<64x128xf32> to vector<48x128xf32>
    %cst_265 = arith.constant 5.000000e-01 : f32
    %555 = vector.broadcast %cst_265 : f32 to vector<48x128xf32>
    %556 = arith.mulf %555, %554 : vector<48x128xf32>
    %557 = math.tanh %556 : vector<48x128xf32>
    %cst_266 = arith.constant 1.000000e+00 : f32
    %558 = vector.broadcast %cst_266 : f32 to vector<48x128xf32>
    %559 = arith.addf %557, %558 : vector<48x128xf32>
    %cst_267 = arith.constant 5.000000e-01 : f32
    %560 = vector.broadcast %cst_267 : f32 to vector<48x128xf32>
    %561 = arith.mulf %560, %559 : vector<48x128xf32>
    %562 = vector.extract_strided_slice %561 {offsets = [0, 0], sizes = [16, 128], strides = [1, 1]} : vector<48x128xf32> to vector<16x128xf32>
    %563 = vector.extract_strided_slice %561 {offsets = [16, 0], sizes = [16, 128], strides = [1, 1]} : vector<48x128xf32> to vector<16x128xf32>
    %564 = vector.extract_strided_slice %561 {offsets = [32, 0], sizes = [16, 128], strides = [1, 1]} : vector<48x128xf32> to vector<16x128xf32>
    %565 = vector.extract_strided_slice %553 {offsets = [48, 0], sizes = [16, 128], strides = [1, 1]} : vector<64x128xf32> to vector<16x128xf32>
    %566 = math.tanh %565 : vector<16x128xf32>
    %567 = arith.mulf %563, %498 : vector<16x128xf32>
    %568 = arith.mulf %562, %566 : vector<16x128xf32>
    %569 = arith.addf %567, %568 : vector<16x128xf32>
    %570 = math.tanh %569 : vector<16x128xf32>
    %571 = arith.mulf %564, %570 : vector<16x128xf32>
    %c0_268 = arith.constant 0 : index
    %c0_269 = arith.constant 0 : index
    %572 = vector.load %arg12[%c0_268, %c0_269] : memref<8x48xf32, #tpu.memory_space<vmem>>, vector<8x48xf32>
    %c0_270 = arith.constant 0 : index
    %c0_271 = arith.constant 0 : index
    %573 = vector.load %arg13[%c0_270, %c0_271] : memref<8x128xf32, #tpu.memory_space<vmem>>, vector<8x128xf32>
    %c1_i32_272 = arith.constant 1 : i32
    %574 = tpu.dynamic_rotate %571 by %c1_i32_272 dim 1 : vector<16x128xf32>, i32 -> vector<16x128xf32>
    %575 = vector.broadcast %2 : vector<1x128xf32> to vector<16x128xf32>
    %576 = arith.mulf %575, %574 : vector<16x128xf32>
    %c127_i32_273 = arith.constant 127 : i32
    %577 = tpu.dynamic_rotate %571 by %c127_i32_273 dim 1 : vector<16x128xf32>, i32 -> vector<16x128xf32>
    %578 = vector.broadcast %3 : vector<1x128xf32> to vector<16x128xf32>
    %579 = arith.mulf %578, %577 : vector<16x128xf32>
    %580 = tpu.concatenate %576, %571, %579 in 0 : vector<16x128xf32>, vector<16x128xf32>, vector<16x128xf32> -> vector<48x128xf32>
    %cst_274 = arith.constant dense<0.000000e+00> : vector<8x128xf32>
    %581 = tpu.matmul %572, %580, %cst_274 {dimension_numbers = #tpu.dot_dimension_numbers<[1], [0], [0], [1], [0, 0, 1, 1], [], []>} : vector<8x48xf32>, vector<48x128xf32>, vector<8x128xf32> -> vector<8x128xf32>
    %582 = arith.addf %581, %573 : vector<8x128xf32>
    %583 = math.tanh %582 : vector<8x128xf32>
    %584 = arith.select %16, %583, %582 : vector<8x128xi1>, vector<8x128xf32>
    %c7 = arith.constant 7 : index
    %c0_275 = arith.constant 0 : index
    %c0_276 = arith.constant 0 : index
    %585 = vector.load %arg14[%c7, %c0_275, %c0_276] : memref<8x8x128xf32, #tpu.memory_space<vmem>>, vector<1x8x128xf32>
    %586 = vector.shape_cast %585 : vector<1x8x128xf32> to vector<8x128xf32>
    %587 = vector.shape_cast %584 : vector<8x128xf32> to vector<1x8x128xf32>
    tpu.vector_store %arg14[%c7, %c0_275, %c0_276], %587 {strides = array<i32>} : memref<8x8x128xf32, #tpu.memory_space<vmem>>, vector<1x8x128xf32>,
    %588 = tpu.concatenate %571, %569 in 0 : vector<16x128xf32>, vector<16x128xf32> -> vector<32x128xf32>
    %c0_277 = arith.constant 0 : index
    %c0_278 = arith.constant 0 : index
    %589 = vector.load %arg15[%c0_277, %c0_278] : memref<32x128xf32, #tpu.memory_space<vmem>>, vector<32x128xf32>
    tpu.vector_store %arg15[%c0_277, %c0_278], %588 {strides = array<i32>} : memref<32x128xf32, #tpu.memory_space<vmem>>, vector<32x128xf32>,
    return
  }
}

</mosaic_0001>

<bundles_post_ra>
// kernel: distana_forward_seq.1
= control target key start
LH: loop header
LB: loop body
LE: loop exit
PB: predicated region body
PF: predicated region fallthrough
CT: control target
= control target key end

     0   :  { %s5397_s22 = smov 1   ;;  %v5398_v3 = vmov 0.0   ;;  %s5399_s25 = smov 127   ;;  %v77_v10 = vlaneseq  ;;  %vm211_vm2 = vcmask 195584   ;;  %v5400_v47 = vmov 0.0|0.0   ;;  %s6724_s0 = inlined_call_operand.vmem [shape: f32[8,1024], index: 0, kind: input, shape index: {}]   ;;  %s6725_s1 = inlined_call_operand.vmem [shape: f32[8,128], index: 1, kind: input, shape index: {}]   ;;  %s6726_s4 = inlined_call_operand.vmem [shape: f32[2,1024], index: 4, kind: input, shape index: {}]   ;;  %s6727_s7 = inlined_call_operand.vmem [shape: f32[8,24], index: 7, kind: input, shape index: {}]   ;;  %s6728_s5 = inlined_call_operand.vmem [shape: f32[8,24], index: 5, kind: input, shape index: {}]   ;;  %s6729_s6 = inlined_call_operand.vmem [shape: f32[8,128], index: 6, kind: input, shape index: {}]   ;;  %s6730_s8 = inlined_call_operand.vmem [shape: f32[8,24], index: 8, kind: input, shape index: {}]   ;;  %s6731_s2 = inlined_call_operand.vmem [shape: f32[16,128], index: 2, kind: input, shape index: {}]   ;;  %s6732_s9 = inlined_call_operand.vmem [shape: f32[8,128], index: 9, kind: input, shape index: {}]   ;;  %s6733_s10 = inlined_call_operand.vmem [shape: f32[64,72], index: 10, kind: input, shape index: {}]   ;;  %s6734_s11 = inlined_call_operand.vmem [shape: f32[64,128], index: 11, kind: input, shape index: {}]   ;;  %s6735_s3 = inlined_call_operand.vmem [shape: f32[16,128], index: 3, kind: input, shape index: {}]   ;;  %s6736_s12 = inlined_call_operand.vmem [shape: f32[8,48], index: 12, kind: input, shape index: {}]   ;;  %s6737_s13 = inlined_call_operand.vmem [shape: f32[8,128], index: 13, kind: input, shape index: {}]   ;;  %s6738_s14 = inlined_call_operand.vmem [shape: f32[8,8,128], index: 14, kind: output, shape index: {0}]   ;;  %s6739_s15 = inlined_call_operand.vmem [shape: f32[32,128], index: 15, kind: output, shape index: {1}]  }
   0x1   :  { %v5485_v0 = vld [vmem:[%s6724_s0 + $0x20] sm:$0xff]  ;;  %v5490_v1 = vld [vmem:[%s6724_s0 + $0x18] sm:$0xff]  ;;  %v57_v2 = vld [vmem:[%s6724_s0 + $0x28] sm:$0xff]  ;;  %421 = vmatprep.mubr.f32.mxu0 %v5398_v3  ;;  %279 = vmatprep.mubr.f32.mxu1 %v5398_v3  ;;  %vm5401_vm3 = vmmov 0   ;;  %vm706_vm4 = vcmask 588800   ;;  %vm886_vm5 = vcmask 392192  }
   0x2   :  { %69 = vrot.lane.b32.xlu0 %v5485_v0, %s5397_s22  ;;  %67 = vrot.lane.b32.xlu1 %v5490_v1, %s5397_s22  ;;  %v5506_v4 = vld [vmem:[%s6724_s0 + $0x30] sm:$0xff]  ;;  %v5515_v5 = vld [vmem:[%s6725_s1] sm:$0xff]  ;;  %v5561_v11 = vshrl.u32 %v77_v10, 7  ;;  %v5563_v12 = vand.u32 127, %v77_v10 }
   0x3   :  { %v5524_v6 = vld [vmem:[%s6724_s0 + $0x8] sm:$0xff]  ;;  %v5529_v7 = vld [vmem:[%s6724_s0] sm:$0xff]  ;;  %v5538_v8 = vld [vmem:[%s6724_s0 + $0x10] sm:$0xff] }
   0x4   :  { %v5543_v9 = vld [vmem:[%s6724_s0 + $0x38] sm:$0xff]  ;;  %v107_v13 = vsub.s32 4, %v5561_v11  ;;  %v111_v14 = vsub.s32 5, %v5561_v11  ;;  %v5570_v15 = vld [vmem:[%s6726_s4] ss:$2 sm:$0xff]  ;;  %vm79_vm0 = vcmp.lt.s32.totalorder %v5563_v12, 1 }
   0x5   :  { %v5583_v21 = vld [vmem:[%s6726_s4 + $0x1] ss:$2 sm:$0xff]  ;;  %v91_v24 = vsub.s32 0, %v5561_v11  ;;  %vm153_vm1 = vcmp.lt.s32.totalorder %v5563_v12, 127  ;;  %v95_v38 = vsub.s32 1, %v5561_v11  ;;  %v99_v53 = vsub.s32 2, %v5561_v11 }
   0x6   :  { %71 = vrot.lane.b32.xlu0 %v57_v2, %s5397_s22  ;;  %147 = vrot.lane.b32.xlu1 %v57_v2, %s5399_s25  ;;  %v108_v18 = vrot.slane %v5570_v15, %v107_v13  ;;  %v112_v20 = vrot.slane %v5570_v15, %v111_v14  ;;  %v186_v27 = vrot.slane %v5583_v21, %v111_v14  ;;  %v5616_v44 = vld [vmem:[%s6727_s7] sm:$0xff]  ;;  %v103_v54 = vsub.s32 3, %v5561_v11 }
   0x7   :  { %v182_v33 = vrot.slane %v5583_v21, %v107_v13  ;;  %v5602_v34 = vrot.slane %v5570_v15, %v91_v24  ;;  %v5610_v41 = vrot.slane %v5583_v21, %v91_v24  ;;  %v96_v45 = vrot.slane %v5570_v15, %v95_v38  ;;  %v5634_v55 = vld [vmem:[%s6728_s5] sm:$0xff] }
   0x8   :  { %v170_v61 = vrot.slane %v5583_v21, %v95_v38  ;;  %v100_v62 = vrot.slane %v5570_v15, %v99_v53  ;;  %v104_v63 = vrot.slane %v5570_v15, %v103_v54  ;;  %v119_v10 = vsub.s32 7, %v5561_v11  ;;  %v5701_v12 = vld [vmem:[%s6729_s6] sm:$0xff] }
   0x9   :  { %vm501_vm6 = vcmp.ge.s32.totalorder %v5561_v11, 4 }
   0xa   :  { %149 = vrot.lane.b32.xlu0 %v5506_v4, %s5399_s25  ;;  %145 = vrot.lane.b32.xlu1 %v5485_v0, %s5399_s25 }
   0xe   :  { %509 = vrot.lane.b32.xlu0 %v5515_v5, %s5397_s22  ;;  %512 = vrot.lane.b32.xlu1 %v5515_v5, %s5399_s25 }
  0x12   :  { %63 = vrot.lane.b32.xlu1 %v5524_v6, %s5397_s22  ;;  %61 = vrot.lane.b32.xlu0 %v5529_v7, %s5397_s22 }
  0x16   :  { %65 = vrot.lane.b32.xlu1 %v5538_v8, %s5397_s22  ;;  %75 = vrot.lane.b32.xlu0 %v5543_v9, %s5397_s22 }
  0x1a   :  { %141 = vrot.lane.b32.xlu1 %v5538_v8, %s5399_s25  ;;  %139 = vrot.lane.b32.xlu0 %v5524_v6, %s5399_s25 }
  0x1e   :  { %73 = vrot.lane.b32.xlu1 %v5506_v4, %s5397_s22  ;;  %137 = vrot.lane.b32.xlu0 %v5529_v7, %s5399_s25 }
  0x22   :  { %151 = vrot.lane.b32.xlu1 %v5543_v9, %s5399_s25  ;;  %143 = vrot.lane.b32.xlu0 %v5490_v1, %s5399_s25 }
  0x74   :  { %v70_v16 = vpop.permute.xlu0 %69  ;;  %v5573_v17 = vpop.permute.xlu1 %67 }
  0x75   :  { %v83_v19 = vsel %vm79_vm0, %v5573_v17, %v70_v16 }
  0x76   :  { %v133_v26 = vmul.f32 %v108_v18, %v83_v19 }
  0x78   :  { %v5585_v22 = vpop.permute.xlu0 %71  ;;  %v148_v23 = vpop.permute.xlu1 %147  ;;  %v4946_v35 = vpack.c.bf16 %v5485_v0, %v133_v26 }
  0x79   :  { %v82_v25 = vsel %vm79_vm0, %v70_v16, %v5585_v22 }
  0x7a   :  { %v134_v28 = vmul.f32 %v112_v20, %v82_v25  ;;  %v115_v20 = vsub.s32 6, %v5561_v11 }
  0x7c   :  { %v5593_v29 = vpop.permute.xlu0 %149  ;;  %v5595_v30 = vpop.permute.xlu1 %145  ;;  %v4944_v31 = vpack.c.bf16 %v57_v2, %v134_v28 }
  0x7d   :  { %v155_v32 = vsel %vm153_vm1, %v148_v23, %v5593_v29  ;;  %v156_v37 = vsel %vm153_vm1, %v5595_v30, %v148_v23 }
  0x7e   :  { %v208_v36 = vmul.f32 %v186_v27, %v155_v32  ;;  %4945 = vmatprep.subr.bf16.mxu0 %v4944_v31  ;;  %v207_v42 = vmul.f32 %v182_v33, %v156_v37  ;;  %v178_v27 = vrot.slane %v5583_v21, %v103_v54  ;;  %v116_v31 = vrot.slane %v5570_v15, %v115_v20 }
  0x7f   :  { %4947 = vmatpush1.bf16.msra.mxu0 %v4946_v35  ;;  %v174_v32 = vrot.slane %v5583_v21, %v99_v53 }
  0x80   :  { %v510_v39 = vpop.permute.xlu0 %509  ;;  %361 = vmatprep.subr.mxu0 %v208_v36  ;;  %v513_v40 = vpop.permute.xlu1 %512 }
  0x81   :  { %v511_v43 = vmul.f32 %v510_v39, %v5602_v34  ;;  %v514_v50 = vmul.f32 %v513_v40, %v5610_v41 }
  0x83   :  { %v4953_v46 = vpack.c.bf16 %v5515_v5, %v511_v43  ;;  %362 = vmatpush1.msra.mxu0 %v207_v42 }
  0x84   :  { %4079 = vmatmul.mubr.msk.f32.vlgmr.msra.gmra.mrb[0].mxu0 %vm211_vm2, %v5616_v44  ;;  %4952 = vmatprep.subr.bf16.mxu0 %v5400_v47  ;;  %v64_v48 = vpop.permute.xlu1 %63  ;;  %v62_v49 = vpop.permute.xlu0 %61 }
  0x85   :  { %v86_v51 = vsel %vm79_vm0, %v62_v49, %v64_v48  ;;  %4954 = vmatpush3.bf16.msra.mxu0 %v4953_v46  ;;  %4438 = vmatprep.mubr.msk.f32.mxu0 %vm5401_vm3, %v5398_v3  ;;  %v190_v46 = vrot.slane %v5583_v21, %v115_v20 }
  0x86   :  { %4436 = vmatprep.subr.mxu0 %v5398_v3  ;;  %v130_v52 = vmul.f32 %v96_v45, %v86_v51 }
  0x88   :  { %v66_v56 = vpop.permute.xlu1 %65  ;;  %v76_v57 = vpop.permute.xlu0 %75  ;;  %v4936_v58 = vpack.c.bf16 %v5524_v6, %v130_v52 }
  0x89   :  { %v87_v59 = vsel %vm79_vm0, %v76_v57, %v62_v49  ;;  %4437 = vmatpush3.msra.mxu0 %v514_v50  ;;  %v84_v0 = vsel %vm79_vm0, %v66_v56, %v5573_v17  ;;  %v85_v2 = vsel %vm79_vm0, %v64_v48, %v66_v56  ;;  %v120_v17 = vrot.slane %v5570_v15, %v119_v10 }
  0x8a   :  { %v129_v60 = vmul.f32 %v5602_v34, %v87_v59  ;;  %4439 = vmatmul.mubr.msk.f32.vlgmr.msra.gmra.mrb[2].mxu0 %vm211_vm2, %v5634_v55  ;;  %4937 = vmatprep.subr.bf16.mxu1 %v4936_v58  ;;  %v131_v18 = vmul.f32 %v100_v62, %v85_v2  ;;  %v132_v19 = vmul.f32 %v104_v63, %v84_v0  ;;  %v5722_v62 = vld [vmem:[%s6730_s8] sm:$0xff] }
  0x8b   :  { %v194_v15 = vrot.slane %v5583_v21, %v119_v10  ;;  %v503_v63 = vld [vmem:[%s6731_s2] sm:$0xff] }
  0x8c   :  { %v142_v5 = vpop.permute.xlu1 %141  ;;  %v140_v6 = vpop.permute.xlu0 %139  ;;  %v4938_v13 = vpack.c.bf16 %v5529_v7, %v129_v60  ;;  %v4942_v28 = vpack.c.bf16 %v5538_v8, %v131_v18  ;;  %v4940_v33 = vpack.c.bf16 %v5490_v1, %v132_v19  ;;  %v5736_v2 = vld [vmem:[%s6732_s9] sm:$0xff] }
  0x8d   :  { %v159_v14 = vsel %vm153_vm1, %v140_v6, %v142_v5 }
  0x8e   :  { %v204_v16 = vmul.f32 %v170_v61, %v159_v14  ;;  %4939 = vmatpush1.bf16.msra.mxu1 %v4938_v13  ;;  %v504_v14 = vld [vmem:[%s6731_s2 + $0x8] sm:$0xff] }
  0x90   :  { %v74_v23 = vpop.permute.xlu1 %73  ;;  %v138_v24 = vpop.permute.xlu0 %137  ;;  %219 = vmatprep.subr.mxu1 %v204_v16  ;;  %v5750_v16 = vld [vmem:[%s6733_s10] sm:$0xff] }
  0x91   :  { %v80_v25 = vsel %vm79_vm0, %v74_v23, %v76_v57  ;;  %v160_v7 = vsel %vm153_vm1, %v138_v24, %v140_v6  ;;  %v81_v35 = vsel %vm79_vm0, %v5585_v22, %v74_v23  ;;  %4468 = vmatprep.mubr.msk.f32.mxu0 %vm706_vm4, %v5750_v16 }
  0x92   :  { %v203_v26 = vmul.f32 %v5610_v41, %v160_v7  ;;  %v136_v36 = vmul.f32 %v120_v17, %v80_v25  ;;  %v135_v1 = vmul.f32 %v116_v31, %v81_v35 }
  0x94   :  { %220 = vmatpush1.msra.mxu1 %v203_v26  ;;  %v144_v37 = vpop.permute.xlu0 %143  ;;  %v152_v39 = vpop.permute.xlu1 %151  ;;  %v4950_v45 = vpack.c.bf16 %v5506_v4, %v135_v1  ;;  %v4966_v26 = vpack.c.bf16 %v504_v14, %v503_v63  ;;  %v5805_v1 = vld [vmem:[%s6733_s10 + $0x38] sm:$0xff] }
  0x95   :  { %v157_v38 = vsel %vm153_vm1, %v144_v37, %v5595_v30  ;;  %v158_v8 = vsel %vm153_vm1, %v142_v5, %v144_v37  ;;  %4941 = vmatprep.subr.bf16.mxu1 %v4940_v33  ;;  %4077 = vmatmul.mubr.msk.f32.vlgmr.msra.gmra.mrb[0].mxu1 %vm211_vm2, %v5616_v44  ;;  %v161_v22 = vsel %vm153_vm1, %v152_v39, %v138_v24  ;;  %v5763_v37 = vld [vmem:[%s6733_s10 + $0x8] sm:$0xff] }
  0x96   :  { %v206_v40 = vmul.f32 %v178_v27, %v157_v38  ;;  %v205_v42 = vmul.f32 %v174_v32, %v158_v8  ;;  %4943 = vmatpush1.bf16.msra.mxu1 %v4942_v28  ;;  %350 = vmatprep.mubr.f32.mxu1 %v5398_v3  ;;  %v4948_v30 = vpack.c.bf16 %v5543_v9, %v136_v36  ;;  %v5768_v38 = vld [vmem:[%s6733_s10 + $0x10] sm:$0xff]  ;;  %v5777_v8 = vld [vmem:[%s6733_s10 + $0x18] sm:$0xff] }
  0x97   :  { %v210_v43 = vmul.f32 %v194_v15, %v161_v22  ;;  %v154_v48 = vsel %vm153_vm1, %v5593_v29, %v152_v39  ;;  %v5782_v15 = vld [vmem:[%s6733_s10 + $0x20] sm:$0xff]  ;;  %v5791_v39 = vld [vmem:[%s6733_s10 + $0x28] sm:$0xff] }
  0x98   :  { %290 = vmatprep.subr.mxu1 %v206_v40  ;;  %v209_v49 = vmul.f32 %v190_v46, %v154_v48  ;;  %v5796_v40 = vld [vmem:[%s6733_s10 + $0x30] sm:$0xff]  ;;  %v5814_v22 = vld [vmem:[%s6734_s11 + $0x8] sm:$0xff]  ;;  %v5826_v48 = vld [vmem:[%s6734_s11 + $0x18] sm:$0xff] }
  0x9a   :  { %291 = vmatpush1.msra.mxu1 %v205_v42  ;;  %v5819_v42 = vld [vmem:[%s6734_s11] sm:$0xff] }
  0x9b   :  { %4949 = vmatprep.subr.bf16.mxu1 %v4948_v30  ;;  %4078 = vmatmul.mubr.msk.f32.vlgmr.msra.gmra.mrb[2].mxu1 %vm211_vm2, %v5616_v44 }
  0x9c   :  { %4951 = vmatpush1.bf16.msra.mxu1 %v4950_v45  ;;  %492 = vmatprep.mubr.f32.mxu1 %v5398_v3 }
  0x9d   :  { %432 = vmatprep.subr.mxu1 %v210_v43 }
  0xa0   :  { %433 = vmatpush1.msra.mxu1 %v209_v49 }
  0xa1   :  { %4080 = vmatmul.mubr.msk.f32.vlgmr.msra.gmra.mrb[4].mxu1 %vm211_vm2, %v5616_v44  ;;  %4955 = vmatprep.subr.bf16.mxu1 %v5400_v47 }
  0xa2   :  { %4447 = vmatprep.mubr.msk.f32.mxu1 %vm5401_vm3, %v5398_v3 }
 0x157   :  { %v5694_v4 = vpop.f32.mrb[0].mxu0 }
 0x158   :  { %v5696_v9 = vpop.f32.mrb[1].mxu0 }
 0x15d   :  { %v584_v21 = vpop.f32.mrb[2].mxu0 }
 0x15e   :  { %v585_v29 = vadd.f32 %v584_v21, %v5701_v12  ;;  %v4440_v50 = vpop.f32.mrb[3].mxu0  ;;  %v5831_v21 = vld [vmem:[%s6734_s11 + $0x10] sm:$0xff] }
 0x160   :  { %592 = vrot.lane.b32.xlu1 %v585_v29, %s5399_s25  ;;  %589 = vrot.lane.b32.xlu0 %v585_v29, %s5397_s22 }
 0x164   :  { %690 = vrot.lane.b32.xlu1 %v503_v63, %s5397_s22 }
 0x168   :  { %v281_v44 = vpop.f32.mrb[0].mxu1 }
 0x169   :  { %v5706_v51 = vpop.f32.mrb[1].mxu1 }
 0x16e   :  { %v5708_v52 = vpop.f32.mrb[2].mxu1 }
 0x16f   :  { %v5710_v53 = vpop.f32.mrb[3].mxu1 }
 0x174   :  { %v5712_v54 = vpop.f32.mrb[4].mxu1 }
 0x175   :  { %v5714_v56 = vpop.f32.mrb[5].mxu1 }
 0x1d2   :  { %v590_v57 = vpop.permute.xlu0 %589  ;;  %v593_v60 = vpop.permute.xlu1 %592 }
 0x1d3   :  { %v591_v58 = vmul.f32 %v590_v57, %v5602_v34  ;;  %v594_v61 = vmul.f32 %v593_v60, %v5610_v41 }
 0x1d5   :  { %v4956_v59 = vpack.c.bf16 %v585_v29, %v591_v58 }
 0x1d6   :  { %v691_v18 = vpop.permute.xlu1 %690 }
 0x1d7   :  { %4957 = vmatpush3.bf16.msra.mxu1 %v4956_v59  ;;  %v695_v19 = vmul.f32 %v691_v18, %v5602_v34 }
 0x1d8   :  { %4445 = vmatprep.subr.mxu1 %v5398_v3 }
 0x1db   :  { %4446 = vmatpush3.msra.mxu1 %v594_v61 }
 0x1dc   :  { %4448 = vmatmul.mubr.msk.f32.vlgmr.msra.gmra.mrb[6].mxu1 %vm211_vm2, %v5722_v62  ;;  %4974 = vmatprep.subr.bf16.mxu1 %v5400_v47 }
 0x1dd   :  { %4492 = vmatprep.mubr.msk.f32.mxu1 %vm5401_vm3, %v5398_v3 }
 0x2af   :  { %v664_v0 = vpop.f32.mrb[6].mxu1 }
 0x2b0   :  { %v668_v5 = vadd.f32 %v664_v0, %v281_v44  ;;  %v4449_v6 = vpop.f32.mrb[7].mxu1  ;;  %v5838_v0 = vld [vmem:[%s6734_s11 + $0x38] sm:$0xff] }
 0x2b1   :  { %v5848_v6 = vld [vmem:[%s6734_s11 + $0x30] sm:$0xff] }
 0x2b2   :  { %v670_v10 = vadd.f32 %v5736_v2, %v668_v5  ;;  %v5843_v5 = vld [vmem:[%s6734_s11 + $0x28] sm:$0xff] }
 0x2b4   :  { %5205 = vtanh.f32 %v670_v10  ;;  %v5853_v10 = vld [vmem:[%s6734_s11 + $0x20] sm:$0xff] }
 0x2be   :  { %v5206_v13 = vpop.eup %5205 }
 0x2bf   :  { %697 = vrot.lane.b32.xlu1 %v5206_v13, %s5399_s25  ;;  %688 = vrot.lane.b32.xlu0 %v5206_v13, %s5397_s22 }
 0x2c3   :  { %692 = vrot.lane.b32.xlu0 %v504_v14, %s5397_s22  ;;  %701 = vrot.lane.b32.xlu1 %v504_v14, %s5399_s25 }
 0x2c7   :  { %699 = vrot.lane.b32.xlu0 %v503_v63, %s5399_s25 }
 0x331   :  { %v689_v20 = vpop.permute.xlu0 %688  ;;  %v698_v27 = vpop.permute.xlu1 %697 }
 0x332   :  { %v694_v17 = vmul.f32 %v689_v20, %v5602_v34  ;;  %v703_v32 = vmul.f32 %v698_v27, %v5610_v41 }
 0x334   :  { %v4958_v23 = vpack.c.bf16 %v695_v19, %v694_v17 }
 0x335   :  { %v693_v24 = vpop.permute.xlu0 %692  ;;  %v702_v33 = vpop.permute.xlu1 %701 }
 0x336   :  { %v696_v25 = vmul.f32 %v693_v24, %v5602_v34  ;;  %4959 = vmatprep.subr.bf16.mxu0 %v4958_v23  ;;  %v705_v36 = vmul.f32 %v702_v33, %v5610_v41 }
 0x337   :  { %4961 = vmatpush3.bf16.msra.mxu0 %v4958_v23 }
 0x338   :  { %v4962_v7 = vpack.c.bf16 %v5206_v13, %v696_v25 }
 0x339   :  { %v700_v28 = vpop.permute.xlu0 %699 }
 0x33a   :  { %v704_v31 = vmul.f32 %v700_v28, %v5610_v41  ;;  %4963 = vmatprep.subr.bf16.mxu0 %v4962_v7 }
 0x33b   :  { %4965 = vmatpush3.bf16.msra.mxu0 %v4962_v7 }
 0x33c   :  { %4967 = vmatprep.subr.bf16.mxu0 %v4966_v26  ;;  %v4970_v35 = vpack.c.bf16 %v704_v31, %v703_v32 }
 0x33f   :  { %4969 = vmatpush3.bf16.msra.mxu0 %v4966_v26 }
 0x340   :  { %4971 = vmatprep.subr.bf16.mxu0 %v4970_v35 }
 0x343   :  { %4973 = vmatpush3.bf16.msra.mxu0 %v4970_v35 }
 0x344   :  { %4466 = vmatprep.subr.mxu0 %v705_v36 }
 0x347   :  { %4467 = vmatpush3.msra.mxu0 %v705_v36  ;;  %v506_v36 = vld [vmem:[%s6735_s3 + $0x8] sm:$0xff] }
 0x348   :  { %4469 = vmatmul.mubr.msk.f32.vlgmr.msra.gmra.mrb[4].mxu0 %vm706_vm4, %v5763_v37 }
 0x349   :  { %4471 = vmatprep.mubr.msk.f32.mxu0 %vm706_vm4, %v5768_v38 }
 0x34c   :  { %4472 = vmatmul.mubr.msk.f32.gmra.mrb[6].mxu0 %vm706_vm4, %v5777_v8 }
 0x34d   :  { %4474 = vmatprep.mubr.msk.f32.mxu0 %vm706_vm4, %v5782_v15 }
 0x350   :  { %4475 = vmatmul.mubr.msk.f32.gmra.mrb[8].mxu0 %vm706_vm4, %v5791_v39 }
 0x351   :  { %4477 = vmatprep.mubr.msk.f32.mxu0 %vm706_vm4, %v5796_v40 }
 0x354   :  { %4478 = vmatmul.mubr.msk.f32.gmra.mrb[10].mxu0 %vm706_vm4, %v5805_v1 }
 0x355   :  { %4531 = vmatprep.mubr.msk.f32.mxu0 %vm706_vm4, %v5750_v16 }
 0x41b   :  { %v4470_v30 = vpop.f32.mrb[4].mxu0 }
 0x41c   :  { %v803_v43 = vadd.f32 %v4470_v30, %v5814_v22  ;;  %v797_v45 = vpop.f32.mrb[5].mxu0 }
 0x41d   :  { %v798_v46 = vadd.f32 %v797_v45, %v5819_v42  ;;  %v505_v45 = vld [vmem:[%s6735_s3] sm:$0xff] }
 0x41e   :  { %v837_v49 = vmul.f32 0.5, %v803_v43 }
 0x41f   :  { %v836_v29 = vmul.f32 0.5, %v798_v46  ;;  %v4473_v50 = vpop.f32.mrb[6].mxu0 }
 0x420   :  { %v813_v44 = vadd.f32 %v4473_v50, %v5826_v48  ;;  %v807_v57 = vpop.f32.mrb[7].mxu0  ;;  %5207 = vtanh.f32 %v837_v49 }
 0x421   :  { %v808_v58 = vadd.f32 %v807_v57, %v5831_v21  ;;  %5209 = vtanh.f32 %v836_v29 }
 0x422   :  { %v839_v59 = vmul.f32 0.5, %v813_v44 }
 0x423   :  { %v838_v60 = vmul.f32 0.5, %v808_v58  ;;  %v4476_v61 = vpop.f32.mrb[8].mxu0 }
 0x424   :  { %5211 = vtanh.f32 %v839_v59  ;;  %v817_v63 = vpop.f32.mrb[9].mxu0  ;;  %v823_v19 = vadd.f32 %v4476_v61, %v5843_v5 }
 0x425   :  { %5213 = vtanh.f32 %v838_v60  ;;  %v818_v17 = vadd.f32 %v817_v63, %v5853_v10 }
 0x426   :  { %v841_v25 = vmul.f32 0.5, %v823_v19 }
 0x427   :  { %v4479_v13 = vpop.f32.mrb[10].mxu0  ;;  %v840_v26 = vmul.f32 0.5, %v818_v17 }
 0x428   :  { %v833_v14 = vadd.f32 %v4479_v13, %v5838_v0  ;;  %v827_v18 = vpop.f32.mrb[11].mxu0 }
 0x429   :  { %v828_v20 = vadd.f32 %v827_v18, %v5848_v6 }
 0x42a   :  { %5215 = vtanh.f32 %v833_v14  ;;  %v5208_v23 = vpop.eup %5207 }
 0x42b   :  { %5217 = vtanh.f32 %v828_v20  ;;  %v5210_v24 = vpop.eup %5209  ;;  %v849_v28 = vadd.f32 1.0, %v5208_v23 }
 0x42c   :  { %v848_v32 = vadd.f32 1.0, %v5210_v24  ;;  %5219 = vtanh.f32 %v841_v25 }
 0x42d   :  { %5221 = vtanh.f32 %v840_v26  ;;  %v855_v43 = vmul.f32 0.5, %v849_v28 }
 0x42e   :  { %v5212_v7 = vpop.eup %5211  ;;  %v854_v49 = vmul.f32 0.5, %v848_v32 }
 0x42f   :  { %v5214_v27 = vpop.eup %5213  ;;  %v851_v31 = vadd.f32 1.0, %v5212_v7 }
 0x430   :  { %v850_v33 = vadd.f32 1.0, %v5214_v27 }
 0x431   :  { %v857_v35 = vmul.f32 0.5, %v851_v31 }
 0x432   :  { %v856_v30 = vmul.f32 0.5, %v850_v33 }
 0x433   :  { %v863_v50 = vmul.f32 %v857_v35, %v506_v36 }
 0x434   :  { %v5216_v46 = vpop.eup %5215  ;;  %v862_v57 = vmul.f32 %v856_v30, %v505_v45  ;;  %v5909_v45 = vld [vmem:[%s6737_s13] sm:$0xff] }
 0x435   :  { %v5218_v29 = vpop.eup %5217  ;;  %v865_v44 = vmul.f32 %v5216_v46, %v855_v43  ;;  %v5899_v43 = vld [vmem:[%s6736_s12] sm:$0xff] }
 0x436   :  { %v864_v58 = vmul.f32 %v5218_v29, %v854_v49  ;;  %v5220_v61 = vpop.eup %5219 }
 0x437   :  { %v5865_v59 = vadd.f32 %v865_v44, %v863_v50  ;;  %v5222_v63 = vpop.eup %5221  ;;  %v853_v13 = vadd.f32 1.0, %v5220_v61 }
 0x438   :  { %v5867_v60 = vadd.f32 %v864_v58, %v862_v57  ;;  %v852_v14 = vadd.f32 1.0, %v5222_v63 }
 0x439   :  { %5223 = vtanh.f32 %v5865_v59  ;;  %v859_v18 = vmul.f32 0.5, %v853_v13 }
 0x43a   :  { %5225 = vtanh.f32 %v5867_v60  ;;  %v858_v20 = vmul.f32 0.5, %v852_v14 }
 0x443   :  { %v5224_v19 = vpop.eup %5223 }
 0x444   :  { %v5226_v17 = vpop.eup %5225  ;;  %v871_v23 = vmul.f32 %v5224_v19, %v859_v18 }
 0x445   :  { %v870_v24 = vmul.f32 %v5226_v17, %v858_v20 }
 0x446   :  { %876 = vrot.lane.b32.xlu1 %v871_v23, %s5397_s22 }
 0x447   :  { %874 = vrot.lane.b32.xlu0 %v870_v24, %s5397_s22  ;;  %v5873_v25 = vpack.c.bf16 %v871_v23, %v870_v24 }
 0x44a   :  { %882 = vrot.lane.b32.xlu1 %v871_v23, %s5399_s25 }
 0x44b   :  { %880 = vrot.lane.b32.xlu0 %v870_v24, %s5399_s25 }
 0x4b8   :  { %v877_v7 = vpop.permute.xlu1 %876 }
 0x4b9   :  { %v5878_v26 = vmul.f32 %v877_v7, %v5602_v34  ;;  %v875_v27 = vpop.permute.xlu0 %874 }
 0x4ba   :  { %v5881_v28 = vmul.f32 %v875_v27, %v5602_v34 }
 0x4bc   :  { %v4975_v31 = vpack.c.bf16 %v5878_v26, %v5881_v28  ;;  %v883_v32 = vpop.permute.xlu1 %882 }
 0x4bd   :  { %v881_v33 = vpop.permute.xlu0 %880  ;;  %v5887_v35 = vmul.f32 %v883_v32, %v5610_v41 }
 0x4be   :  { %4976 = vmatpush3.bf16.msra.mxu1 %v4975_v31  ;;  %v5890_v36 = vmul.f32 %v881_v33, %v5610_v41 }
 0x4bf   :  { %4977 = vmatprep.subr.bf16.mxu1 %v5400_v47 }
 0x4c0   :  { %v4981_v30 = vpack.c.bf16 %v5887_v35, %v5890_v36 }
 0x4c2   :  { %4979 = vmatpush3.bf16.msra.mxu1 %v5873_v25 }
 0x4c3   :  { %4980 = vmatprep.subr.bf16.mxu1 %v5400_v47 }
 0x4c6   :  { %4982 = vmatpush3.bf16.msra.mxu1 %v4981_v30 }
 0x4c7   :  { %4983 = vmatprep.subr.bf16.mxu1 %v5400_v47 }
 0x4c9   :  { %4493 = vmatmul.mubr.msk.f32.vlgmr.msra.gmra.mrb[8].mxu1 %vm886_vm5, %v5899_v43 }
 0x4ca   :  { %4501 = vmatprep.mubr.msk.f32.mxu1 %vm5401_vm3, %v5398_v3 }
 0x59c   :  { %v956_v46 = vpop.f32.mrb[8].mxu1 }
 0x59d   :  { %v957_v49 = vadd.f32 %v956_v46, %v5909_v45  ;;  %v4494_v29 = vpop.f32.mrb[9].mxu1 }
 0x59f   :  { %5227 = vtanh.f32 %v957_v49 }
 0x5a9   :  { %v5228_v50 = vpop.eup %5227 }
 0x5aa   :  { %v961_v44 = vsel %vm501_vm6, %v5228_v50, %v957_v49 }
 0x5ab   :  { %968 = vrot.lane.b32.xlu1 %v961_v44, %s5399_s25  ;;  %962 = vst [vmem:[%s6738_s14] sm:$0xff] %v961_v44  ;;  %965 = vrot.lane.b32.xlu0 %v961_v44, %s5397_s22 }
 0x61d   :  { %v966_v57 = vpop.permute.xlu0 %965  ;;  %v969_v63 = vpop.permute.xlu1 %968 }
 0x61e   :  { %v967_v58 = vmul.f32 %v966_v57, %v5602_v34  ;;  %v970_v13 = vmul.f32 %v969_v63, %v5610_v41 }
 0x620   :  { %v4984_v61 = vpack.c.bf16 %v961_v44, %v967_v58 }
 0x622   :  { %4985 = vmatpush3.bf16.msra.mxu1 %v4984_v61 }
 0x623   :  { %4499 = vmatprep.subr.mxu1 %v5398_v3 }
 0x626   :  { %4500 = vmatpush3.msra.mxu1 %v970_v13 }
 0x627   :  { %4502 = vmatmul.mubr.msk.f32.vlgmr.msra.gmra.mrb[10].mxu1 %vm211_vm2, %v5634_v55  ;;  %4986 = vmatprep.subr.bf16.mxu1 %v5400_v47 }
 0x628   :  { %4510 = vmatprep.mubr.msk.f32.mxu1 %vm5401_vm3, %v5398_v3 }
 0x6fa   :  { %v1040_v14 = vpop.f32.mrb[10].mxu1 }
 0x6fb   :  { %v1041_v18 = vadd.f32 %v1040_v14, %v5701_v12  ;;  %v4503_v19 = vpop.f32.mrb[11].mxu1 }
 0x6fd   :  { %1048 = vrot.lane.b32.xlu1 %v1041_v18, %s5399_s25  ;;  %1045 = vrot.lane.b32.xlu0 %v1041_v18, %s5397_s22 }
 0x76f   :  { %v1046_v20 = vpop.permute.xlu0 %1045  ;;  %v1049_v24 = vpop.permute.xlu1 %1048 }
 0x770   :  { %v1047_v17 = vmul.f32 %v1046_v20, %v5602_v34  ;;  %v1050_v7 = vmul.f32 %v1049_v24, %v5610_v41 }
 0x772   :  { %v4987_v23 = vpack.c.bf16 %v1041_v18, %v1047_v17 }
 0x774   :  { %4988 = vmatpush3.bf16.msra.mxu1 %v4987_v23 }
 0x775   :  { %4508 = vmatprep.subr.mxu1 %v5398_v3 }
 0x778   :  { %4509 = vmatpush3.msra.mxu1 %v1050_v7 }
 0x779   :  { %4511 = vmatmul.mubr.msk.f32.vlgmr.msra.gmra.mrb[12].mxu1 %vm211_vm2, %v5722_v62  ;;  %5005 = vmatprep.subr.bf16.mxu1 %v5400_v47 }
 0x77a   :  { %4555 = vmatprep.mubr.msk.f32.mxu1 %vm5401_vm3, %v5398_v3 }
 0x84c   :  { %v1120_v27 = vpop.f32.mrb[12].mxu1 }
 0x84d   :  { %v1124_v31 = vadd.f32 %v1120_v27, %v5706_v51  ;;  %v4512_v32 = vpop.f32.mrb[13].mxu1 }
 0x84f   :  { %v1126_v33 = vadd.f32 %v1124_v31, %v5736_v2 }
 0x851   :  { %5229 = vtanh.f32 %v1126_v33 }
 0x85b   :  { %v5230_v30 = vpop.eup %5229 }
 0x85c   :  { %1147 = vrot.lane.b32.xlu1 %v5230_v30, %s5399_s25  ;;  %1144 = vrot.lane.b32.xlu0 %v5230_v30, %s5397_s22  ;;  %v4993_v50 = vpack.c.bf16 %v5230_v30, %v5878_v26 }
 0x8ce   :  { %v1145_v46 = vpop.permute.xlu0 %1144  ;;  %v1148_v44 = vpop.permute.xlu1 %1147 }
 0x8cf   :  { %v1146_v49 = vmul.f32 %v1145_v46, %v5602_v34  ;;  %v1149_v51 = vmul.f32 %v1148_v44, %v5610_v41 }
 0x8d1   :  { %v4989_v29 = vpack.c.bf16 %v5881_v28, %v1146_v49  ;;  %v5001_v57 = vpack.c.bf16 %v5890_v36, %v1149_v51 }
 0x8d3   :  { %4990 = vmatprep.subr.bf16.mxu0 %v4989_v29 }
 0x8d4   :  { %4992 = vmatpush3.bf16.msra.mxu0 %v4989_v29 }
 0x8d5   :  { %4994 = vmatprep.subr.bf16.mxu0 %v4993_v50 }
 0x8d8   :  { %4996 = vmatpush3.bf16.msra.mxu0 %v4993_v50 }
 0x8d9   :  { %4998 = vmatprep.subr.bf16.mxu0 %v5873_v25 }
 0x8dc   :  { %5000 = vmatpush3.bf16.msra.mxu0 %v5873_v25 }
 0x8dd   :  { %5002 = vmatprep.subr.bf16.mxu0 %v5001_v57 }
 0x8e0   :  { %5004 = vmatpush3.bf16.msra.mxu0 %v5001_v57 }
 0x8e1   :  { %4529 = vmatprep.subr.mxu0 %v5887_v35 }
 0x8e4   :  { %4530 = vmatpush3.msra.mxu0 %v5887_v35 }
 0x8e5   :  { %4532 = vmatmul.mubr.msk.f32.vlgmr.msra.gmra.mrb[12].mxu0 %vm706_vm4, %v5763_v37 }
 0x8e6   :  { %4534 = vmatprep.mubr.msk.f32.mxu0 %vm706_vm4, %v5768_v38 }
 0x8e9   :  { %4535 = vmatmul.mubr.msk.f32.gmra.mrb[14].mxu0 %vm706_vm4, %v5777_v8 }
 0x8ea   :  { %4537 = vmatprep.mubr.msk.f32.mxu0 %vm706_vm4, %v5782_v15 }
 0x8ed   :  { %4538 = vmatmul.mubr.msk.f32.gmra.mrb[16].mxu0 %vm706_vm4, %v5791_v39 }
 0x8ee   :  { %4540 = vmatprep.mubr.msk.f32.mxu0 %vm706_vm4, %v5796_v40 }
 0x8f1   :  { %4541 = vmatmul.mubr.msk.f32.gmra.mrb[18].mxu0 %vm706_vm4, %v5805_v1 }
 0x8f2   :  { %4594 = vmatprep.mubr.msk.f32.mxu0 %vm706_vm4, %v5750_v16 }
 0x9b8   :  { %v4533_v25 = vpop.f32.mrb[12].mxu0 }
 0x9b9   :  { %v1246_v26 = vadd.f32 %v4533_v25, %v5814_v22  ;;  %v1240_v28 = vpop.f32.mrb[13].mxu0 }
 0x9ba   :  { %v1241_v35 = vadd.f32 %v1240_v28, %v5819_v42 }
 0x9bb   :  { %v1280_v36 = vmul.f32 0.5, %v1246_v26 }
 0x9bc   :  { %v1279_v58 = vmul.f32 0.5, %v1241_v35  ;;  %v4536_v61 = vpop.f32.mrb[14].mxu0 }
 0x9bd   :  { %v1256_v63 = vadd.f32 %v4536_v61, %v5826_v48  ;;  %v1250_v13 = vpop.f32.mrb[15].mxu0  ;;  %5231 = vtanh.f32 %v1280_v36 }
 0x9be   :  { %v1251_v14 = vadd.f32 %v1250_v13, %v5831_v21  ;;  %5233 = vtanh.f32 %v1279_v58 }
 0x9bf   :  { %v1282_v18 = vmul.f32 0.5, %v1256_v63 }
 0x9c0   :  { %v1281_v19 = vmul.f32 0.5, %v1251_v14  ;;  %v4539_v20 = vpop.f32.mrb[16].mxu0 }
 0x9c1   :  { %5235 = vtanh.f32 %v1282_v18  ;;  %v1260_v17 = vpop.f32.mrb[17].mxu0  ;;  %v1266_v27 = vadd.f32 %v4539_v20, %v5843_v5 }
 0x9c2   :  { %5237 = vtanh.f32 %v1281_v19  ;;  %v1261_v32 = vadd.f32 %v1260_v17, %v5853_v10 }
 0x9c3   :  { %v1284_v46 = vmul.f32 0.5, %v1266_v27 }
 0x9c4   :  { %v4542_v23 = vpop.f32.mrb[18].mxu0  ;;  %v1283_v29 = vmul.f32 0.5, %v1261_v32 }
 0x9c5   :  { %v1276_v24 = vadd.f32 %v4542_v23, %v5838_v0  ;;  %v1270_v7 = vpop.f32.mrb[19].mxu0 }
 0x9c6   :  { %v1271_v31 = vadd.f32 %v1270_v7, %v5848_v6 }
 0x9c7   :  { %5239 = vtanh.f32 %v1276_v24  ;;  %v5232_v33 = vpop.eup %5231 }
 0x9c8   :  { %5241 = vtanh.f32 %v1271_v31  ;;  %v5234_v30 = vpop.eup %5233  ;;  %v1292_v44 = vadd.f32 1.0, %v5232_v33 }
 0x9c9   :  { %v1291_v57 = vadd.f32 1.0, %v5234_v30  ;;  %5243 = vtanh.f32 %v1284_v46 }
 0x9ca   :  { %5245 = vtanh.f32 %v1283_v29  ;;  %v1298_v35 = vmul.f32 0.5, %v1292_v44 }
 0x9cb   :  { %v5236_v49 = vpop.eup %5235  ;;  %v1297_v58 = vmul.f32 0.5, %v1291_v57 }
 0x9cc   :  { %v5238_v50 = vpop.eup %5237  ;;  %v1294_v51 = vadd.f32 1.0, %v5236_v49 }
 0x9cd   :  { %v1293_v25 = vadd.f32 1.0, %v5238_v50 }
 0x9ce   :  { %v1300_v26 = vmul.f32 0.5, %v1294_v51 }
 0x9cf   :  { %v1299_v28 = vmul.f32 0.5, %v1293_v25 }
 0x9d0   :  { %v1306_v63 = vmul.f32 %v1300_v26, %v5865_v59 }
 0x9d1   :  { %v5240_v36 = vpop.eup %5239  ;;  %v1305_v14 = vmul.f32 %v1299_v28, %v5867_v60 }
 0x9d2   :  { %v5242_v61 = vpop.eup %5241  ;;  %v1308_v13 = vmul.f32 %v5240_v36, %v1298_v35 }
 0x9d3   :  { %v1307_v18 = vmul.f32 %v5242_v61, %v1297_v58  ;;  %v5244_v17 = vpop.eup %5243 }
 0x9d4   :  { %v5978_v19 = vadd.f32 %v1308_v13, %v1306_v63  ;;  %v5246_v23 = vpop.eup %5245  ;;  %v1296_v24 = vadd.f32 1.0, %v5244_v17 }
 0x9d5   :  { %v5980_v20 = vadd.f32 %v1307_v18, %v1305_v14  ;;  %v1295_v7 = vadd.f32 1.0, %v5246_v23 }
 0x9d6   :  { %5247 = vtanh.f32 %v5978_v19  ;;  %v1302_v27 = vmul.f32 0.5, %v1296_v24 }
 0x9d7   :  { %5249 = vtanh.f32 %v5980_v20  ;;  %v1301_v32 = vmul.f32 0.5, %v1295_v7 }
 0x9e0   :  { %v5248_v31 = vpop.eup %5247 }
 0x9e1   :  { %v5250_v59 = vpop.eup %5249  ;;  %v1314_v33 = vmul.f32 %v5248_v31, %v1302_v27 }
 0x9e2   :  { %v1313_v30 = vmul.f32 %v5250_v59, %v1301_v32 }
 0x9e3   :  { %1319 = vrot.lane.b32.xlu1 %v1314_v33, %s5397_s22 }
 0x9e4   :  { %1317 = vrot.lane.b32.xlu0 %v1313_v30, %s5397_s22  ;;  %v5986_v60 = vpack.c.bf16 %v1314_v33, %v1313_v30 }
 0x9e7   :  { %1325 = vrot.lane.b32.xlu1 %v1314_v33, %s5399_s25 }
 0x9e8   :  { %1323 = vrot.lane.b32.xlu0 %v1313_v30, %s5399_s25 }
 0xa55   :  { %v1320_v46 = vpop.permute.xlu1 %1319 }
 0xa56   :  { %v5991_v49 = vmul.f32 %v1320_v46, %v5602_v34  ;;  %v1318_v29 = vpop.permute.xlu0 %1317 }
 0xa57   :  { %v1321_v50 = vmul.f32 %v1318_v29, %v5602_v34 }
 0xa59   :  { %v5006_v44 = vpack.c.bf16 %v5991_v49, %v1321_v50  ;;  %v1326_v51 = vpop.permute.xlu1 %1325 }
 0xa5a   :  { %v1324_v57 = vpop.permute.xlu0 %1323  ;;  %v5997_v25 = vmul.f32 %v1326_v51, %v5610_v41 }
 0xa5b   :  { %5007 = vmatpush3.bf16.msra.mxu1 %v5006_v44  ;;  %v6000_v26 = vmul.f32 %v1324_v57, %v5610_v41 }
 0xa5c   :  { %5008 = vmatprep.subr.bf16.mxu1 %v5400_v47 }
 0xa5d   :  { %v5012_v28 = vpack.c.bf16 %v5997_v25, %v6000_v26 }
 0xa5f   :  { %5010 = vmatpush3.bf16.msra.mxu1 %v5986_v60 }
 0xa60   :  { %5011 = vmatprep.subr.bf16.mxu1 %v5400_v47 }
 0xa63   :  { %5013 = vmatpush3.bf16.msra.mxu1 %v5012_v28 }
 0xa64   :  { %5014 = vmatprep.subr.bf16.mxu1 %v5400_v47 }
 0xa66   :  { %4556 = vmatmul.mubr.msk.f32.vlgmr.msra.gmra.mrb[14].mxu1 %vm886_vm5, %v5899_v43 }
 0xa67   :  { %4564 = vmatprep.mubr.msk.f32.mxu1 %vm5401_vm3, %v5398_v3 }
 0xb39   :  { %v1398_v35 = vpop.f32.mrb[14].mxu1 }
 0xb3a   :  { %v1399_v36 = vadd.f32 %v1398_v35, %v5909_v45  ;;  %v4557_v58 = vpop.f32.mrb[15].mxu1 }
 0xb3c   :  { %5251 = vtanh.f32 %v1399_v36 }
 0xb46   :  { %v5252_v61 = vpop.eup %5251 }
 0xb47   :  { %v1403_v63 = vsel %vm501_vm6, %v5252_v61, %v1399_v36 }
 0xb48   :  { %1411 = vrot.lane.b32.xlu1 %v1403_v63, %s5399_s25  ;;  %4103 = vst [vmem:[%s6738_s14 + $0x8] sm:$0xff] %v1403_v63  ;;  %1408 = vrot.lane.b32.xlu0 %v1403_v63, %s5397_s22 }
 0xbba   :  { %v1409_v13 = vpop.permute.xlu0 %1408  ;;  %v1412_v17 = vpop.permute.xlu1 %1411 }
 0xbbb   :  { %v1410_v14 = vmul.f32 %v1409_v13, %v5602_v34  ;;  %v1413_v23 = vmul.f32 %v1412_v17, %v5610_v41 }
 0xbbd   :  { %v5015_v18 = vpack.c.bf16 %v1403_v63, %v1410_v14 }
 0xbbf   :  { %5016 = vmatpush3.bf16.msra.mxu1 %v5015_v18 }
 0xbc0   :  { %4562 = vmatprep.subr.mxu1 %v5398_v3 }
 0xbc3   :  { %4563 = vmatpush3.msra.mxu1 %v1413_v23 }
 0xbc4   :  { %4565 = vmatmul.mubr.msk.f32.vlgmr.msra.gmra.mrb[16].mxu1 %vm211_vm2, %v5634_v55  ;;  %5017 = vmatprep.subr.bf16.mxu1 %v5400_v47 }
 0xbc5   :  { %4573 = vmatprep.mubr.msk.f32.mxu1 %vm5401_vm3, %v5398_v3 }
 0xc97   :  { %v1483_v24 = vpop.f32.mrb[16].mxu1 }
 0xc98   :  { %v1484_v7 = vadd.f32 %v1483_v24, %v5701_v12  ;;  %v4566_v27 = vpop.f32.mrb[17].mxu1 }
 0xc9a   :  { %1491 = vrot.lane.b32.xlu1 %v1484_v7, %s5399_s25  ;;  %1488 = vrot.lane.b32.xlu0 %v1484_v7, %s5397_s22 }
 0xd0c   :  { %v1489_v31 = vpop.permute.xlu0 %1488  ;;  %v1492_v33 = vpop.permute.xlu1 %1491 }
 0xd0d   :  { %v1490_v32 = vmul.f32 %v1489_v31, %v5602_v34  ;;  %v1493_v55 = vmul.f32 %v1492_v33, %v5610_v41 }
 0xd0f   :  { %v5018_v59 = vpack.c.bf16 %v1484_v7, %v1490_v32 }
 0xd11   :  { %5019 = vmatpush3.bf16.msra.mxu1 %v5018_v59 }
 0xd12   :  { %4571 = vmatprep.subr.mxu1 %v5398_v3 }
 0xd15   :  { %4572 = vmatpush3.msra.mxu1 %v1493_v55 }
 0xd16   :  { %4574 = vmatmul.mubr.msk.f32.vlgmr.msra.gmra.mrb[18].mxu1 %vm211_vm2, %v5722_v62  ;;  %5036 = vmatprep.subr.bf16.mxu1 %v5400_v47 }
 0xd17   :  { %4618 = vmatprep.mubr.msk.f32.mxu1 %vm5401_vm3, %v5398_v3 }
 0xde9   :  { %v1563_v12 = vpop.f32.mrb[18].mxu1 }
 0xdea   :  { %v1567_v30 = vadd.f32 %v1563_v12, %v5708_v52  ;;  %v4575_v46 = vpop.f32.mrb[19].mxu1 }
 0xdec   :  { %v1569_v29 = vadd.f32 %v1567_v30, %v5736_v2 }
 0xdee   :  { %5253 = vtanh.f32 %v1569_v29 }
 0xdf8   :  { %v5254_v44 = vpop.eup %5253 }
 0xdf9   :  { %1590 = vrot.lane.b32.xlu1 %v5254_v44, %s5399_s25  ;;  %1587 = vrot.lane.b32.xlu0 %v5254_v44, %s5397_s22  ;;  %v5024_v28 = vpack.c.bf16 %v5254_v44, %v5991_v49 }
 0xe6b   :  { %v1588_v51 = vpop.permute.xlu0 %1587  ;;  %v1591_v35 = vpop.permute.xlu1 %1590 }
 0xe6c   :  { %v1589_v62 = vmul.f32 %v1588_v51, %v5602_v34  ;;  %v1592_v52 = vmul.f32 %v1591_v35, %v5610_v41 }
 0xe6e   :  { %v5020_v57 = vpack.c.bf16 %v1321_v50, %v1589_v62  ;;  %v5032_v2 = vpack.c.bf16 %v6000_v26, %v1592_v52 }
 0xe70   :  { %5021 = vmatprep.subr.bf16.mxu0 %v5020_v57 }
 0xe71   :  { %5023 = vmatpush3.bf16.msra.mxu0 %v5020_v57 }
 0xe72   :  { %5025 = vmatprep.subr.bf16.mxu0 %v5024_v28 }
 0xe75   :  { %5027 = vmatpush3.bf16.msra.mxu0 %v5024_v28 }
 0xe76   :  { %5029 = vmatprep.subr.bf16.mxu0 %v5986_v60 }
 0xe79   :  { %5031 = vmatpush3.bf16.msra.mxu0 %v5986_v60 }
 0xe7a   :  { %5033 = vmatprep.subr.bf16.mxu0 %v5032_v2 }
 0xe7d   :  { %5035 = vmatpush3.bf16.msra.mxu0 %v5032_v2 }
 0xe7e   :  { %4592 = vmatprep.subr.mxu0 %v5997_v25 }
 0xe81   :  { %4593 = vmatpush3.msra.mxu0 %v5997_v25 }
 0xe82   :  { %4595 = vmatmul.mubr.msk.f32.vlgmr.msra.gmra.mrb[20].mxu0 %vm706_vm4, %v5763_v37  ;;  %5048 = vmatprep.subr.bf16.mxu0 %v5400_v47 }
 0xe83   :  { %4597 = vmatprep.mubr.msk.f32.mxu0 %vm706_vm4, %v5768_v38 }
 0xe86   :  { %4598 = vmatmul.mubr.msk.f32.gmra.mrb[22].mxu0 %vm706_vm4, %v5777_v8 }
 0xe87   :  { %4600 = vmatprep.mubr.msk.f32.mxu0 %vm706_vm4, %v5782_v15 }
 0xe8a   :  { %4601 = vmatmul.mubr.msk.f32.gmra.mrb[24].mxu0 %vm706_vm4, %v5791_v39 }
 0xe8b   :  { %4603 = vmatprep.mubr.msk.f32.mxu0 %vm706_vm4, %v5796_v40 }
 0xe8e   :  { %4604 = vmatmul.mubr.msk.f32.gmra.mrb[26].mxu0 %vm706_vm4, %v5805_v1 }
 0xe8f   :  { %4636 = vmatprep.mubr.msk.f32.mxu0 %vm5401_vm3, %v5398_v3 }
 0xf55   :  { %v4596_v60 = vpop.f32.mrb[20].mxu0 }
 0xf56   :  { %v1689_v49 = vadd.f32 %v4596_v60, %v5814_v22  ;;  %v1683_v50 = vpop.f32.mrb[21].mxu0 }
 0xf57   :  { %v1684_v25 = vadd.f32 %v1683_v50, %v5819_v42 }
 0xf58   :  { %v1723_v26 = vmul.f32 0.5, %v1689_v49 }
 0xf59   :  { %v1722_v36 = vmul.f32 0.5, %v1684_v25  ;;  %v4599_v58 = vpop.f32.mrb[22].mxu0 }
 0xf5a   :  { %v1699_v61 = vadd.f32 %v4599_v58, %v5826_v48  ;;  %v1693_v63 = vpop.f32.mrb[23].mxu0  ;;  %5255 = vtanh.f32 %v1723_v26 }
 0xf5b   :  { %v1694_v13 = vadd.f32 %v1693_v63, %v5831_v21  ;;  %5257 = vtanh.f32 %v1722_v36 }
 0xf5c   :  { %v1725_v14 = vmul.f32 0.5, %v1699_v61 }
 0xf5d   :  { %v1724_v18 = vmul.f32 0.5, %v1694_v13  ;;  %v4602_v17 = vpop.f32.mrb[24].mxu0 }
 0xf5e   :  { %5259 = vtanh.f32 %v1725_v14  ;;  %v1703_v23 = vpop.f32.mrb[25].mxu0  ;;  %v1709_v31 = vadd.f32 %v4602_v17, %v5843_v5 }
 0xf5f   :  { %5261 = vtanh.f32 %v1724_v18  ;;  %v1704_v59 = vadd.f32 %v1703_v23, %v5853_v10 }
 0xf60   :  { %v1727_v12 = vmul.f32 0.5, %v1709_v31 }
 0xf61   :  { %v4605_v24 = vpop.f32.mrb[26].mxu0  ;;  %v1726_v46 = vmul.f32 0.5, %v1704_v59 }
 0xf62   :  { %v1719_v7 = vadd.f32 %v4605_v24, %v5838_v0  ;;  %v1713_v27 = vpop.f32.mrb[27].mxu0 }
 0xf63   :  { %v1714_v32 = vadd.f32 %v1713_v27, %v5848_v6 }
 0xf64   :  { %5263 = vtanh.f32 %v1719_v7  ;;  %v5256_v33 = vpop.eup %5255 }
 0xf65   :  { %5265 = vtanh.f32 %v1714_v32  ;;  %v5258_v55 = vpop.eup %5257  ;;  %v1735_v44 = vadd.f32 1.0, %v5256_v33 }
 0xf66   :  { %v1734_v62 = vadd.f32 1.0, %v5258_v55  ;;  %5267 = vtanh.f32 %v1727_v12 }
 0xf67   :  { %5269 = vtanh.f32 %v1726_v46  ;;  %v1741_v52 = vmul.f32 0.5, %v1735_v44 }
 0xf68   :  { %v5260_v30 = vpop.eup %5259  ;;  %v1740_v60 = vmul.f32 0.5, %v1734_v62 }
 0xf69   :  { %v5262_v29 = vpop.eup %5261  ;;  %v1737_v51 = vadd.f32 1.0, %v5260_v30 }
 0xf6a   :  { %v1736_v57 = vadd.f32 1.0, %v5262_v29 }
 0xf6b   :  { %v1743_v28 = vmul.f32 0.5, %v1737_v51 }
 0xf6c   :  { %v1742_v35 = vmul.f32 0.5, %v1736_v57 }
 0xf6d   :  { %v1749_v50 = vmul.f32 %v1743_v28, %v5978_v19 }
 0xf6e   :  { %v5264_v2 = vpop.eup %5263  ;;  %v1748_v26 = vmul.f32 %v1742_v35, %v5980_v20 }
 0xf6f   :  { %v5266_v49 = vpop.eup %5265  ;;  %v1751_v25 = vmul.f32 %v5264_v2, %v1741_v52 }
 0xf70   :  { %v1750_v36 = vmul.f32 %v5266_v49, %v1740_v60  ;;  %v5268_v63 = vpop.eup %5267 }
 0xf71   :  { %v6077_v58 = vadd.f32 %v1751_v25, %v1749_v50  ;;  %v5270_v13 = vpop.eup %5269  ;;  %v1739_v14 = vadd.f32 1.0, %v5268_v63  ;;  %v6127_v25 = vld [vmem:[%s6728_s5] sm:$0xff] }
 0xf72   :  { %v6079_v61 = vadd.f32 %v1750_v36, %v1748_v26  ;;  %v1738_v18 = vadd.f32 1.0, %v5270_v13  ;;  %v6136_v26 = vld [vmem:[%s6729_s6] sm:$0xff] }
 0xf73   :  { %5271 = vtanh.f32 %v6077_v58  ;;  %v1745_v17 = vmul.f32 0.5, %v1739_v14 }
 0xf74   :  { %5273 = vtanh.f32 %v6079_v61  ;;  %v1744_v24 = vmul.f32 0.5, %v1738_v18 }
 0xf7d   :  { %v5272_v23 = vpop.eup %5271 }
 0xf7e   :  { %v5274_v19 = vpop.eup %5273  ;;  %v1757_v7 = vmul.f32 %v5272_v23, %v1745_v17 }
 0xf7f   :  { %v1756_v27 = vmul.f32 %v5274_v19, %v1744_v24  ;;  %v6147_v24 = vld [vmem:[%s6730_s8] sm:$0xff] }
 0xf80   :  { %1762 = vrot.lane.b32.xlu1 %v1757_v7, %s5397_s22 }
 0xf81   :  { %1760 = vrot.lane.b32.xlu0 %v1756_v27, %s5397_s22  ;;  %v6085_v20 = vpack.c.bf16 %v1757_v7, %v1756_v27 }
 0xf84   :  { %1768 = vrot.lane.b32.xlu1 %v1757_v7, %s5399_s25  ;;  %v6157_v7 = vld [vmem:[%s6732_s9] sm:$0xff] }
 0xf85   :  { %1766 = vrot.lane.b32.xlu0 %v1756_v27, %s5399_s25 }
 0xff2   :  { %v1763_v31 = vpop.permute.xlu1 %1762 }
 0xff3   :  { %v6090_v32 = vmul.f32 %v1763_v31, %v5602_v34  ;;  %v1761_v59 = vpop.permute.xlu0 %1760 }
 0xff4   :  { %v6093_v33 = vmul.f32 %v1761_v59, %v5602_v34 }
 0xff6   :  { %v5037_v55 = vpack.c.bf16 %v6090_v32, %v6093_v33  ;;  %v1769_v12 = vpop.permute.xlu1 %1768 }
 0xff7   :  { %v1767_v30 = vpop.permute.xlu0 %1766  ;;  %v6099_v46 = vmul.f32 %v1769_v12, %v5610_v41 }
 0xff8   :  { %5038 = vmatpush3.bf16.msra.mxu1 %v5037_v55  ;;  %v6102_v29 = vmul.f32 %v1767_v30, %v5610_v41 }
 0xff9   :  { %5039 = vmatprep.subr.bf16.mxu1 %v5400_v47 }
 0xffa   :  { %v5043_v44 = vpack.c.bf16 %v6099_v46, %v6102_v29 }
 0xffc   :  { %5041 = vmatpush3.bf16.msra.mxu1 %v6085_v20 }
 0xffd   :  { %5042 = vmatprep.subr.bf16.mxu1 %v5400_v47 }
0x1000   :  { %5044 = vmatpush3.bf16.msra.mxu1 %v5043_v44 }
0x1001   :  { %5045 = vmatprep.subr.bf16.mxu1 %v5400_v47 }
0x1003   :  { %4619 = vmatmul.mubr.msk.f32.vlgmr.msra.gmra.mrb[20].mxu1 %vm886_vm5, %v5899_v43 }
0x1004   :  { %4627 = vmatprep.mubr.msk.f32.mxu1 %vm5401_vm3, %v5398_v3 }
0x10d6   :  { %v1841_v51 = vpop.f32.mrb[20].mxu1 }
0x10d7   :  { %v1842_v62 = vadd.f32 %v1841_v51, %v5909_v45  ;;  %v4620_v57 = vpop.f32.mrb[21].mxu1 }
0x10d9   :  { %5275 = vtanh.f32 %v1842_v62 }
0x10e3   :  { %v5276_v28 = vpop.eup %5275 }
0x10e4   :  { %v1846_v35 = vsel %vm501_vm6, %v5276_v28, %v1842_v62 }
0x10e5   :  { %1854 = vrot.lane.b32.xlu1 %v1846_v35, %s5399_s25  ;;  %4115 = vst [vmem:[%s6738_s14 + $0x10] sm:$0xff] %v1846_v35  ;;  %1851 = vrot.lane.b32.xlu0 %v1846_v35, %s5397_s22 }
0x1157   :  { %v1852_v52 = vpop.permute.xlu0 %1851  ;;  %v1855_v49 = vpop.permute.xlu1 %1854 }
0x1158   :  { %v1853_v2 = vmul.f32 %v1852_v52, %v5602_v34  ;;  %v1856_v50 = vmul.f32 %v1855_v49, %v5610_v41 }
0x115a   :  { %v5046_v60 = vpack.c.bf16 %v1846_v35, %v1853_v2 }
0x115c   :  { %5047 = vmatpush3.bf16.msra.mxu1 %v5046_v60 }
0x115d   :  { %4625 = vmatprep.subr.mxu1 %v5398_v3 }
0x1160   :  { %4626 = vmatpush3.msra.mxu1 %v1856_v50 }
0x1161   :  { %4628 = vmatmul.mubr.msk.f32.vlgmr.msra.gmra.mrb[22].mxu1 %vm211_vm2, %v6127_v25 }
0x1162   :  { %4657 = vmatprep.mubr.msk.f32.mxu1 %vm706_vm4, %v5750_v16 }
0x1234   :  { %v1926_v36 = vpop.f32.mrb[22].mxu1 }
0x1235   :  { %v1927_v63 = vadd.f32 %v1926_v36, %v6136_v26  ;;  %v4629_v13 = vpop.f32.mrb[23].mxu1 }
0x1237   :  { %1934 = vrot.lane.b32.xlu1 %v1927_v63, %s5399_s25  ;;  %1931 = vrot.lane.b32.xlu0 %v1927_v63, %s5397_s22 }
0x12a9   :  { %v1932_v14 = vpop.permute.xlu0 %1931  ;;  %v1935_v23 = vpop.permute.xlu1 %1934 }
0x12aa   :  { %v1933_v18 = vmul.f32 %v1932_v14, %v5602_v34  ;;  %v1936_v16 = vmul.f32 %v1935_v23, %v5610_v41 }
0x12ac   :  { %v5049_v17 = vpack.c.bf16 %v1927_v63, %v1933_v18 }
0x12ae   :  { %5050 = vmatpush3.bf16.msra.mxu0 %v5049_v17 }
0x12af   :  { %4634 = vmatprep.subr.mxu0 %v5398_v3 }
0x12b2   :  { %4635 = vmatpush3.msra.mxu0 %v1936_v16 }
0x12b3   :  { %4637 = vmatmul.mubr.msk.f32.vlgmr.msra.gmra.mrb[28].mxu0 %vm211_vm2, %v6147_v24  ;;  %5067 = vmatprep.subr.bf16.mxu0 %v5400_v47 }
0x12b4   :  { %4681 = vmatprep.mubr.msk.f32.mxu0 %vm5401_vm3, %v5398_v3 }
0x1386   :  { %v2006_v19 = vpop.f32.mrb[28].mxu0 }
0x1387   :  { %v2010_v27 = vadd.f32 %v2006_v19, %v5710_v53  ;;  %v4638_v31 = vpop.f32.mrb[29].mxu0 }
0x1389   :  { %v2012_v59 = vadd.f32 %v6157_v7, %v2010_v27 }
0x138b   :  { %5277 = vtanh.f32 %v2012_v59 }
0x1395   :  { %v5278_v55 = vpop.eup %5277 }
0x1396   :  { %2033 = vrot.lane.b32.xlu1 %v5278_v55, %s5399_s25  ;;  %2030 = vrot.lane.b32.xlu0 %v5278_v55, %s5397_s22  ;;  %v5055_v51 = vpack.c.bf16 %v5278_v55, %v6090_v32 }
0x1408   :  { %v2031_v12 = vpop.permute.xlu0 %2030  ;;  %v2034_v62 = vpop.permute.xlu1 %2033 }
0x1409   :  { %v2032_v30 = vmul.f32 %v2031_v12, %v5602_v34  ;;  %v2035_v53 = vmul.f32 %v2034_v62, %v5610_v41 }
0x140b   :  { %v5051_v44 = vpack.c.bf16 %v6093_v33, %v2032_v30  ;;  %v5063_v57 = vpack.c.bf16 %v6102_v29, %v2035_v53 }
0x140d   :  { %5052 = vmatprep.subr.bf16.mxu1 %v5051_v44 }
0x140e   :  { %5054 = vmatpush3.bf16.msra.mxu1 %v5051_v44 }
0x140f   :  { %5056 = vmatprep.subr.bf16.mxu1 %v5055_v51 }
0x1412   :  { %5058 = vmatpush3.bf16.msra.mxu1 %v5055_v51 }
0x1413   :  { %5060 = vmatprep.subr.bf16.mxu1 %v6085_v20 }
0x1416   :  { %5062 = vmatpush3.bf16.msra.mxu1 %v6085_v20 }
0x1417   :  { %5064 = vmatprep.subr.bf16.mxu1 %v5063_v57 }
0x141a   :  { %5066 = vmatpush3.bf16.msra.mxu1 %v5063_v57 }
0x141b   :  { %4655 = vmatprep.subr.mxu1 %v6099_v46 }
0x141e   :  { %4656 = vmatpush3.msra.mxu1 %v6099_v46 }
0x141f   :  { %4658 = vmatmul.mubr.msk.f32.vlgmr.msra.gmra.mrb[24].mxu1 %vm706_vm4, %v5763_v37 }
0x1420   :  { %4660 = vmatprep.mubr.msk.f32.mxu1 %vm706_vm4, %v5768_v38 }
0x1423   :  { %4661 = vmatmul.mubr.msk.f32.gmra.mrb[26].mxu1 %vm706_vm4, %v5777_v8 }
0x1424   :  { %4663 = vmatprep.mubr.msk.f32.mxu1 %vm706_vm4, %v5782_v15 }
0x1427   :  { %4664 = vmatmul.mubr.msk.f32.gmra.mrb[28].mxu1 %vm706_vm4, %v5791_v39 }
0x1428   :  { %4666 = vmatprep.mubr.msk.f32.mxu1 %vm706_vm4, %v5796_v40 }
0x142b   :  { %4667 = vmatmul.mubr.msk.f32.gmra.mrb[30].mxu1 %vm706_vm4, %v5805_v1 }
0x14f2   :  { %v4659_v20 = vpop.f32.mrb[24].mxu1 }
0x14f3   :  { %v2132_v37 = vadd.f32 %v4659_v20, %v5814_v22  ;;  %v2126_v32 = vpop.f32.mrb[25].mxu1 }
0x14f4   :  { %v2127_v38 = vadd.f32 %v2126_v32, %v5819_v42 }
0x14f5   :  { %v2166_v33 = vmul.f32 0.5, %v2132_v37 }
0x14f6   :  { %v2165_v8 = vmul.f32 0.5, %v2127_v38  ;;  %v4662_v46 = vpop.f32.mrb[26].mxu1 }
0x14f7   :  { %v2142_v15 = vadd.f32 %v4662_v46, %v5826_v48  ;;  %v2136_v29 = vpop.f32.mrb[27].mxu1  ;;  %5279 = vtanh.f32 %v2166_v33 }
0x14f8   :  { %v2137_v39 = vadd.f32 %v2136_v29, %v5831_v21  ;;  %5281 = vtanh.f32 %v2165_v8 }
0x14f9   :  { %v2168_v28 = vmul.f32 0.5, %v2142_v15 }
0x14fa   :  { %v2167_v40 = vmul.f32 0.5, %v2137_v39  ;;  %v4665_v35 = vpop.f32.mrb[28].mxu1 }
0x14fb   :  { %5283 = vtanh.f32 %v2168_v28  ;;  %v2146_v1 = vpop.f32.mrb[29].mxu1  ;;  %v2152_v2 = vadd.f32 %v4665_v35, %v5843_v5 }
0x14fc   :  { %5285 = vtanh.f32 %v2167_v40  ;;  %v2147_v48 = vadd.f32 %v2146_v1, %v5853_v10 }
0x14fd   :  { %v2170_v50 = vmul.f32 0.5, %v2152_v2 }
0x14fe   :  { %v4668_v22 = vpop.f32.mrb[30].mxu1  ;;  %v2169_v63 = vmul.f32 0.5, %v2147_v48 }
0x14ff   :  { %v2162_v52 = vadd.f32 %v4668_v22, %v5838_v0  ;;  %v2156_v42 = vpop.f32.mrb[31].mxu1 }
0x1500   :  { %v2157_v60 = vadd.f32 %v2156_v42, %v5848_v6 }
0x1501   :  { %5287 = vtanh.f32 %v2162_v52  ;;  %v5280_v21 = vpop.eup %5279 }
0x1502   :  { %5289 = vtanh.f32 %v2157_v60  ;;  %v5282_v49 = vpop.eup %5281  ;;  %v2178_v14 = vadd.f32 1.0, %v5280_v21 }
0x1503   :  { %v2177_v17 = vadd.f32 1.0, %v5282_v49  ;;  %5291 = vtanh.f32 %v2170_v50 }
0x1504   :  { %5293 = vtanh.f32 %v2169_v63  ;;  %v2184_v5 = vmul.f32 0.5, %v2178_v14 }
0x1505   :  { %v5284_v36 = vpop.eup %5283  ;;  %v2183_v19 = vmul.f32 0.5, %v2177_v17 }
0x1506   :  { %v5286_v13 = vpop.eup %5285  ;;  %v2180_v18 = vadd.f32 1.0, %v5284_v36 }
0x1507   :  { %v2179_v23 = vadd.f32 1.0, %v5286_v13 }
0x1508   :  { %v2186_v0 = vmul.f32 0.5, %v2180_v18 }
0x1509   :  { %v2185_v16 = vmul.f32 0.5, %v2179_v23 }
0x150a   :  { %v2192_v27 = vmul.f32 %v2186_v0, %v6077_v58 }
0x150b   :  { %v5288_v6 = vpop.eup %5287  ;;  %v2191_v59 = vmul.f32 %v2185_v16, %v6079_v61 }
0x150c   :  { %v5290_v10 = vpop.eup %5289  ;;  %v2194_v31 = vmul.f32 %v5288_v6, %v2184_v5 }
0x150d   :  { %v2193_v55 = vmul.f32 %v5290_v10, %v2183_v19  ;;  %v5292_v44 = vpop.eup %5291  ;;  %v6266_v10 = vld [vmem:[%s6733_s10] sm:$0xff] }
0x150e   :  { %v6196_v12 = vadd.f32 %v2194_v31, %v2192_v27  ;;  %v5294_v51 = vpop.eup %5293  ;;  %v2182_v62 = vadd.f32 1.0, %v5292_v44  ;;  %4720 = vmatprep.mubr.msk.f32.mxu1 %vm706_vm4, %v6266_v10 }
0x150f   :  { %v6198_v30 = vadd.f32 %v2193_v55, %v2191_v59  ;;  %v2181_v53 = vadd.f32 1.0, %v5294_v51 }
0x1510   :  { %5295 = vtanh.f32 %v6196_v12  ;;  %v2188_v57 = vmul.f32 0.5, %v2182_v62  ;;  %v6281_v62 = vld [vmem:[%s6733_s10 + $0x8] sm:$0xff] }
0x1511   :  { %5297 = vtanh.f32 %v6198_v30  ;;  %v2187_v37 = vmul.f32 0.5, %v2181_v53  ;;  %v6286_v53 = vld [vmem:[%s6733_s10 + $0x10] sm:$0xff] }
0x151a   :  { %v5296_v20 = vpop.eup %5295 }
0x151b   :  { %v5298_v58 = vpop.eup %5297  ;;  %v2200_v32 = vmul.f32 %v5296_v20, %v2188_v57  ;;  %v6296_v57 = vld [vmem:[%s6733_s10 + $0x18] sm:$0xff]  ;;  %v6301_v20 = vld [vmem:[%s6733_s10 + $0x20] sm:$0xff] }
0x151c   :  { %v2199_v38 = vmul.f32 %v5298_v58, %v2187_v37  ;;  %v6310_v37 = vld [vmem:[%s6733_s10 + $0x28] sm:$0xff]  ;;  %v6315_v58 = vld [vmem:[%s6733_s10 + $0x30] sm:$0xff] }
0x151d   :  { %2205 = vrot.lane.b32.xlu1 %v2200_v32, %s5397_s22 }
0x151e   :  { %2203 = vrot.lane.b32.xlu0 %v2199_v38, %s5397_s22  ;;  %v6204_v61 = vpack.c.bf16 %v2200_v32, %v2199_v38 }
0x1521   :  { %2211 = vrot.lane.b32.xlu1 %v2200_v32, %s5399_s25  ;;  %v6324_v32 = vld [vmem:[%s6733_s10 + $0x38] sm:$0xff] }
0x1522   :  { %2209 = vrot.lane.b32.xlu0 %v2199_v38, %s5399_s25  ;;  %v6333_v38 = vld [vmem:[%s6734_s11 + $0x8] sm:$0xff] }
0x158f   :  { %v2206_v33 = vpop.permute.xlu1 %2205 }
0x1590   :  { %v6209_v8 = vmul.f32 %v2206_v33, %v5602_v34  ;;  %v2204_v46 = vpop.permute.xlu0 %2203 }
0x1591   :  { %v6212_v15 = vmul.f32 %v2204_v46, %v5602_v34 }
0x1593   :  { %v5068_v29 = vpack.c.bf16 %v6209_v8, %v6212_v15  ;;  %v2212_v39 = vpop.permute.xlu1 %2211 }
0x1594   :  { %v2210_v28 = vpop.permute.xlu0 %2209  ;;  %v6218_v40 = vmul.f32 %v2212_v39, %v5610_v41 }
0x1595   :  { %5069 = vmatpush3.bf16.msra.mxu0 %v5068_v29  ;;  %v6221_v35 = vmul.f32 %v2210_v28, %v5610_v41  ;;  %v6345_v29 = vld [vmem:[%s6734_s11 + $0x18] sm:$0xff]  ;;  %v6350_v28 = vld [vmem:[%s6734_s11 + $0x10] sm:$0xff] }
0x1596   :  { %5070 = vmatprep.subr.bf16.mxu0 %v5400_v47 }
0x1597   :  { %v5074_v1 = vpack.c.bf16 %v6218_v40, %v6221_v35 }
0x1599   :  { %5072 = vmatpush3.bf16.msra.mxu0 %v6204_v61 }
0x159a   :  { %5073 = vmatprep.subr.bf16.mxu0 %v5400_v47 }
0x159d   :  { %5075 = vmatpush3.bf16.msra.mxu0 %v5074_v1 }
0x159e   :  { %5076 = vmatprep.subr.bf16.mxu0 %v5400_v47 }
0x15a0   :  { %4682 = vmatmul.mubr.msk.f32.vlgmr.msra.gmra.mrb[30].mxu0 %vm886_vm5, %v5899_v43 }
0x15a1   :  { %4690 = vmatprep.mubr.msk.f32.mxu0 %vm5401_vm3, %v5398_v3 }
0x1673   :  { %v2284_v22 = vpop.f32.mrb[30].mxu0 }
0x1674   :  { %v2285_v52 = vadd.f32 %v2284_v22, %v5909_v45  ;;  %v4683_v42 = vpop.f32.mrb[31].mxu0 }
0x1676   :  { %5299 = vtanh.f32 %v2285_v52 }
0x1680   :  { %v5300_v2 = vpop.eup %5299 }
0x1681   :  { %v2289_v60 = vsel %vm501_vm6, %v5300_v2, %v2285_v52 }
0x1682   :  { %2297 = vrot.lane.b32.xlu1 %v2289_v60, %s5399_s25  ;;  %4127 = vst [vmem:[%s6738_s14 + $0x18] sm:$0xff] %v2289_v60  ;;  %2294 = vrot.lane.b32.xlu0 %v2289_v60, %s5397_s22 }
0x16f4   :  { %v2295_v43 = vpop.permute.xlu0 %2294  ;;  %v2298_v49 = vpop.permute.xlu1 %2297 }
0x16f5   :  { %v2296_v48 = vmul.f32 %v2295_v43, %v5602_v34  ;;  %v2299_v45 = vmul.f32 %v2298_v49, %v5610_v41  ;;  %v6367_v49 = vld [vmem:[%s6734_s11 + $0x30] sm:$0xff] }
0x16f7   :  { %v5077_v21 = vpack.c.bf16 %v2289_v60, %v2296_v48  ;;  %v6357_v48 = vld [vmem:[%s6734_s11 + $0x38] sm:$0xff] }
0x16f9   :  { %5078 = vmatpush3.bf16.msra.mxu0 %v5077_v21  ;;  %v6362_v21 = vld [vmem:[%s6734_s11 + $0x28] sm:$0xff] }
0x16fa   :  { %4688 = vmatprep.subr.mxu0 %v5398_v3 }
0x16fd   :  { %4689 = vmatpush3.msra.mxu0 %v2299_v45  ;;  %v6372_v45 = vld [vmem:[%s6734_s11 + $0x20] sm:$0xff] }
0x16fe   :  { %4691 = vmatmul.mubr.msk.f32.vlgmr.msra.gmra.mrb[32].mxu0 %vm211_vm2, %v6127_v25  ;;  %5079 = vmatprep.subr.bf16.mxu0 %v5400_v47 }
0x16ff   :  { %4699 = vmatprep.mubr.msk.f32.mxu0 %vm5401_vm3, %v5398_v3 }
0x17d1   :  { %v2369_v50 = vpop.f32.mrb[32].mxu0 }
0x17d2   :  { %v2370_v36 = vadd.f32 %v2369_v50, %v6136_v26  ;;  %v4692_v63 = vpop.f32.mrb[33].mxu0 }
0x17d4   :  { %2377 = vrot.lane.b32.xlu1 %v2370_v36, %s5399_s25  ;;  %2374 = vrot.lane.b32.xlu0 %v2370_v36, %s5397_s22 }
0x1846   :  { %v2375_v13 = vpop.permute.xlu0 %2374  ;;  %v2378_v17 = vpop.permute.xlu1 %2377 }
0x1847   :  { %v2376_v14 = vmul.f32 %v2375_v13, %v5602_v34  ;;  %v2379_v23 = vmul.f32 %v2378_v17, %v5610_v41 }
0x1849   :  { %v5080_v18 = vpack.c.bf16 %v2370_v36, %v2376_v14 }
0x184b   :  { %5081 = vmatpush3.bf16.msra.mxu0 %v5080_v18 }
0x184c   :  { %4697 = vmatprep.subr.mxu0 %v5398_v3 }
0x184f   :  { %4698 = vmatpush3.msra.mxu0 %v2379_v23 }
0x1850   :  { %4700 = vmatmul.mubr.msk.f32.vlgmr.msra.gmra.mrb[34].mxu0 %vm211_vm2, %v6147_v24  ;;  %5098 = vmatprep.subr.bf16.mxu0 %v5400_v47 }
0x1851   :  { %4744 = vmatprep.mubr.msk.f32.mxu0 %vm5401_vm3, %v5398_v3 }
0x1923   :  { %v2449_v0 = vpop.f32.mrb[34].mxu0 }
0x1924   :  { %v2453_v16 = vadd.f32 %v2449_v0, %v5694_v4  ;;  %v4701_v5 = vpop.f32.mrb[35].mxu0 }
0x1926   :  { %v2455_v6 = vadd.f32 %v2453_v16, %v6157_v7 }
0x1928   :  { %5301 = vtanh.f32 %v2455_v6 }
0x1932   :  { %v5302_v19 = vpop.eup %5301 }
0x1933   :  { %2476 = vrot.lane.b32.xlu1 %v5302_v19, %s5399_s25  ;;  %2473 = vrot.lane.b32.xlu0 %v5302_v19, %s5397_s22  ;;  %v5086_v59 = vpack.c.bf16 %v5302_v19, %v6209_v8 }
0x19a5   :  { %v2474_v27 = vpop.permute.xlu0 %2473  ;;  %v2477_v55 = vpop.permute.xlu1 %2476 }
0x19a6   :  { %v2475_v4 = vmul.f32 %v2474_v27, %v5602_v34  ;;  %v2478_v44 = vmul.f32 %v2477_v55, %v5610_v41 }
0x19a8   :  { %v5082_v31 = vpack.c.bf16 %v6212_v15, %v2475_v4  ;;  %v5094_v51 = vpack.c.bf16 %v6221_v35, %v2478_v44 }
0x19aa   :  { %5083 = vmatprep.subr.bf16.mxu1 %v5082_v31 }
0x19ab   :  { %5085 = vmatpush3.bf16.msra.mxu1 %v5082_v31 }
0x19ac   :  { %5087 = vmatprep.subr.bf16.mxu1 %v5086_v59 }
0x19af   :  { %5089 = vmatpush3.bf16.msra.mxu1 %v5086_v59 }
0x19b0   :  { %5091 = vmatprep.subr.bf16.mxu1 %v6204_v61 }
0x19b3   :  { %5093 = vmatpush3.bf16.msra.mxu1 %v6204_v61  ;;  %v6338_v61 = vld [vmem:[%s6734_s11] sm:$0xff] }
0x19b4   :  { %5095 = vmatprep.subr.bf16.mxu1 %v5094_v51 }
0x19b7   :  { %5097 = vmatpush3.bf16.msra.mxu1 %v5094_v51 }
0x19b8   :  { %4718 = vmatprep.subr.mxu1 %v6218_v40 }
0x19bb   :  { %4719 = vmatpush3.msra.mxu1 %v6218_v40 }
0x19bc   :  { %4721 = vmatmul.mubr.msk.f32.vlgmr.msra.gmra.mrb[32].mxu1 %vm706_vm4, %v6281_v62 }
0x19bd   :  { %4723 = vmatprep.mubr.msk.f32.mxu1 %vm706_vm4, %v6286_v53 }
0x19c0   :  { %4724 = vmatmul.mubr.msk.f32.gmra.mrb[34].mxu1 %vm706_vm4, %v6296_v57 }
0x19c1   :  { %4726 = vmatprep.mubr.msk.f32.mxu1 %vm706_vm4, %v6301_v20 }
0x19c4   :  { %4727 = vmatmul.mubr.msk.f32.gmra.mrb[36].mxu1 %vm706_vm4, %v6310_v37 }
0x19c5   :  { %4729 = vmatprep.mubr.msk.f32.mxu1 %vm706_vm4, %v6315_v58 }
0x19c8   :  { %4730 = vmatmul.mubr.msk.f32.gmra.mrb[38].mxu1 %vm706_vm4, %v6324_v32 }
0x19c9   :  { %4783 = vmatprep.mubr.msk.f32.mxu1 %vm706_vm4, %v6266_v10 }
0x1a8f   :  { %v4722_v33 = vpop.f32.mrb[32].mxu1 }
0x1a90   :  { %v2575_v8 = vadd.f32 %v4722_v33, %v6333_v38  ;;  %v2569_v46 = vpop.f32.mrb[33].mxu1 }
0x1a91   :  { %v2570_v15 = vadd.f32 %v2569_v46, %v6338_v61 }
0x1a92   :  { %v2609_v39 = vmul.f32 0.5, %v2575_v8 }
0x1a93   :  { %v2608_v40 = vmul.f32 0.5, %v2570_v15  ;;  %v4725_v35 = vpop.f32.mrb[34].mxu1 }
0x1a94   :  { %v2585_v1 = vadd.f32 %v4725_v35, %v6345_v29  ;;  %v2579_v22 = vpop.f32.mrb[35].mxu1  ;;  %5303 = vtanh.f32 %v2609_v39 }
0x1a95   :  { %v2580_v52 = vadd.f32 %v2579_v22, %v6350_v28  ;;  %5305 = vtanh.f32 %v2608_v40 }
0x1a96   :  { %v2611_v42 = vmul.f32 0.5, %v2585_v1 }
0x1a97   :  { %v2610_v2 = vmul.f32 0.5, %v2580_v52  ;;  %v4728_v60 = vpop.f32.mrb[36].mxu1 }
0x1a98   :  { %5307 = vtanh.f32 %v2611_v42  ;;  %v2589_v43 = vpop.f32.mrb[37].mxu1  ;;  %v2595_v13 = vadd.f32 %v4728_v60, %v6362_v21 }
0x1a99   :  { %5309 = vtanh.f32 %v2610_v2  ;;  %v2590_v18 = vadd.f32 %v2589_v43, %v6372_v45 }
0x1a9a   :  { %v2613_v0 = vmul.f32 0.5, %v2595_v13 }
0x1a9b   :  { %v4731_v50 = vpop.f32.mrb[38].mxu1  ;;  %v2612_v5 = vmul.f32 0.5, %v2590_v18 }
0x1a9c   :  { %v2605_v36 = vadd.f32 %v4731_v50, %v6357_v48  ;;  %v2599_v63 = vpop.f32.mrb[39].mxu1 }
0x1a9d   :  { %v2600_v14 = vadd.f32 %v2599_v63, %v6367_v49 }
0x1a9e   :  { %5311 = vtanh.f32 %v2605_v36  ;;  %v5304_v17 = vpop.eup %5303 }
0x1a9f   :  { %5313 = vtanh.f32 %v2600_v14  ;;  %v5306_v23 = vpop.eup %5305  ;;  %v2621_v19 = vadd.f32 1.0, %v5304_v17 }
0x1aa0   :  { %v2620_v4 = vadd.f32 1.0, %v5306_v23  ;;  %5315 = vtanh.f32 %v2613_v0 }
0x1aa1   :  { %5317 = vtanh.f32 %v2612_v5  ;;  %v2627_v44 = vmul.f32 0.5, %v2621_v19 }
0x1aa2   :  { %v5308_v16 = vpop.eup %5307  ;;  %v2626_v33 = vmul.f32 0.5, %v2620_v4  ;;  %v6424_v4 = vld [vmem:[%s6737_s13] sm:$0xff] }
0x1aa3   :  { %v5310_v6 = vpop.eup %5309  ;;  %v2623_v27 = vadd.f32 1.0, %v5308_v16 }
0x1aa4   :  { %v2622_v31 = vadd.f32 1.0, %v5310_v6 }
0x1aa5   :  { %v2629_v59 = vmul.f32 0.5, %v2623_v27  ;;  %v6414_v27 = vld [vmem:[%s6736_s12] sm:$0xff] }
0x1aa6   :  { %v2628_v55 = vmul.f32 0.5, %v2622_v31 }
0x1aa7   :  { %v2635_v46 = vmul.f32 %v2629_v59, %v6196_v12 }
0x1aa8   :  { %v5312_v51 = vpop.eup %5311  ;;  %v2634_v39 = vmul.f32 %v2628_v55, %v6198_v30 }
0x1aa9   :  { %v5314_v8 = vpop.eup %5313  ;;  %v2637_v15 = vmul.f32 %v5312_v51, %v2627_v44 }
0x1aaa   :  { %v2636_v40 = vmul.f32 %v5314_v8, %v2626_v33  ;;  %v5316_v22 = vpop.eup %5315 }
0x1aab   :  { %v6380_v35 = vadd.f32 %v2637_v15, %v2635_v46  ;;  %v5318_v52 = vpop.eup %5317  ;;  %v2625_v42 = vadd.f32 1.0, %v5316_v22 }
0x1aac   :  { %v6382_v1 = vadd.f32 %v2636_v40, %v2634_v39  ;;  %v2624_v2 = vadd.f32 1.0, %v5318_v52 }
0x1aad   :  { %5319 = vtanh.f32 %v6380_v35  ;;  %v2631_v60 = vmul.f32 0.5, %v2625_v42 }
0x1aae   :  { %5321 = vtanh.f32 %v6382_v1  ;;  %v2630_v50 = vmul.f32 0.5, %v2624_v2 }
0x1ab7   :  { %v5320_v43 = vpop.eup %5319 }
0x1ab8   :  { %v5322_v12 = vpop.eup %5321  ;;  %v2643_v36 = vmul.f32 %v5320_v43, %v2631_v60 }
0x1ab9   :  { %v2642_v63 = vmul.f32 %v5322_v12, %v2630_v50 }
0x1aba   :  { %2648 = vrot.lane.b32.xlu1 %v2643_v36, %s5397_s22 }
0x1abb   :  { %2646 = vrot.lane.b32.xlu0 %v2642_v63, %s5397_s22  ;;  %v6388_v30 = vpack.c.bf16 %v2643_v36, %v2642_v63 }
0x1abe   :  { %2654 = vrot.lane.b32.xlu1 %v2643_v36, %s5399_s25 }
0x1abf   :  { %2652 = vrot.lane.b32.xlu0 %v2642_v63, %s5399_s25 }
0x1b2c   :  { %v2649_v13 = vpop.permute.xlu1 %2648 }
0x1b2d   :  { %v6393_v14 = vmul.f32 %v2649_v13, %v5602_v34  ;;  %v2647_v18 = vpop.permute.xlu0 %2646 }
0x1b2e   :  { %v6396_v17 = vmul.f32 %v2647_v18, %v5602_v34 }
0x1b30   :  { %v5099_v23 = vpack.c.bf16 %v6393_v14, %v6396_v17  ;;  %v2655_v0 = vpop.permute.xlu1 %2654 }
0x1b31   :  { %v2653_v16 = vpop.permute.xlu0 %2652  ;;  %v6402_v5 = vmul.f32 %v2655_v0, %v5610_v41 }
0x1b32   :  { %5100 = vmatpush3.bf16.msra.mxu0 %v5099_v23  ;;  %v6405_v6 = vmul.f32 %v2653_v16, %v5610_v41 }
0x1b33   :  { %5101 = vmatprep.subr.bf16.mxu0 %v5400_v47 }
0x1b34   :  { %v5105_v19 = vpack.c.bf16 %v6402_v5, %v6405_v6 }
0x1b36   :  { %5103 = vmatpush3.bf16.msra.mxu0 %v6388_v30 }
0x1b37   :  { %5104 = vmatprep.subr.bf16.mxu0 %v5400_v47 }
0x1b3a   :  { %5106 = vmatpush3.bf16.msra.mxu0 %v5105_v19 }
0x1b3b   :  { %5107 = vmatprep.subr.bf16.mxu0 %v5400_v47 }
0x1b3d   :  { %4745 = vmatmul.mubr.msk.f32.vlgmr.msra.gmra.mrb[36].mxu0 %vm886_vm5, %v6414_v27 }
0x1b3e   :  { %4753 = vmatprep.mubr.msk.f32.mxu0 %vm5401_vm3, %v5398_v3 }
0x1c10   :  { %v2727_v31 = vpop.f32.mrb[36].mxu0 }
0x1c11   :  { %v2728_v59 = vadd.f32 %v2727_v31, %v6424_v4  ;;  %v4746_v55 = vpop.f32.mrb[37].mxu0 }
0x1c13   :  { %5323 = vtanh.f32 %v2728_v59 }
0x1c1d   :  { %v5324_v44 = vpop.eup %5323 }
0x1c1e   :  { %v2732_v51 = vsel %vm501_vm6, %v5324_v44, %v2728_v59 }
0x1c1f   :  { %2740 = vrot.lane.b32.xlu1 %v2732_v51, %s5399_s25  ;;  %4139 = vst [vmem:[%s6738_s14 + $0x20] sm:$0xff] %v2732_v51  ;;  %2737 = vrot.lane.b32.xlu0 %v2732_v51, %s5397_s22 }
0x1c91   :  { %v2738_v33 = vpop.permute.xlu0 %2737  ;;  %v2741_v15 = vpop.permute.xlu1 %2740 }
0x1c92   :  { %v2739_v8 = vmul.f32 %v2738_v33, %v5602_v34  ;;  %v2742_v39 = vmul.f32 %v2741_v15, %v5610_v41 }
0x1c94   :  { %v5108_v46 = vpack.c.bf16 %v2732_v51, %v2739_v8 }
0x1c96   :  { %5109 = vmatpush3.bf16.msra.mxu0 %v5108_v46 }
0x1c97   :  { %4751 = vmatprep.subr.mxu0 %v5398_v3 }
0x1c9a   :  { %4752 = vmatpush3.msra.mxu0 %v2742_v39 }
0x1c9b   :  { %4754 = vmatmul.mubr.msk.f32.vlgmr.msra.gmra.mrb[38].mxu0 %vm211_vm2, %v6127_v25  ;;  %5110 = vmatprep.subr.bf16.mxu0 %v5400_v47 }
0x1c9c   :  { %4762 = vmatprep.mubr.msk.f32.mxu0 %vm5401_vm3, %v5398_v3 }
0x1d6e   :  { %v2812_v40 = vpop.f32.mrb[38].mxu0 }
0x1d6f   :  { %v2813_v22 = vadd.f32 %v2812_v40, %v6136_v26  ;;  %v4755_v52 = vpop.f32.mrb[39].mxu0 }
0x1d71   :  { %2820 = vrot.lane.b32.xlu1 %v2813_v22, %s5399_s25  ;;  %2817 = vrot.lane.b32.xlu0 %v2813_v22, %s5397_s22 }
0x1de3   :  { %v2818_v42 = vpop.permute.xlu0 %2817  ;;  %v2821_v43 = vpop.permute.xlu1 %2820 }
0x1de4   :  { %v2819_v2 = vmul.f32 %v2818_v42, %v5602_v34  ;;  %v2822_v50 = vmul.f32 %v2821_v43, %v5610_v41 }
0x1de6   :  { %v5111_v60 = vpack.c.bf16 %v2813_v22, %v2819_v2 }
0x1de8   :  { %5112 = vmatpush3.bf16.msra.mxu0 %v5111_v60 }
0x1de9   :  { %4760 = vmatprep.subr.mxu0 %v5398_v3 }
0x1dec   :  { %4761 = vmatpush3.msra.mxu0 %v2822_v50 }
0x1ded   :  { %4763 = vmatmul.mubr.msk.f32.vlgmr.msra.gmra.mrb[40].mxu0 %vm211_vm2, %v6147_v24  ;;  %5129 = vmatprep.subr.bf16.mxu0 %v5400_v47 }
0x1dee   :  { %4807 = vmatprep.mubr.msk.f32.mxu0 %vm5401_vm3, %v5398_v3 }
0x1ec0   :  { %v2892_v12 = vpop.f32.mrb[40].mxu0 }
0x1ec1   :  { %v2896_v36 = vadd.f32 %v2892_v12, %v5696_v9  ;;  %v4764_v63 = vpop.f32.mrb[41].mxu0 }
0x1ec3   :  { %v2898_v13 = vadd.f32 %v2896_v36, %v6157_v7 }
0x1ec5   :  { %5325 = vtanh.f32 %v2898_v13 }
0x1ecf   :  { %v5326_v18 = vpop.eup %5325 }
0x1ed0   :  { %2919 = vrot.lane.b32.xlu1 %v5326_v18, %s5399_s25  ;;  %2916 = vrot.lane.b32.xlu0 %v5326_v18, %s5397_s22  ;;  %v5117_v19 = vpack.c.bf16 %v5326_v18, %v6393_v14 }
0x1f42   :  { %v2917_v23 = vpop.permute.xlu0 %2916  ;;  %v2920_v31 = vpop.permute.xlu1 %2919 }
0x1f43   :  { %v2918_v0 = vmul.f32 %v2917_v23, %v5602_v34  ;;  %v2921_v9 = vmul.f32 %v2920_v31, %v5610_v41 }
0x1f45   :  { %v5113_v16 = vpack.c.bf16 %v6396_v17, %v2918_v0  ;;  %v5125_v59 = vpack.c.bf16 %v6405_v6, %v2921_v9 }
0x1f47   :  { %5114 = vmatprep.subr.bf16.mxu1 %v5113_v16 }
0x1f48   :  { %5116 = vmatpush3.bf16.msra.mxu1 %v5113_v16 }
0x1f49   :  { %5118 = vmatprep.subr.bf16.mxu1 %v5117_v19 }
0x1f4c   :  { %5120 = vmatpush3.bf16.msra.mxu1 %v5117_v19 }
0x1f4d   :  { %5122 = vmatprep.subr.bf16.mxu1 %v6388_v30 }
0x1f50   :  { %5124 = vmatpush3.bf16.msra.mxu1 %v6388_v30 }
0x1f51   :  { %5126 = vmatprep.subr.bf16.mxu1 %v5125_v59 }
0x1f54   :  { %5128 = vmatpush3.bf16.msra.mxu1 %v5125_v59 }
0x1f55   :  { %4781 = vmatprep.subr.mxu1 %v6402_v5 }
0x1f58   :  { %4782 = vmatpush3.msra.mxu1 %v6402_v5 }
0x1f59   :  { %4784 = vmatmul.mubr.msk.f32.vlgmr.msra.gmra.mrb[40].mxu1 %vm706_vm4, %v6281_v62  ;;  %5141 = vmatprep.subr.bf16.mxu1 %v5400_v47 }
0x1f5a   :  { %4786 = vmatprep.mubr.msk.f32.mxu1 %vm706_vm4, %v6286_v53 }
0x1f5d   :  { %4787 = vmatmul.mubr.msk.f32.gmra.mrb[42].mxu1 %vm706_vm4, %v6296_v57 }
0x1f5e   :  { %4789 = vmatprep.mubr.msk.f32.mxu1 %vm706_vm4, %v6301_v20 }
0x1f61   :  { %4790 = vmatmul.mubr.msk.f32.gmra.mrb[44].mxu1 %vm706_vm4, %v6310_v37 }
0x1f62   :  { %4792 = vmatprep.mubr.msk.f32.mxu1 %vm706_vm4, %v6315_v58 }
0x1f65   :  { %4793 = vmatmul.mubr.msk.f32.gmra.mrb[46].mxu1 %vm706_vm4, %v6324_v32 }
0x1f66   :  { %4825 = vmatprep.mubr.msk.f32.mxu1 %vm5401_vm3, %v5398_v3 }
0x202c   :  { %v4785_v30 = vpop.f32.mrb[40].mxu1 }
0x202d   :  { %v3018_v14 = vadd.f32 %v4785_v30, %v6333_v38  ;;  %v3012_v17 = vpop.f32.mrb[41].mxu1 }
0x202e   :  { %v3013_v5 = vadd.f32 %v3012_v17, %v6338_v61 }
0x202f   :  { %v3052_v6 = vmul.f32 0.5, %v3018_v14 }
0x2030   :  { %v3051_v55 = vmul.f32 0.5, %v3013_v5  ;;  %v4788_v44 = vpop.f32.mrb[42].mxu1 }
0x2031   :  { %v3028_v51 = vadd.f32 %v4788_v44, %v6345_v29  ;;  %v3022_v33 = vpop.f32.mrb[43].mxu1  ;;  %5327 = vtanh.f32 %v3052_v6 }
0x2032   :  { %v3023_v8 = vadd.f32 %v3022_v33, %v6350_v28  ;;  %5329 = vtanh.f32 %v3051_v55 }
0x2033   :  { %v3054_v46 = vmul.f32 0.5, %v3028_v51 }
0x2034   :  { %v3053_v15 = vmul.f32 0.5, %v3023_v8  ;;  %v4791_v39 = vpop.f32.mrb[44].mxu1 }
0x2035   :  { %5331 = vtanh.f32 %v3054_v46  ;;  %v3032_v40 = vpop.f32.mrb[45].mxu1  ;;  %v3038_v2 = vadd.f32 %v4791_v39, %v6362_v21 }
0x2036   :  { %5333 = vtanh.f32 %v3053_v15  ;;  %v3033_v43 = vadd.f32 %v3032_v40, %v6372_v45 }
0x2037   :  { %v3056_v36 = vmul.f32 0.5, %v3038_v2 }
0x2038   :  { %v4794_v22 = vpop.f32.mrb[46].mxu1  ;;  %v3055_v13 = vmul.f32 0.5, %v3033_v43 }
0x2039   :  { %v3048_v52 = vadd.f32 %v4794_v22, %v6357_v48  ;;  %v3042_v42 = vpop.f32.mrb[47].mxu1 }
0x203a   :  { %v3043_v60 = vadd.f32 %v3042_v42, %v6367_v49 }
0x203b   :  { %5335 = vtanh.f32 %v3048_v52  ;;  %v5328_v50 = vpop.eup %5327 }
0x203c   :  { %5337 = vtanh.f32 %v3043_v60  ;;  %v5330_v12 = vpop.eup %5329  ;;  %v3064_v23 = vadd.f32 1.0, %v5328_v50 }
0x203d   :  { %v3063_v16 = vadd.f32 1.0, %v5330_v12  ;;  %5339 = vtanh.f32 %v3056_v36 }
0x203e   :  { %5341 = vtanh.f32 %v3055_v13  ;;  %v3070_v59 = vmul.f32 0.5, %v3064_v23 }
0x203f   :  { %v5332_v63 = vpop.eup %5331  ;;  %v3069_v14 = vmul.f32 0.5, %v3063_v16 }
0x2040   :  { %v5334_v18 = vpop.eup %5333  ;;  %v3066_v0 = vadd.f32 1.0, %v5332_v63 }
0x2041   :  { %v3065_v19 = vadd.f32 1.0, %v5334_v18 }
0x2042   :  { %v3072_v31 = vmul.f32 0.5, %v3066_v0 }
0x2043   :  { %v3071_v9 = vmul.f32 0.5, %v3065_v19 }
0x2044   :  { %v3078_v5 = vmul.f32 %v3072_v31, %v6380_v35 }
0x2045   :  { %v5336_v30 = vpop.eup %5335  ;;  %v3077_v55 = vmul.f32 %v3071_v9, %v6382_v1 }
0x2046   :  { %v5338_v17 = vpop.eup %5337  ;;  %v3080_v6 = vmul.f32 %v5336_v30, %v3070_v59 }
0x2047   :  { %v3079_v44 = vmul.f32 %v5338_v17, %v3069_v14  ;;  %v5340_v8 = vpop.eup %5339 }
0x2048   :  { %v6493_v51 = vadd.f32 %v3080_v6, %v3078_v5  ;;  %v5342_v46 = vpop.eup %5341  ;;  %v3068_v15 = vadd.f32 1.0, %v5340_v8 }
0x2049   :  { %v6495_v33 = vadd.f32 %v3079_v44, %v3077_v55  ;;  %v3067_v39 = vadd.f32 1.0, %v5342_v46 }
0x204a   :  { %5343 = vtanh.f32 %v6493_v51  ;;  %v3074_v40 = vmul.f32 0.5, %v3068_v15 }
0x204b   :  { %5345 = vtanh.f32 %v6495_v33  ;;  %v3073_v52 = vmul.f32 0.5, %v3067_v39 }
0x2054   :  { %v5344_v22 = vpop.eup %5343 }
0x2055   :  { %v5346_v35 = vpop.eup %5345  ;;  %v3086_v42 = vmul.f32 %v5344_v22, %v3074_v40 }
0x2056   :  { %v3085_v2 = vmul.f32 %v5346_v35, %v3073_v52 }
0x2057   :  { %3091 = vrot.lane.b32.xlu1 %v3086_v42, %s5397_s22 }
0x2058   :  { %3089 = vrot.lane.b32.xlu0 %v3085_v2, %s5397_s22  ;;  %v6501_v1 = vpack.c.bf16 %v3086_v42, %v3085_v2 }
0x205b   :  { %3097 = vrot.lane.b32.xlu1 %v3086_v42, %s5399_s25 }
0x205c   :  { %3095 = vrot.lane.b32.xlu0 %v3085_v2, %s5399_s25 }
0x20c9   :  { %v3092_v60 = vpop.permute.xlu1 %3091 }
0x20ca   :  { %v6506_v43 = vmul.f32 %v3092_v60, %v5602_v34  ;;  %v3090_v50 = vpop.permute.xlu0 %3089 }
0x20cb   :  { %v3093_v12 = vmul.f32 %v3090_v50, %v5602_v34 }
0x20cd   :  { %v5130_v36 = vpack.c.bf16 %v6506_v43, %v3093_v12  ;;  %v3098_v63 = vpop.permute.xlu1 %3097 }
0x20ce   :  { %v3096_v13 = vpop.permute.xlu0 %3095  ;;  %v6512_v18 = vmul.f32 %v3098_v63, %v5610_v41 }
0x20cf   :  { %5131 = vmatpush3.bf16.msra.mxu0 %v5130_v36  ;;  %v3099_v23 = vmul.f32 %v3096_v13, %v5610_v41 }
0x20d0   :  { %5132 = vmatprep.subr.bf16.mxu0 %v5400_v47 }
0x20d1   :  { %v5136_v0 = vpack.c.bf16 %v6512_v18, %v3099_v23 }
0x20d3   :  { %5134 = vmatpush3.bf16.msra.mxu0 %v6501_v1 }
0x20d4   :  { %5135 = vmatprep.subr.bf16.mxu0 %v5400_v47 }
0x20d7   :  { %5137 = vmatpush3.bf16.msra.mxu0 %v5136_v0 }
0x20d8   :  { %5138 = vmatprep.subr.bf16.mxu0 %v5400_v47 }
0x20da   :  { %4808 = vmatmul.mubr.msk.f32.vlgmr.msra.gmra.mrb[42].mxu0 %vm886_vm5, %v6414_v27 }
0x20db   :  { %4816 = vmatprep.mubr.msk.f32.mxu0 %vm5401_vm3, %v5398_v3 }
0x21ad   :  { %v3170_v16 = vpop.f32.mrb[42].mxu0 }
0x21ae   :  { %v3171_v19 = vadd.f32 %v3170_v16, %v6424_v4  ;;  %v4809_v31 = vpop.f32.mrb[43].mxu0 }
0x21b0   :  { %5347 = vtanh.f32 %v3171_v19 }
0x21ba   :  { %v5348_v9 = vpop.eup %5347 }
0x21bb   :  { %v3175_v59 = vsel %vm501_vm6, %v5348_v9, %v3171_v19 }
0x21bc   :  { %3183 = vrot.lane.b32.xlu1 %v3175_v59, %s5399_s25  ;;  %4151 = vst [vmem:[%s6738_s14 + $0x28] sm:$0xff] %v3175_v59  ;;  %3180 = vrot.lane.b32.xlu0 %v3175_v59, %s5397_s22 }
0x222e   :  { %v3181_v30 = vpop.permute.xlu0 %3180  ;;  %v3184_v5 = vpop.permute.xlu1 %3183 }
0x222f   :  { %v3182_v14 = vmul.f32 %v3181_v30, %v5602_v34  ;;  %v3185_v6 = vmul.f32 %v3184_v5, %v5610_v41 }
0x2231   :  { %v5139_v17 = vpack.c.bf16 %v3175_v59, %v3182_v14 }
0x2233   :  { %5140 = vmatpush3.bf16.msra.mxu0 %v5139_v17 }
0x2234   :  { %4814 = vmatprep.subr.mxu0 %v5398_v3 }
0x2237   :  { %4815 = vmatpush3.msra.mxu0 %v3185_v6 }
0x2238   :  { %4817 = vmatmul.mubr.msk.f32.vlgmr.msra.gmra.mrb[44].mxu0 %vm211_vm2, %v6127_v25 }
0x2239   :  { %4846 = vmatprep.mubr.msk.f32.mxu0 %vm706_vm4, %v6266_v10 }
0x230b   :  { %v3255_v55 = vpop.f32.mrb[44].mxu0 }
0x230c   :  { %v3256_v44 = vadd.f32 %v3255_v55, %v6136_v26  ;;  %v4818_v8 = vpop.f32.mrb[45].mxu0 }
0x230e   :  { %3263 = vrot.lane.b32.xlu1 %v3256_v44, %s5399_s25  ;;  %3260 = vrot.lane.b32.xlu0 %v3256_v44, %s5397_s22 }
0x2380   :  { %v3261_v46 = vpop.permute.xlu0 %3260  ;;  %v3264_v40 = vpop.permute.xlu1 %3263 }
0x2381   :  { %v3262_v15 = vmul.f32 %v3261_v46, %v5602_v34  ;;  %v3265_v25 = vmul.f32 %v3264_v40, %v5610_v41 }
0x2383   :  { %v5142_v39 = vpack.c.bf16 %v3256_v44, %v3262_v15 }
0x2385   :  { %5143 = vmatpush3.bf16.msra.mxu1 %v5142_v39 }
0x2386   :  { %4823 = vmatprep.subr.mxu1 %v5398_v3 }
0x2389   :  { %4824 = vmatpush3.msra.mxu1 %v3265_v25 }
0x238a   :  { %4826 = vmatmul.mubr.msk.f32.vlgmr.msra.gmra.mrb[48].mxu1 %vm211_vm2, %v6147_v24  ;;  %5160 = vmatprep.subr.bf16.mxu1 %v5400_v47 }
0x238b   :  { %4870 = vmatprep.mubr.msk.f32.mxu1 %vm5401_vm3, %v5398_v3 }
0x245d   :  { %v3335_v26 = vpop.f32.mrb[48].mxu1 }
0x245e   :  { %v3339_v22 = vadd.f32 %v3335_v26, %v5712_v54  ;;  %v4827_v52 = vpop.f32.mrb[49].mxu1 }
0x2460   :  { %v3341_v35 = vadd.f32 %v3339_v22, %v6157_v7 }
0x2462   :  { %5349 = vtanh.f32 %v3341_v35 }
0x246c   :  { %v5350_v42 = vpop.eup %5349 }
0x246d   :  { %3362 = vrot.lane.b32.xlu1 %v5350_v42, %s5399_s25  ;;  %3359 = vrot.lane.b32.xlu0 %v5350_v42, %s5397_s22  ;;  %v5148_v50 = vpack.c.bf16 %v5350_v42, %v6506_v43 }
0x24df   :  { %v3360_v2 = vpop.permute.xlu0 %3359  ;;  %v3363_v36 = vpop.permute.xlu1 %3362 }
0x24e0   :  { %v3361_v24 = vmul.f32 %v3360_v2, %v5602_v34  ;;  %v3364_v54 = vmul.f32 %v3363_v36, %v5610_v41 }
0x24e2   :  { %v5144_v60 = vpack.c.bf16 %v3093_v12, %v3361_v24  ;;  %v5156_v7 = vpack.c.bf16 %v3099_v23, %v3364_v54 }
0x24e4   :  { %5145 = vmatprep.subr.bf16.mxu0 %v5144_v60 }
0x24e5   :  { %5147 = vmatpush3.bf16.msra.mxu0 %v5144_v60 }
0x24e6   :  { %5149 = vmatprep.subr.bf16.mxu0 %v5148_v50 }
0x24e9   :  { %5151 = vmatpush3.bf16.msra.mxu0 %v5148_v50 }
0x24ea   :  { %5153 = vmatprep.subr.bf16.mxu0 %v6501_v1 }
0x24ed   :  { %5155 = vmatpush3.bf16.msra.mxu0 %v6501_v1 }
0x24ee   :  { %5157 = vmatprep.subr.bf16.mxu0 %v5156_v7 }
0x24f1   :  { %5159 = vmatpush3.bf16.msra.mxu0 %v5156_v7 }
0x24f2   :  { %4844 = vmatprep.subr.mxu0 %v6512_v18 }
0x24f5   :  { %4845 = vmatpush3.msra.mxu0 %v6512_v18 }
0x24f6   :  { %4847 = vmatmul.mubr.msk.f32.vlgmr.msra.gmra.mrb[46].mxu0 %vm706_vm4, %v6281_v62 }
0x24f7   :  { %4849 = vmatprep.mubr.msk.f32.mxu0 %vm706_vm4, %v6286_v53 }
0x24fa   :  { %4850 = vmatmul.mubr.msk.f32.gmra.mrb[48].mxu0 %vm706_vm4, %v6296_v57 }
0x24fb   :  { %4852 = vmatprep.mubr.msk.f32.mxu0 %vm706_vm4, %v6301_v20 }
0x24fe   :  { %4853 = vmatmul.mubr.msk.f32.gmra.mrb[50].mxu0 %vm706_vm4, %v6310_v37 }
0x24ff   :  { %4855 = vmatprep.mubr.msk.f32.mxu0 %vm706_vm4, %v6315_v58 }
0x2502   :  { %4856 = vmatmul.mubr.msk.f32.gmra.mrb[52].mxu0 %vm706_vm4, %v6324_v32 }
0x2503   :  { %4909 = vmatprep.mubr.msk.f32.mxu0 %vm706_vm4, %v6266_v10 }
0x25c9   :  { %v4848_v1 = vpop.f32.mrb[46].mxu0 }
0x25ca   :  { %v3461_v43 = vadd.f32 %v4848_v1, %v6333_v38  ;;  %v3455_v12 = vpop.f32.mrb[47].mxu0 }
0x25cb   :  { %v3456_v63 = vadd.f32 %v3455_v12, %v6338_v61 }
0x25cc   :  { %v3495_v13 = vmul.f32 0.5, %v3461_v43 }
0x25cd   :  { %v3494_v18 = vmul.f32 0.5, %v3456_v63  ;;  %v4851_v23 = vpop.f32.mrb[48].mxu0 }
0x25ce   :  { %v3471_v0 = vadd.f32 %v4851_v23, %v6345_v29  ;;  %v3465_v16 = vpop.f32.mrb[49].mxu0  ;;  %5351 = vtanh.f32 %v3495_v13 }
0x25cf   :  { %v3466_v19 = vadd.f32 %v3465_v16, %v6350_v28  ;;  %5353 = vtanh.f32 %v3494_v18 }
0x25d0   :  { %v3497_v31 = vmul.f32 0.5, %v3471_v0 }
0x25d1   :  { %v3496_v9 = vmul.f32 0.5, %v3466_v19  ;;  %v4854_v59 = vpop.f32.mrb[50].mxu0 }
0x25d2   :  { %5355 = vtanh.f32 %v3497_v31  ;;  %v3475_v10 = vpop.f32.mrb[51].mxu0  ;;  %v3481_v5 = vadd.f32 %v4854_v59, %v6362_v21 }
0x25d3   :  { %5357 = vtanh.f32 %v3496_v9  ;;  %v3476_v55 = vadd.f32 %v3475_v10, %v6372_v45 }
0x25d4   :  { %v3499_v46 = vmul.f32 0.5, %v3481_v5 }
0x25d5   :  { %v4857_v30 = vpop.f32.mrb[52].mxu0  ;;  %v3498_v39 = vmul.f32 0.5, %v3476_v55 }
0x25d6   :  { %v3491_v14 = vadd.f32 %v4857_v30, %v6357_v48  ;;  %v3485_v17 = vpop.f32.mrb[53].mxu0 }
0x25d7   :  { %v3486_v6 = vadd.f32 %v3485_v17, %v6367_v49 }
0x25d8   :  { %5359 = vtanh.f32 %v3491_v14  ;;  %v5352_v44 = vpop.eup %5351 }
0x25d9   :  { %5361 = vtanh.f32 %v3486_v6  ;;  %v5354_v8 = vpop.eup %5353  ;;  %v3507_v25 = vadd.f32 1.0, %v5352_v44 }
0x25da   :  { %v3506_v22 = vadd.f32 1.0, %v5354_v8  ;;  %5363 = vtanh.f32 %v3499_v46 }
0x25db   :  { %5365 = vtanh.f32 %v3498_v39  ;;  %v3513_v2 = vmul.f32 0.5, %v3507_v25 }
0x25dc   :  { %v5356_v15 = vpop.eup %5355  ;;  %v3512_v60 = vmul.f32 0.5, %v3506_v22 }
0x25dd   :  { %v5358_v40 = vpop.eup %5357  ;;  %v3509_v26 = vadd.f32 1.0, %v5356_v15 }
0x25de   :  { %v3508_v52 = vadd.f32 1.0, %v5358_v40 }
0x25df   :  { %v3515_v35 = vmul.f32 0.5, %v3509_v26 }
0x25e0   :  { %v3514_v42 = vmul.f32 0.5, %v3508_v52 }
0x25e1   :  { %v3521_v36 = vmul.f32 %v3515_v35, %v6493_v51 }
0x25e2   :  { %v5360_v24 = vpop.eup %5359  ;;  %v3520_v7 = vmul.f32 %v3514_v42, %v6495_v33 }
0x25e3   :  { %v5362_v50 = vpop.eup %5361  ;;  %v3523_v54 = vmul.f32 %v5360_v24, %v3513_v2  ;;  %v3621_v2 = vld [vmem:[%s6728_s5] sm:$0xff] }
0x25e4   :  { %v3522_v1 = vmul.f32 %v5362_v50, %v3512_v60  ;;  %v5364_v63 = vpop.eup %5363  ;;  %v3622_v24 = vld [vmem:[%s6729_s6] sm:$0xff] }
0x25e5   :  { %v6586_v43 = vadd.f32 %v3523_v54, %v3521_v36  ;;  %v5366_v13 = vpop.eup %5365  ;;  %v3511_v18 = vadd.f32 1.0, %v5364_v63 }
0x25e6   :  { %v6588_v12 = vadd.f32 %v3522_v1, %v3520_v7  ;;  %v3510_v23 = vadd.f32 1.0, %v5366_v13 }
0x25e7   :  { %5367 = vtanh.f32 %v6586_v43  ;;  %v3517_v0 = vmul.f32 0.5, %v3511_v18  ;;  %v3702_v18 = vld [vmem:[%s6730_s8] sm:$0xff] }
0x25e8   :  { %5369 = vtanh.f32 %v6588_v12  ;;  %v3516_v19 = vmul.f32 0.5, %v3510_v23 }
0x25f1   :  { %v5368_v16 = vpop.eup %5367 }
0x25f2   :  { %v5370_v51 = vpop.eup %5369  ;;  %v3529_v31 = vmul.f32 %v5368_v16, %v3517_v0  ;;  %v3783_v0 = vld [vmem:[%s6732_s9] sm:$0xff] }
0x25f3   :  { %v3528_v9 = vmul.f32 %v5370_v51, %v3516_v19 }
0x25f4   :  { %3534 = vrot.lane.b32.xlu1 %v3529_v31, %s5397_s22 }
0x25f5   :  { %3532 = vrot.lane.b32.xlu0 %v3528_v9, %s5397_s22  ;;  %v6594_v33 = vpack.c.bf16 %v3529_v31, %v3528_v9 }
0x25f8   :  { %3540 = vrot.lane.b32.xlu1 %v3529_v31, %s5399_s25 }
0x25f9   :  { %3538 = vrot.lane.b32.xlu0 %v3528_v9, %s5399_s25 }
0x2666   :  { %v3535_v59 = vpop.permute.xlu1 %3534 }
0x2667   :  { %v6599_v10 = vmul.f32 %v3535_v59, %v5602_v34  ;;  %v3533_v30 = vpop.permute.xlu0 %3532 }
0x2668   :  { %v6602_v14 = vmul.f32 %v3533_v30, %v5602_v34 }
0x266a   :  { %v5161_v17 = vpack.c.bf16 %v6599_v10, %v6602_v14  ;;  %v3541_v5 = vpop.permute.xlu1 %3540 }
0x266b   :  { %v3539_v6 = vpop.permute.xlu0 %3538  ;;  %v6608_v55 = vmul.f32 %v3541_v5, %v5610_v41 }
0x266c   :  { %5162 = vmatpush3.bf16.msra.mxu1 %v5161_v17  ;;  %v6611_v44 = vmul.f32 %v3539_v6, %v5610_v41 }
0x266d   :  { %5163 = vmatprep.subr.bf16.mxu1 %v5400_v47 }
0x266e   :  { %v5167_v8 = vpack.c.bf16 %v6608_v55, %v6611_v44 }
0x2670   :  { %5165 = vmatpush3.bf16.msra.mxu1 %v6594_v33 }
0x2671   :  { %5166 = vmatprep.subr.bf16.mxu1 %v5400_v47 }
0x2674   :  { %5168 = vmatpush3.bf16.msra.mxu1 %v5167_v8 }
0x2675   :  { %5169 = vmatprep.subr.bf16.mxu1 %v5400_v47 }
0x2677   :  { %4871 = vmatmul.mubr.msk.f32.vlgmr.msra.gmra.mrb[50].mxu1 %vm886_vm5, %v6414_v27 }
0x2678   :  { %4879 = vmatprep.mubr.msk.f32.mxu1 %vm5401_vm3, %v5398_v3 }
0x274a   :  { %v3613_v46 = vpop.f32.mrb[50].mxu1 }
0x274b   :  { %v3614_v15 = vadd.f32 %v3613_v46, %v6424_v4  ;;  %v4872_v39 = vpop.f32.mrb[51].mxu1 }
0x274d   :  { %5371 = vtanh.f32 %v3614_v15 }
0x2757   :  { %v5372_v40 = vpop.eup %5371 }
0x2758   :  { %v3618_v25 = vsel %vm501_vm6, %v5372_v40, %v3614_v15 }
0x2759   :  { %3626 = vrot.lane.b32.xlu1 %v3618_v25, %s5399_s25  ;;  %4163 = vst [vmem:[%s6738_s14 + $0x30] sm:$0xff] %v3618_v25  ;;  %3623 = vrot.lane.b32.xlu0 %v3618_v25, %s5397_s22 }
0x27cb   :  { %v3624_v26 = vpop.permute.xlu0 %3623  ;;  %v3627_v35 = vpop.permute.xlu1 %3626 }
0x27cc   :  { %v3625_v22 = vmul.f32 %v3624_v26, %v5602_v34  ;;  %v3628_v42 = vmul.f32 %v3627_v35, %v5610_v41 }
0x27ce   :  { %v5170_v52 = vpack.c.bf16 %v3618_v25, %v3625_v22 }
0x27d0   :  { %5171 = vmatpush3.bf16.msra.mxu1 %v5170_v52 }
0x27d1   :  { %4877 = vmatprep.subr.mxu1 %v5398_v3 }
0x27d4   :  { %4878 = vmatpush3.msra.mxu1 %v3628_v42 }
0x27d5   :  { %4880 = vmatmul.mubr.msk.f32.vlgmr.msra.gmra.mrb[52].mxu1 %vm211_vm2, %v3621_v2  ;;  %5172 = vmatprep.subr.bf16.mxu1 %v5400_v47 }
0x27d6   :  { %4888 = vmatprep.mubr.msk.f32.mxu1 %vm5401_vm3, %v5398_v3 }
0x28a8   :  { %v3698_v60 = vpop.f32.mrb[52].mxu1 }
0x28a9   :  { %v3699_v50 = vadd.f32 %v3698_v60, %v3622_v24  ;;  %v4881_v36 = vpop.f32.mrb[53].mxu1 }
0x28ab   :  { %3703 = vrot.lane.b32.xlu0 %v3699_v50, %s5397_s22  ;;  %3706 = vrot.lane.b32.xlu1 %v3699_v50, %s5399_s25 }
0x291d   :  { %v3704_v54 = vpop.permute.xlu0 %3703  ;;  %v3707_v63 = vpop.permute.xlu1 %3706 }
0x291e   :  { %v3705_v7 = vmul.f32 %v3704_v54, %v5602_v34  ;;  %v3708_v13 = vmul.f32 %v3707_v63, %v5610_v41 }
0x2920   :  { %v5173_v1 = vpack.c.bf16 %v3699_v50, %v3705_v7 }
0x2922   :  { %5174 = vmatpush3.bf16.msra.mxu1 %v5173_v1 }
0x2923   :  { %4886 = vmatprep.subr.mxu1 %v5398_v3 }
0x2926   :  { %4887 = vmatpush3.msra.mxu1 %v3708_v13 }
0x2927   :  { %4889 = vmatmul.mubr.msk.f32.vlgmr.msra.gmra.mrb[54].mxu1 %vm211_vm2, %v3702_v18  ;;  %5191 = vmatprep.subr.bf16.mxu1 %v5400_v47 }
0x2928   :  { %4933 = vmatprep.mubr.msk.f32.mxu1 %vm5401_vm3, %v5398_v3 }
0x29fa   :  { %v3778_v23 = vpop.f32.mrb[54].mxu1 }
0x29fb   :  { %v3782_v16 = vadd.f32 %v3778_v23, %v5714_v56  ;;  %v4890_v19 = vpop.f32.mrb[55].mxu1 }
0x29fd   :  { %v3784_v51 = vadd.f32 %v3783_v0, %v3782_v16 }
0x29ff   :  { %5373 = vtanh.f32 %v3784_v51 }
0x2a09   :  { %v5374_v31 = vpop.eup %5373 }
0x2a0a   :  { %3805 = vrot.lane.b32.xlu1 %v5374_v31, %s5399_s25  ;;  %3802 = vrot.lane.b32.xlu0 %v5374_v31, %s5397_s22  ;;  %v5179_v30 = vpack.c.bf16 %v5374_v31, %v6599_v10 }
0x2a7c   :  { %v3803_v9 = vpop.permute.xlu0 %3802  ;;  %v3806_v17 = vpop.permute.xlu1 %3805 }
0x2a7d   :  { %v3804_v59 = vmul.f32 %v3803_v9, %v5602_v34  ;;  %v3807_v56 = vmul.f32 %v3806_v17, %v5610_v41 }
0x2a7f   :  { %v5175_v3 = vpack.c.bf16 %v6602_v14, %v3804_v59  ;;  %v5187_v5 = vpack.c.bf16 %v6611_v44, %v3807_v56 }
0x2a81   :  { %5176 = vmatprep.subr.bf16.mxu0 %v5175_v3 }
0x2a82   :  { %5178 = vmatpush3.bf16.msra.mxu0 %v5175_v3 }
0x2a83   :  { %5180 = vmatprep.subr.bf16.mxu0 %v5179_v30 }
0x2a86   :  { %5182 = vmatpush3.bf16.msra.mxu0 %v5179_v30 }
0x2a87   :  { %5184 = vmatprep.subr.bf16.mxu0 %v6594_v33 }
0x2a8a   :  { %5186 = vmatpush3.bf16.msra.mxu0 %v6594_v33 }
0x2a8b   :  { %5188 = vmatprep.subr.bf16.mxu0 %v5187_v5 }
0x2a8e   :  { %5190 = vmatpush3.bf16.msra.mxu0 %v5187_v5 }
0x2a8f   :  { %4907 = vmatprep.subr.mxu0 %v6608_v55 }
0x2a92   :  { %4908 = vmatpush3.msra.mxu0 %v6608_v55 }
0x2a93   :  { %4910 = vmatmul.mubr.msk.f32.vlgmr.msra.gmra.mrb[54].mxu0 %vm706_vm4, %v6281_v62 }
0x2a94   :  { %4912 = vmatprep.mubr.msk.f32.mxu0 %vm706_vm4, %v6286_v53 }
0x2a97   :  { %4913 = vmatmul.mubr.msk.f32.gmra.mrb[56].mxu0 %vm706_vm4, %v6296_v57 }
0x2a98   :  { %4915 = vmatprep.mubr.msk.f32.mxu0 %vm706_vm4, %v6301_v20 }
0x2a9b   :  { %4916 = vmatmul.mubr.msk.f32.gmra.mrb[58].mxu0 %vm706_vm4, %v6310_v37 }
0x2a9c   :  { %4918 = vmatprep.mubr.msk.f32.mxu0 %vm706_vm4, %v6315_v58 }
0x2a9f   :  { %4919 = vmatmul.mubr.msk.f32.gmra.mrb[60].mxu0 %vm706_vm4, %v6324_v32 }
0x2b66   :  { %v4911_v33 = vpop.f32.mrb[54].mxu0 }
0x2b67   :  { %v3904_v62 = vadd.f32 %v4911_v33, %v6333_v38  ;;  %v3898_v10 = vpop.f32.mrb[55].mxu0 }
0x2b68   :  { %v3899_v53 = vadd.f32 %v3898_v10, %v6338_v61 }
0x2b69   :  { %v3938_v14 = vmul.f32 0.5, %v3904_v62 }
0x2b6a   :  { %v3937_v57 = vmul.f32 0.5, %v3899_v53  ;;  %v4914_v6 = vpop.f32.mrb[56].mxu0 }
0x2b6b   :  { %v3914_v20 = vadd.f32 %v4914_v6, %v6345_v29  ;;  %v3908_v55 = vpop.f32.mrb[57].mxu0  ;;  %5375 = vtanh.f32 %v3938_v14 }
0x2b6c   :  { %v3909_v37 = vadd.f32 %v3908_v55, %v6350_v28  ;;  %5377 = vtanh.f32 %v3937_v57 }
0x2b6d   :  { %v3940_v44 = vmul.f32 0.5, %v3914_v20 }
0x2b6e   :  { %v3939_v58 = vmul.f32 0.5, %v3909_v37  ;;  %v4917_v8 = vpop.f32.mrb[58].mxu0 }
0x2b6f   :  { %5379 = vtanh.f32 %v3940_v44  ;;  %v3918_v32 = vpop.f32.mrb[59].mxu0  ;;  %v3924_v15 = vadd.f32 %v4917_v8, %v6362_v21 }
0x2b70   :  { %5381 = vtanh.f32 %v3939_v58  ;;  %v3919_v29 = vadd.f32 %v3918_v32, %v6372_v45 }
0x2b71   :  { %v3942_v25 = vmul.f32 0.5, %v3924_v15 }
0x2b72   :  { %v4920_v38 = vpop.f32.mrb[60].mxu0  ;;  %v3941_v22 = vmul.f32 0.5, %v3919_v29 }
0x2b73   :  { %v3934_v46 = vadd.f32 %v4920_v38, %v6357_v48  ;;  %v3928_v61 = vpop.f32.mrb[61].mxu0 }
0x2b74   :  { %v3929_v39 = vadd.f32 %v3928_v61, %v6367_v49 }
0x2b75   :  { %5383 = vtanh.f32 %v3934_v46  ;;  %v5376_v28 = vpop.eup %5375 }
0x2b76   :  { %5385 = vtanh.f32 %v3929_v39  ;;  %v5378_v40 = vpop.eup %5377  ;;  %v3950_v35 = vadd.f32 1.0, %v5376_v28 }
0x2b77   :  { %v3949_v2 = vadd.f32 1.0, %v5378_v40  ;;  %5387 = vtanh.f32 %v3942_v25 }
0x2b78   :  { %5389 = vtanh.f32 %v3941_v22  ;;  %v3956_v21 = vmul.f32 0.5, %v3950_v35 }
0x2b79   :  { %v5380_v26 = vpop.eup %5379  ;;  %v3955_v50 = vmul.f32 0.5, %v3949_v2 }
0x2b7a   :  { %v5382_v52 = vpop.eup %5381  ;;  %v3952_v42 = vadd.f32 1.0, %v5380_v26 }
0x2b7b   :  { %v3951_v24 = vadd.f32 1.0, %v5382_v52 }
0x2b7c   :  { %v3958_v48 = vmul.f32 0.5, %v3952_v42 }
0x2b7d   :  { %v3957_v60 = vmul.f32 0.5, %v3951_v24 }
0x2b7e   :  { %v3964_v36 = vmul.f32 %v3958_v48, %v6586_v43 }
0x2b7f   :  { %v5384_v49 = vpop.eup %5383  ;;  %v3963_v7 = vmul.f32 %v3957_v60, %v6588_v12 }
0x2b80   :  { %v5386_v45 = vpop.eup %5385  ;;  %v3966_v54 = vmul.f32 %v5384_v49, %v3956_v21 }
0x2b81   :  { %v3965_v1 = vmul.f32 %v5386_v45, %v3955_v50  ;;  %v5388_v18 = vpop.eup %5387 }
0x2b82   :  { %v3968_v63 = vadd.f32 %v3966_v54, %v3964_v36  ;;  %v5390_v23 = vpop.eup %5389  ;;  %v3954_v0 = vadd.f32 1.0, %v5388_v18 }
0x2b83   :  { %v3967_v13 = vadd.f32 %v3965_v1, %v3963_v7  ;;  %v3953_v43 = vadd.f32 1.0, %v5390_v23 }
0x2b84   :  { %5391 = vtanh.f32 %v3968_v63  ;;  %4067 = vst [vmem:[%s6739_s15 + $0x18] sm:$0xff] %v3968_v63  ;;  %v3960_v16 = vmul.f32 0.5, %v3954_v0 }
0x2b85   :  { %5393 = vtanh.f32 %v3967_v13  ;;  %4066 = vst [vmem:[%s6739_s15 + $0x10] sm:$0xff] %v3967_v13  ;;  %v3959_v12 = vmul.f32 0.5, %v3953_v43 }
0x2b8e   :  { %v5392_v19 = vpop.eup %5391 }
0x2b8f   :  { %v5394_v51 = vpop.eup %5393  ;;  %v3972_v31 = vmul.f32 %v5392_v19, %v3960_v16 }
0x2b90   :  { %v3971_v9 = vmul.f32 %v5394_v51, %v3959_v12 }
0x2b91   :  { %3977 = vrot.lane.b32.xlu1 %v3972_v31, %s5397_s22  ;;  %4065 = vst [vmem:[%s6739_s15 + $0x8] sm:$0xff] %v3972_v31 }
0x2b92   :  { %3975 = vrot.lane.b32.xlu0 %v3971_v9, %s5397_s22  ;;  %4064 = vst [vmem:[%s6739_s15] sm:$0xff] %v3971_v9  ;;  %v5195_v59 = vpack.c.bf16 %v3972_v31, %v3971_v9 }
0x2b95   :  { %3983 = vrot.lane.b32.xlu1 %v3972_v31, %s5399_s25 }
0x2b96   :  { %3981 = vrot.lane.b32.xlu0 %v3971_v9, %s5399_s25 }
0x2c03   :  { %v3978_v3 = vpop.permute.xlu1 %3977 }
0x2c04   :  { %v3980_v30 = vmul.f32 %v3978_v3, %v5602_v34  ;;  %v3976_v17 = vpop.permute.xlu0 %3975 }
0x2c05   :  { %v3979_v56 = vmul.f32 %v3976_v17, %v5602_v34 }
0x2c07   :  { %v5192_v5 = vpack.c.bf16 %v3980_v30, %v3979_v56  ;;  %v3984_v33 = vpop.permute.xlu1 %3983 }
0x2c08   :  { %v3982_v62 = vpop.permute.xlu0 %3981  ;;  %v3986_v10 = vmul.f32 %v3984_v33, %v5610_v41 }
0x2c09   :  { %5193 = vmatpush3.bf16.msra.mxu1 %v5192_v5  ;;  %v3985_v53 = vmul.f32 %v3982_v62, %v5610_v41 }
0x2c0a   :  { %5194 = vmatprep.subr.bf16.mxu1 %v5400_v47 }
0x2c0b   :  { %v5198_v14 = vpack.c.bf16 %v3986_v10, %v3985_v53 }
0x2c0d   :  { %5196 = vmatpush3.bf16.msra.mxu1 %v5195_v59 }
0x2c0e   :  { %5197 = vmatprep.subr.bf16.mxu1 %v5400_v47 }
0x2c11   :  { %5199 = vmatpush3.bf16.msra.mxu1 %v5198_v14 }
0x2c14   :  { %4934 = vmatmul.mubr.msk.f32.vlgmr.msra.gmra.mrb[56].mxu1 %vm886_vm5, %v6414_v27 }
0x2ce7   :  { %v4056_v57 = vpop.f32.mrb[56].mxu1 }
0x2ce8   :  { %v4057_v34 = vadd.f32 %v4056_v57, %v6424_v4  ;;  %v4935_v6 = vpop.f32.mrb[57].mxu1 }
0x2cea   :  { %5395 = vtanh.f32 %v4057_v34 }
0x2cf4   :  { %v5396_v20 = vpop.eup %5395 }
0x2cf5   :  { %v4061_v55 = vsel %vm501_vm6, %v5396_v20, %v4057_v34 }
0x2cf6   :  { %4175 = vst [vmem:[%s6738_s14 + $0x38] sm:$0xff] %v4061_v55 }

</bundles_post_ra>
